<compile_context>
chip_gen: v7x
topology: tpu7x:2x2x1
jax: 0.10.0
libtpu: 0.0.40
codegen_flags: <defaults>
</compile_context>

<pallas_src>
import jax
import jax.numpy as jnp
from jax.experimental import pallas as pl
from jax.experimental.pallas import tpu as pltpu

EPS = 1e-5
NEG_SLOPE = 0.2

LATENT_DIM = 64
H1, H2, H3 = 256, 512, 1024
OUT_FEATS = 784          # 28 * 28
OUT_PAD = 896            # 7 * 128 -> lane-dense padded output width


def _leaky_relu(x):
    return jnp.where(x > 0, x, NEG_SLOPE * x)


def _batch_norm(x, gamma, beta):
    # Training-mode BatchNorm1d: stats over the batch axis, biased variance.
    # Form (x - mu) once and reuse it for both the variance and the normalize.
    mu = jnp.mean(x, axis=0, keepdims=True)
    xc = x - mu
    var = jnp.mean(xc * xc, axis=0, keepdims=True)
    return xc * jax.lax.rsqrt(var + EPS) * gamma + beta


def generator_kernel(z_ref,
                     w1_ref, b1_ref, g1_ref, be1_ref,
                     w2_ref, b2_ref, g2_ref, be2_ref,
                     w3_hbm, b3_ref, g3_ref, be3_ref,
                     w4_hbm, b4_ref,
                     out_ref,
                     w3_vmem, w4_vmem, sem):
    # Kick off DMAs for the two big bf16 weight matrices immediately so their
    # HBM->VMEM transfer (the bulk of all bytes) overlaps block-1/2 compute.
    cp3 = pltpu.make_async_copy(w3_hbm, w3_vmem, sem.at[0])
    cp4 = pltpu.make_async_copy(w4_hbm, w4_vmem, sem.at[1])
    cp3.start()
    cp4.start()

    # Block 1: Linear(latent, 256) -> LeakyReLU(0.2) -> BatchNorm1d(256)
    h = jnp.dot(z_ref[...].astype(jnp.bfloat16), w1_ref[...],
                preferred_element_type=jnp.float32)
    h = h + b1_ref[...]
    h = _batch_norm(_leaky_relu(h), g1_ref[...], be1_ref[...])

    # Block 2: Linear(256, 512) -> LeakyReLU(0.2) -> BatchNorm1d(512)
    h = jnp.dot(h.astype(jnp.bfloat16), w2_ref[...],
                preferred_element_type=jnp.float32)
    h = h + b2_ref[...]
    h = _batch_norm(_leaky_relu(h), g2_ref[...], be2_ref[...])

    # Block 3: Linear(512, 1024) -> LeakyReLU(0.2) -> BatchNorm1d(1024)
    cp3.wait()
    h = jnp.dot(h.astype(jnp.bfloat16), w3_vmem[...],
                preferred_element_type=jnp.float32)
    h = h + b3_ref[...]
    h = _batch_norm(_leaky_relu(h), g3_ref[...], be3_ref[...])

    # Output: Linear(1024, 896-padded) -> Tanh  (padded cols sliced off outside)
    cp4.wait()
    h = jnp.dot(h.astype(jnp.bfloat16), w4_vmem[...],
                preferred_element_type=jnp.float32)
    h = h + b4_ref[...]
    out_ref[...] = jnp.tanh(h)


def generator_forward(z, params):
    """Runs the whole Generator MLP in a single Pallas kernel (fits VMEM)."""
    B = z.shape[0]
    flat_args = (z,) + tuple(params)

    vmem = pl.BlockSpec(memory_space=pltpu.MemorySpace.VMEM)
    hbm = pl.BlockSpec(memory_space=pl.ANY)
    # params layout: w1 b1 g1 be1 | w2 b2 g2 be2 | w3 b3 g3 be3 | w4 b4
    in_specs = [vmem,                       # z
                vmem, vmem, vmem, vmem,     # block 1
                vmem, vmem, vmem, vmem,     # block 2
                hbm,  vmem, vmem, vmem,     # block 3 (w3 stays in HBM, manual DMA)
                hbm,  vmem]                 # output  (w4 stays in HBM, manual DMA)

    flops = 2 * B * (LATENT_DIM * H1 + H1 * H2 + H2 * H3 + H3 * OUT_PAD)
    bytes_accessed = (z.size * z.dtype.itemsize
                      + sum(int(p.size) * p.dtype.itemsize for p in params)
                      + B * OUT_PAD * 4)
    cost = pl.CostEstimate(flops=flops,
                           transcendentals=B * (OUT_PAD + H1 + H2 + H3),
                           bytes_accessed=bytes_accessed)

    img_flat = pl.pallas_call(
        generator_kernel,
        out_shape=jax.ShapeDtypeStruct((B, OUT_PAD), jnp.float32),
        in_specs=in_specs,
        out_specs=vmem,
        scratch_shapes=[pltpu.VMEM((H2, H3), jnp.bfloat16),      # w3 landing buf
                        pltpu.VMEM((H3, OUT_PAD), jnp.bfloat16),  # w4 landing buf
                        pltpu.SemaphoreType.DMA((2,))],
        compiler_params=pltpu.CompilerParams(vmem_limit_bytes=32 << 20),
        cost_estimate=cost,
    )(*flat_args)

    # Glue: drop lane padding, match PyTorch img.view(B, 1, 28, 28) (NCHW).
    return img_flat[:, :OUT_FEATS].reshape(B, 1, 28, 28)


def init_params(key, latent_dim):
    dims = [(latent_dim, H1), (H1, H2), (H2, H3), (H3, OUT_FEATS)]
    params = []
    for i, (fin, fout) in enumerate(dims):
        kw, kb, kg, kbeta, key = jax.random.split(key, 5)
        scale = 1.0 / jnp.sqrt(jnp.float32(fin))
        w = jax.random.uniform(kw, (fin, fout), jnp.float32, -scale, scale)
        b = jax.random.uniform(kb, (1, fout), jnp.float32, -scale, scale)
        if i == 3:
            # Pad the output layer to a lane-dense 896 (= 7 * 128) columns.
            w = jnp.pad(w, ((0, 0), (0, OUT_PAD - OUT_FEATS)))
            b = jnp.pad(b, ((0, 0), (0, OUT_PAD - OUT_FEATS)))
        params += [w.astype(jnp.bfloat16), b]   # weights bf16, biases f32
        if i < 3:  # hidden layers have BatchNorm affine params (kept f32)
            g = 1.0 + 0.1 * jax.random.normal(kg, (1, fout), jnp.float32)
            be = 0.1 * jax.random.normal(kbeta, (1, fout), jnp.float32)
            params += [g, be]
    return params


def reference_forward(z, params):
    """Pure-JAX reference mirroring the kernel numerics (bf16 dots, f32 acc)."""
    (w1, b1, g1, be1, w2, b2, g2, be2, w3, b3, g3, be3, w4, b4) = params

    def lin(x, w, b):
        return jnp.dot(x.astype(jnp.bfloat16), w,
                       preferred_element_type=jnp.float32) + b

    h = _batch_norm(_leaky_relu(lin(z, w1, b1)), g1, be1)
    h = _batch_norm(_leaky_relu(lin(h, w2, b2)), g2, be2)
    h = _batch_norm(_leaky_relu(lin(h, w3, b3)), g3, be3)
    h = jnp.tanh(lin(h, w4, b4))
    return h[:, :OUT_FEATS].reshape(z.shape[0], 1, 28, 28)


if __name__ == "__main__":
    latent_dim = LATENT_DIM
    batch = 8

    key = jax.random.PRNGKey(0)
    kz, kp = jax.random.split(key)
    z = jax.random.normal(kz, (batch, latent_dim), jnp.float32)
    params = init_params(kp, latent_dim)

    img = generator_forward(z, params)
    img = jax.block_until_ready(img)

    ref = reference_forward(z, params)
    assert img.shape == (batch, 1, 28, 28)
    err = float(jnp.max(jnp.abs(img - ref)))
    assert jnp.allclose(img, ref, atol=2e-2, rtol=2e-2), err

    print("KERNEL_OK")
</pallas_src>

<mosaic_0001>
module attributes {stable_mosaic.version = 11 : i64} {
  func.func @generator_kernel(%arg0: memref<8x64xf32, #tpu.memory_space<vmem>>, %arg1: memref<64x256xbf16, #tpu.memory_space<vmem>>, %arg2: memref<1x256xf32, #tpu.memory_space<vmem>>, %arg3: memref<1x256xf32, #tpu.memory_space<vmem>>, %arg4: memref<1x256xf32, #tpu.memory_space<vmem>>, %arg5: memref<256x512xbf16, #tpu.memory_space<vmem>>, %arg6: memref<1x512xf32, #tpu.memory_space<vmem>>, %arg7: memref<1x512xf32, #tpu.memory_space<vmem>>, %arg8: memref<1x512xf32, #tpu.memory_space<vmem>>, %arg9: memref<512x1024xbf16, #tpu.memory_space<any>>, %arg10: memref<1x1024xf32, #tpu.memory_space<vmem>>, %arg11: memref<1x1024xf32, #tpu.memory_space<vmem>>, %arg12: memref<1x1024xf32, #tpu.memory_space<vmem>>, %arg13: memref<1024x896xbf16, #tpu.memory_space<any>>, %arg14: memref<1x896xf32, #tpu.memory_space<vmem>>, %arg15: memref<8x896xf32, #tpu.memory_space<vmem>>, %arg16: memref<512x1024xbf16, #tpu.memory_space<vmem>>, %arg17: memref<1024x896xbf16, #tpu.memory_space<vmem>>, %arg18: memref<2x!tpu.dma_semaphore, #tpu.memory_space<semaphore_mem>>) attributes {dimension_semantics = [], scalar_prefetch = 0 : i64, scratch_operands = 3 : i64, tpu.core_type = #tpu.core_type<tc>} {
    %c0_i32 = arith.constant 0 : i32
    %0 = tpu.memref_slice %arg18[%c0_i32] : memref<2x!tpu.dma_semaphore, #tpu.memory_space<semaphore_mem>> -> memref<1x!tpu.dma_semaphore, #tpu.memory_space<semaphore_mem>>
    %1 = tpu.memref_squeeze %0 : memref<1x!tpu.dma_semaphore, #tpu.memory_space<semaphore_mem>> -> memref<!tpu.dma_semaphore, #tpu.memory_space<semaphore_mem>>
    tpu.enqueue_dma source(%arg9 : memref<512x1024xbf16, #tpu.memory_space<any>>) target(%arg16 : memref<512x1024xbf16, #tpu.memory_space<vmem>>) target_semaphore(%1 : memref<!tpu.dma_semaphore, #tpu.memory_space<semaphore_mem>>)
    %c1_i32 = arith.constant 1 : i32
    %2 = tpu.memref_slice %arg18[%c1_i32] : memref<2x!tpu.dma_semaphore, #tpu.memory_space<semaphore_mem>> -> memref<1x!tpu.dma_semaphore, #tpu.memory_space<semaphore_mem>>
    %3 = tpu.memref_squeeze %2 : memref<1x!tpu.dma_semaphore, #tpu.memory_space<semaphore_mem>> -> memref<!tpu.dma_semaphore, #tpu.memory_space<semaphore_mem>>
    tpu.enqueue_dma source(%arg13 : memref<1024x896xbf16, #tpu.memory_space<any>>) target(%arg17 : memref<1024x896xbf16, #tpu.memory_space<vmem>>) target_semaphore(%3 : memref<!tpu.dma_semaphore, #tpu.memory_space<semaphore_mem>>)
    %c0 = arith.constant 0 : index
    %c0_0 = arith.constant 0 : index
    %4 = vector.load %arg0[%c0, %c0_0] : memref<8x64xf32, #tpu.memory_space<vmem>>, vector<8x64xf32>
    %5 = arith.truncf %4 : vector<8x64xf32> to vector<8x64xbf16>
    %c0_1 = arith.constant 0 : index
    %c0_2 = arith.constant 0 : index
    %6 = vector.load %arg1[%c0_1, %c0_2] : memref<64x256xbf16, #tpu.memory_space<vmem>>, vector<64x256xbf16>
    %cst = arith.constant dense<0.000000e+00> : vector<8x256xf32>
    %7 = tpu.matmul %5, %6, %cst {dimension_numbers = #tpu.dot_dimension_numbers<[1], [0], [0], [1], [0, 0, 1, 1], [], []>} : vector<8x64xbf16>, vector<64x256xbf16>, vector<8x256xf32> -> vector<8x256xf32>
    %c0_3 = arith.constant 0 : index
    %c0_4 = arith.constant 0 : index
    %8 = vector.load %arg2[%c0_3, %c0_4] : memref<1x256xf32, #tpu.memory_space<vmem>>, vector<1x256xf32>
    %9 = vector.broadcast %8 : vector<1x256xf32> to vector<8x256xf32>
    %10 = arith.addf %7, %9 : vector<8x256xf32>
    %cst_5 = arith.constant 0.000000e+00 : f32
    %11 = vector.broadcast %cst_5 : f32 to vector<8x256xf32>
    %12 = arith.cmpf ogt, %10, %11 : vector<8x256xf32>
    %cst_6 = arith.constant 2.000000e-01 : f32
    %13 = vector.broadcast %cst_6 : f32 to vector<8x256xf32>
    %14 = arith.mulf %13, %10 : vector<8x256xf32>
    %15 = arith.select %12, %10, %14 : vector<8x256xi1>, vector<8x256xf32>
    %c0_7 = arith.constant 0 : index
    %c0_8 = arith.constant 0 : index
    %16 = vector.load %arg3[%c0_7, %c0_8] : memref<1x256xf32, #tpu.memory_space<vmem>>, vector<1x256xf32>
    %c0_9 = arith.constant 0 : index
    %c0_10 = arith.constant 0 : index
    %17 = vector.load %arg4[%c0_9, %c0_10] : memref<1x256xf32, #tpu.memory_space<vmem>>, vector<1x256xf32>
    %cst_11 = arith.constant dense<0.000000e+00> : vector<256xf32>
    %18 = vector.multi_reduction <add>, %15, %cst_11 [0] : vector<8x256xf32> to vector<256xf32>
    %19 = vector.shape_cast %18 : vector<256xf32> to vector<1x256xf32>
    %cst_12 = arith.constant 8.000000e+00 : f32
    %20 = vector.broadcast %cst_12 : f32 to vector<1x256xf32>
    %21 = arith.divf %19, %20 : vector<1x256xf32>
    %22 = vector.broadcast %21 : vector<1x256xf32> to vector<8x256xf32>
    %23 = arith.subf %15, %22 : vector<8x256xf32>
    %24 = arith.mulf %23, %23 : vector<8x256xf32>
    %cst_13 = arith.constant dense<0.000000e+00> : vector<256xf32>
    %25 = vector.multi_reduction <add>, %24, %cst_13 [0] : vector<8x256xf32> to vector<256xf32>
    %26 = vector.shape_cast %25 : vector<256xf32> to vector<1x256xf32>
    %cst_14 = arith.constant 8.000000e+00 : f32
    %27 = vector.broadcast %cst_14 : f32 to vector<1x256xf32>
    %28 = arith.divf %26, %27 : vector<1x256xf32>
    %cst_15 = arith.constant 9.99999974E-6 : f32
    %29 = vector.broadcast %cst_15 : f32 to vector<1x256xf32>
    %30 = arith.addf %28, %29 : vector<1x256xf32>
    %31 = math.rsqrt %30 : vector<1x256xf32>
    %32 = vector.broadcast %31 : vector<1x256xf32> to vector<8x256xf32>
    %33 = arith.mulf %23, %32 : vector<8x256xf32>
    %34 = vector.broadcast %16 : vector<1x256xf32> to vector<8x256xf32>
    %35 = arith.mulf %33, %34 : vector<8x256xf32>
    %36 = vector.broadcast %17 : vector<1x256xf32> to vector<8x256xf32>
    %37 = arith.addf %35, %36 : vector<8x256xf32>
    %38 = arith.truncf %37 : vector<8x256xf32> to vector<8x256xbf16>
    %c0_16 = arith.constant 0 : index
    %c0_17 = arith.constant 0 : index
    %39 = vector.load %arg5[%c0_16, %c0_17] : memref<256x512xbf16, #tpu.memory_space<vmem>>, vector<256x512xbf16>
    %cst_18 = arith.constant dense<0.000000e+00> : vector<8x512xf32>
    %40 = tpu.matmul %38, %39, %cst_18 {dimension_numbers = #tpu.dot_dimension_numbers<[1], [0], [0], [1], [0, 0, 1, 1], [], []>} : vector<8x256xbf16>, vector<256x512xbf16>, vector<8x512xf32> -> vector<8x512xf32>
    %c0_19 = arith.constant 0 : index
    %c0_20 = arith.constant 0 : index
    %41 = vector.load %arg6[%c0_19, %c0_20] : memref<1x512xf32, #tpu.memory_space<vmem>>, vector<1x512xf32>
    %42 = vector.broadcast %41 : vector<1x512xf32> to vector<8x512xf32>
    %43 = arith.addf %40, %42 : vector<8x512xf32>
    %cst_21 = arith.constant 0.000000e+00 : f32
    %44 = vector.broadcast %cst_21 : f32 to vector<8x512xf32>
    %45 = arith.cmpf ogt, %43, %44 : vector<8x512xf32>
    %cst_22 = arith.constant 2.000000e-01 : f32
    %46 = vector.broadcast %cst_22 : f32 to vector<8x512xf32>
    %47 = arith.mulf %46, %43 : vector<8x512xf32>
    %48 = arith.select %45, %43, %47 : vector<8x512xi1>, vector<8x512xf32>
    %c0_23 = arith.constant 0 : index
    %c0_24 = arith.constant 0 : index
    %49 = vector.load %arg7[%c0_23, %c0_24] : memref<1x512xf32, #tpu.memory_space<vmem>>, vector<1x512xf32>
    %c0_25 = arith.constant 0 : index
    %c0_26 = arith.constant 0 : index
    %50 = vector.load %arg8[%c0_25, %c0_26] : memref<1x512xf32, #tpu.memory_space<vmem>>, vector<1x512xf32>
    %cst_27 = arith.constant dense<0.000000e+00> : vector<512xf32>
    %51 = vector.multi_reduction <add>, %48, %cst_27 [0] : vector<8x512xf32> to vector<512xf32>
    %52 = vector.shape_cast %51 : vector<512xf32> to vector<1x512xf32>
    %cst_28 = arith.constant 8.000000e+00 : f32
    %53 = vector.broadcast %cst_28 : f32 to vector<1x512xf32>
    %54 = arith.divf %52, %53 : vector<1x512xf32>
    %55 = vector.broadcast %54 : vector<1x512xf32> to vector<8x512xf32>
    %56 = arith.subf %48, %55 : vector<8x512xf32>
    %57 = arith.mulf %56, %56 : vector<8x512xf32>
    %cst_29 = arith.constant dense<0.000000e+00> : vector<512xf32>
    %58 = vector.multi_reduction <add>, %57, %cst_29 [0] : vector<8x512xf32> to vector<512xf32>
    %59 = vector.shape_cast %58 : vector<512xf32> to vector<1x512xf32>
    %cst_30 = arith.constant 8.000000e+00 : f32
    %60 = vector.broadcast %cst_30 : f32 to vector<1x512xf32>
    %61 = arith.divf %59, %60 : vector<1x512xf32>
    %cst_31 = arith.constant 9.99999974E-6 : f32
    %62 = vector.broadcast %cst_31 : f32 to vector<1x512xf32>
    %63 = arith.addf %61, %62 : vector<1x512xf32>
    %64 = math.rsqrt %63 : vector<1x512xf32>
    %65 = vector.broadcast %64 : vector<1x512xf32> to vector<8x512xf32>
    %66 = arith.mulf %56, %65 : vector<8x512xf32>
    %67 = vector.broadcast %49 : vector<1x512xf32> to vector<8x512xf32>
    %68 = arith.mulf %66, %67 : vector<8x512xf32>
    %69 = vector.broadcast %50 : vector<1x512xf32> to vector<8x512xf32>
    %70 = arith.addf %68, %69 : vector<8x512xf32>
    %c0_i32_32 = arith.constant 0 : i32
    %71 = tpu.memref_slice %arg18[%c0_i32_32] : memref<2x!tpu.dma_semaphore, #tpu.memory_space<semaphore_mem>> -> memref<1x!tpu.dma_semaphore, #tpu.memory_space<semaphore_mem>>
    %72 = tpu.memref_squeeze %71 : memref<1x!tpu.dma_semaphore, #tpu.memory_space<semaphore_mem>> -> memref<!tpu.dma_semaphore, #tpu.memory_space<semaphore_mem>>
    tpu.wait_dma2 semaphore(%72 : memref<!tpu.dma_semaphore, #tpu.memory_space<semaphore_mem>>) src(%arg9 : memref<512x1024xbf16, #tpu.memory_space<any>>) dst(%arg16 : memref<512x1024xbf16, #tpu.memory_space<vmem>>)
    %73 = arith.truncf %70 : vector<8x512xf32> to vector<8x512xbf16>
    %c0_33 = arith.constant 0 : index
    %c0_34 = arith.constant 0 : index
    %74 = vector.load %arg16[%c0_33, %c0_34] : memref<512x1024xbf16, #tpu.memory_space<vmem>>, vector<512x1024xbf16>
    %cst_35 = arith.constant dense<0.000000e+00> : vector<8x1024xf32>
    %75 = tpu.matmul %73, %74, %cst_35 {dimension_numbers = #tpu.dot_dimension_numbers<[1], [0], [0], [1], [0, 0, 1, 1], [], []>} : vector<8x512xbf16>, vector<512x1024xbf16>, vector<8x1024xf32> -> vector<8x1024xf32>
    %c0_36 = arith.constant 0 : index
    %c0_37 = arith.constant 0 : index
    %76 = vector.load %arg10[%c0_36, %c0_37] : memref<1x1024xf32, #tpu.memory_space<vmem>>, vector<1x1024xf32>
    %77 = vector.broadcast %76 : vector<1x1024xf32> to vector<8x1024xf32>
    %78 = arith.addf %75, %77 : vector<8x1024xf32>
    %cst_38 = arith.constant 0.000000e+00 : f32
    %79 = vector.broadcast %cst_38 : f32 to vector<8x1024xf32>
    %80 = arith.cmpf ogt, %78, %79 : vector<8x1024xf32>
    %cst_39 = arith.constant 2.000000e-01 : f32
    %81 = vector.broadcast %cst_39 : f32 to vector<8x1024xf32>
    %82 = arith.mulf %81, %78 : vector<8x1024xf32>
    %83 = arith.select %80, %78, %82 : vector<8x1024xi1>, vector<8x1024xf32>
    %c0_40 = arith.constant 0 : index
    %c0_41 = arith.constant 0 : index
    %84 = vector.load %arg11[%c0_40, %c0_41] : memref<1x1024xf32, #tpu.memory_space<vmem>>, vector<1x1024xf32>
    %c0_42 = arith.constant 0 : index
    %c0_43 = arith.constant 0 : index
    %85 = vector.load %arg12[%c0_42, %c0_43] : memref<1x1024xf32, #tpu.memory_space<vmem>>, vector<1x1024xf32>
    %cst_44 = arith.constant dense<0.000000e+00> : vector<1024xf32>
    %86 = vector.multi_reduction <add>, %83, %cst_44 [0] : vector<8x1024xf32> to vector<1024xf32>
    %87 = vector.shape_cast %86 : vector<1024xf32> to vector<1x1024xf32>
    %cst_45 = arith.constant 8.000000e+00 : f32
    %88 = vector.broadcast %cst_45 : f32 to vector<1x1024xf32>
    %89 = arith.divf %87, %88 : vector<1x1024xf32>
    %90 = vector.broadcast %89 : vector<1x1024xf32> to vector<8x1024xf32>
    %91 = arith.subf %83, %90 : vector<8x1024xf32>
    %92 = arith.mulf %91, %91 : vector<8x1024xf32>
    %cst_46 = arith.constant dense<0.000000e+00> : vector<1024xf32>
    %93 = vector.multi_reduction <add>, %92, %cst_46 [0] : vector<8x1024xf32> to vector<1024xf32>
    %94 = vector.shape_cast %93 : vector<1024xf32> to vector<1x1024xf32>
    %cst_47 = arith.constant 8.000000e+00 : f32
    %95 = vector.broadcast %cst_47 : f32 to vector<1x1024xf32>
    %96 = arith.divf %94, %95 : vector<1x1024xf32>
    %cst_48 = arith.constant 9.99999974E-6 : f32
    %97 = vector.broadcast %cst_48 : f32 to vector<1x1024xf32>
    %98 = arith.addf %96, %97 : vector<1x1024xf32>
    %99 = math.rsqrt %98 : vector<1x1024xf32>
    %100 = vector.broadcast %99 : vector<1x1024xf32> to vector<8x1024xf32>
    %101 = arith.mulf %91, %100 : vector<8x1024xf32>
    %102 = vector.broadcast %84 : vector<1x1024xf32> to vector<8x1024xf32>
    %103 = arith.mulf %101, %102 : vector<8x1024xf32>
    %104 = vector.broadcast %85 : vector<1x1024xf32> to vector<8x1024xf32>
    %105 = arith.addf %103, %104 : vector<8x1024xf32>
    %c1_i32_49 = arith.constant 1 : i32
    %106 = tpu.memref_slice %arg18[%c1_i32_49] : memref<2x!tpu.dma_semaphore, #tpu.memory_space<semaphore_mem>> -> memref<1x!tpu.dma_semaphore, #tpu.memory_space<semaphore_mem>>
    %107 = tpu.memref_squeeze %106 : memref<1x!tpu.dma_semaphore, #tpu.memory_space<semaphore_mem>> -> memref<!tpu.dma_semaphore, #tpu.memory_space<semaphore_mem>>
    tpu.wait_dma2 semaphore(%107 : memref<!tpu.dma_semaphore, #tpu.memory_space<semaphore_mem>>) src(%arg13 : memref<1024x896xbf16, #tpu.memory_space<any>>) dst(%arg17 : memref<1024x896xbf16, #tpu.memory_space<vmem>>)
    %108 = arith.truncf %105 : vector<8x1024xf32> to vector<8x1024xbf16>
    %c0_50 = arith.constant 0 : index
    %c0_51 = arith.constant 0 : index
    %109 = vector.load %arg17[%c0_50, %c0_51] : memref<1024x896xbf16, #tpu.memory_space<vmem>>, vector<1024x896xbf16>
    %cst_52 = arith.constant dense<0.000000e+00> : vector<8x896xf32>
    %110 = tpu.matmul %108, %109, %cst_52 {dimension_numbers = #tpu.dot_dimension_numbers<[1], [0], [0], [1], [0, 0, 1, 1], [], []>} : vector<8x1024xbf16>, vector<1024x896xbf16>, vector<8x896xf32> -> vector<8x896xf32>
    %c0_53 = arith.constant 0 : index
    %c0_54 = arith.constant 0 : index
    %111 = vector.load %arg14[%c0_53, %c0_54] : memref<1x896xf32, #tpu.memory_space<vmem>>, vector<1x896xf32>
    %112 = vector.broadcast %111 : vector<1x896xf32> to vector<8x896xf32>
    %113 = arith.addf %110, %112 : vector<8x896xf32>
    %114 = math.tanh %113 : vector<8x896xf32>
    %c0_55 = arith.constant 0 : index
    %c0_56 = arith.constant 0 : index
    %115 = vector.load %arg15[%c0_55, %c0_56] : memref<8x896xf32, #tpu.memory_space<vmem>>, vector<8x896xf32>
    tpu.vector_store %arg15[%c0_55, %c0_56], %114 {strides = array<i32>} : memref<8x896xf32, #tpu.memory_space<vmem>>, vector<8x896xf32>,
    return
  }
}

</mosaic_0001>

<bundles_post_ra>
// kernel: tpu_custom_call.1
= control target key start
LH: loop header
LB: loop body
LE: loop exit
PB: predicated region body
PF: predicated region fallthrough
CT: control target
= control target key end

     0   :  { %s4482_s0 = inlined_call_operand.hbm [shape: f32[8,64], index: 0, kind: input, shape index: {}]   ;;  %s4483_s1 = inlined_call_operand.hbm [shape: bf16[64,256], index: 1, kind: input, shape index: {}]   ;;  %s4484_s2 = inlined_call_operand.hbm [shape: f32[1,256], index: 2, kind: input, shape index: {}]   ;;  %s4485_s3 = inlined_call_operand.hbm [shape: f32[1,256], index: 3, kind: input, shape index: {}]   ;;  %s4486_s4 = inlined_call_operand.hbm [shape: f32[1,256], index: 4, kind: input, shape index: {}]   ;;  %s4487_s5 = inlined_call_operand.hbm [shape: bf16[256,512], index: 5, kind: input, shape index: {}]   ;;  %s4488_s6 = inlined_call_operand.hbm [shape: f32[1,512], index: 6, kind: input, shape index: {}]   ;;  %s4489_s7 = inlined_call_operand.hbm [shape: f32[1,512], index: 7, kind: input, shape index: {}]   ;;  %s4490_s8 = inlined_call_operand.hbm [shape: f32[1,512], index: 8, kind: input, shape index: {}]   ;;  %s4491_s9 = inlined_call_operand.hbm [shape: bf16[512,1024], index: 9, kind: input, shape index: {}]   ;;  %s4492_s10 = inlined_call_operand.hbm [shape: f32[1,1024], index: 10, kind: input, shape index: {}]   ;;  %s4493_s11 = inlined_call_operand.hbm [shape: f32[1,1024], index: 11, kind: input, shape index: {}]   ;;  %s4494_s12 = inlined_call_operand.hbm [shape: f32[1,1024], index: 12, kind: input, shape index: {}]   ;;  %s4495_s13 = inlined_call_operand.hbm [shape: bf16[1024,896], index: 13, kind: input, shape index: {}]   ;;  %s4496_s14 = inlined_call_operand.hbm [shape: f32[1,896], index: 14, kind: input, shape index: {}]   ;;  %s4497_s15 = inlined_call_operand.hbm [shape: f32[8,896], index: 15, kind: output, shape index: {}]  }
   0x1   :  { %4499 = sst [smem:[#allocation41_spill]] %s4497_s15 }
   0x2   :  { %20 = vsyncpa [#allocation6], 0 }
   0x3   :  { %21 = vsyncpa [#allocation9], 0 }
   0x4   :  { %22 = vsyncpa [#allocation12], 0 }
   0x5   :  { %23 = vsyncpa [#allocation15], 0 }
   0x6   :  { %24 = vsyncpa [#allocation18], 0 }
   0x7   :  { %25 = vsyncpa [#allocation21], 0 }
   0x8   :  { %26 = vsyncpa [#allocation24], 0 }
   0x9   :  { %27 = vsyncpa [#allocation7], 0  ;;  %s3933_s18 = smov [#allocation8]   ;;  %s3605_s22 = scalar_lea.hbm %s4483_s1, 1024 }
   0xa   :  { %s43_s19 = sshll.u32 %s3933_s18, 4  ;;  %p3606_p0 = scmp.ne.s32.totalorder %s4483_s1, %s3605_s22  ;;  %s44_s19 = int_to_ptr.vmem [resolvable:$true] %s43_s19 }
   0xb   :  { %p3609_p1 = scmp.lt.u32.totalorder %s3605_s22, %s4483_s1 }
   0xd   :  { %p3611_p2 = pnand %p3609_p1, %p3606_p0 }
   0xf   :  { %3614 = shalt.err (!%p3611_p2)
}
  0x10   :  { %s3615_s27 = scalar_lea.vmem %s44_s19, 1024  ;;  %p3620_p4 = scmp.lt.s32.totalorder %s44_s19, %s44_s19 }
  0x11   :  { %p3616_p3 = scmp.ne.s32.totalorder %s44_s19, %s3615_s27  ;;  %p3621_p5 = scmp.lt.s32.totalorder %s3615_s27, %s3615_s27 }
  0x13   :  { %p3622_p6 = por %p3621_p5, %p3620_p4 }
  0x15   :  { %p3623_p7 = pnand %p3622_p6, %p3616_p3 }
  0x17   :  { %3626 = shalt.err (!%p3623_p7)
}
  0x18   :  { %s3934_s28 = smov 128   ;;  %s3935_s29 = smov 8  }
  0x19   :  { %49 = dma.hbm_to_vmem [thread:$0]  %s4483_s1, 1024, %s44_s19, [#allocation9], %s3934_s28, %s3934_s28, %s3935_s29  }
  0x1a   :  { %s3936_s17 = smov [#allocation11]   ;;  %s3937_s20 = smov [#allocation14]  }
  0x1b   :  { %s66_s18 = sshll.u32 %s3936_s17, 4  ;;  %s85_s21 = sshll.u32 %s3937_s20, 4  ;;  %s67_s18 = int_to_ptr.vmem [resolvable:$true] %s66_s18  ;;  %s86_s21 = int_to_ptr.vmem [resolvable:$true] %s85_s21 }
  0x1c   :  { %s3627_s24 = scalar_lea.hbm %s4485_s3, 32 }
  0x1d   :  { %p3628_p8 = scmp.ne.s32.totalorder %s4485_s3, %s3627_s24  ;;  %p3631_p9 = scmp.lt.u32.totalorder %s3627_s24, %s4485_s3 }
  0x1f   :  { %p3633_p10 = pnand %p3631_p9, %p3628_p8 }
  0x21   :  { %3636 = shalt.err (!%p3633_p10)
}
  0x22   :  { %s3637_s1 = scalar_lea.vmem %s67_s18, 32  ;;  %p3642_p12 = scmp.lt.s32.totalorder %s67_s18, %s67_s18 }
  0x23   :  { %p3638_p11 = scmp.ne.s32.totalorder %s67_s18, %s3637_s1  ;;  %p3643_p13 = scmp.lt.s32.totalorder %s3637_s1, %s3637_s1 }
  0x25   :  { %p3644_p0 = por %p3643_p13, %p3642_p12 }
  0x27   :  { %p3645_p1 = pnand %p3644_p0, %p3638_p11 }
  0x29   :  { %3648 = shalt.err (!%p3645_p1)
}
  0x2a   :  { %69 = dma.hbm_to_vmem [thread:$0]  %s4485_s3, 32, %s67_s18, [#allocation12]  }
  0x2b   :  { %s3649_s20 = scalar_lea.hbm %s4487_s5, 8192 }
  0x2c   :  { %p3650_p2 = scmp.ne.s32.totalorder %s4487_s5, %s3649_s20  ;;  %p3653_p3 = scmp.lt.u32.totalorder %s3649_s20, %s4487_s5 }
  0x2e   :  { %p3655_p4 = pnand %p3653_p3, %p3650_p2 }
  0x30   :  { %3658 = shalt.err (!%p3655_p4)
}
  0x31   :  { %s3659_s25 = scalar_lea.vmem %s86_s21, 8192  ;;  %p3664_p6 = scmp.lt.s32.totalorder %s86_s21, %s86_s21 }
  0x32   :  { %p3660_p5 = scmp.ne.s32.totalorder %s86_s21, %s3659_s25  ;;  %p3665_p7 = scmp.lt.s32.totalorder %s3659_s25, %s3659_s25 }
  0x34   :  { %p3666_p8 = por %p3665_p7, %p3664_p6 }
  0x36   :  { %p3667_p9 = pnand %p3666_p8, %p3660_p5 }
  0x38   :  { %3670 = shalt.err (!%p3667_p9)
}
  0x39   :  { %s3938_s3 = smov 256   ;;  %s3939_s18 = smov 16  }
  0x3a   :  { %91 = dma.hbm_to_vmem [thread:$0]  %s4487_s5, 8192, %s86_s21, [#allocation15], %s3938_s3, %s3938_s3, %s3939_s18  }
  0x3b   :  { %s3940_s1 = smov [#allocation17]   ;;  %s3941_s30 = smov [#allocation20]  }
  0x3c   :  { %s108_s19 = sshll.u32 %s3940_s1, 4  ;;  %s128_s16 = sshll.u32 %s3941_s30, 4  ;;  %s109_s19 = int_to_ptr.vmem [resolvable:$true] %s108_s19  ;;  %s129_s16 = int_to_ptr.vmem [resolvable:$true] %s128_s16 }
  0x3d   :  { %s3671_s15 = scalar_lea.hbm %s4489_s7, 64 }
  0x3e   :  { %p3672_p10 = scmp.ne.s32.totalorder %s4489_s7, %s3671_s15  ;;  %p3675_p11 = scmp.lt.u32.totalorder %s3671_s15, %s4489_s7 }
  0x40   :  { %p3677_p12 = pnand %p3675_p11, %p3672_p10 }
  0x42   :  { %3680 = shalt.err (!%p3677_p12)
}
  0x43   :  { %s3681_s5 = scalar_lea.vmem %s109_s19, 64  ;;  %p3686_p0 = scmp.lt.s32.totalorder %s109_s19, %s109_s19 }
  0x44   :  { %p3682_p13 = scmp.ne.s32.totalorder %s109_s19, %s3681_s5  ;;  %p3687_p1 = scmp.lt.s32.totalorder %s3681_s5, %s3681_s5 }
  0x46   :  { %p3688_p2 = por %p3687_p1, %p3686_p0 }
  0x48   :  { %p3689_p3 = pnand %p3688_p2, %p3682_p13 }
  0x4a   :  { %3692 = shalt.err (!%p3689_p3)
}
  0x4b   :  { %111 = dma.hbm_to_vmem [thread:$0]  %s4489_s7, 64, %s109_s19, [#allocation18]  }
  0x4c   :  { %s3693_s27 = scalar_lea.hbm %s4492_s10, 128 }
  0x4d   :  { %p3694_p4 = scmp.ne.s32.totalorder %s4492_s10, %s3693_s27  ;;  %p3697_p5 = scmp.lt.u32.totalorder %s3693_s27, %s4492_s10 }
  0x4f   :  { %p3699_p6 = pnand %p3697_p5, %p3694_p4 }
  0x51   :  { %3702 = shalt.err (!%p3699_p6)
}
  0x52   :  { %s3703_s15 = scalar_lea.vmem %s129_s16, 128  ;;  %p3708_p8 = scmp.lt.s32.totalorder %s129_s16, %s129_s16 }
  0x53   :  { %p3704_p7 = scmp.ne.s32.totalorder %s129_s16, %s3703_s15  ;;  %p3709_p9 = scmp.lt.s32.totalorder %s3703_s15, %s3703_s15 }
  0x55   :  { %p3710_p10 = por %p3709_p9, %p3708_p8 }
  0x57   :  { %p3711_p11 = pnand %p3710_p10, %p3704_p7 }
  0x59   :  { %3714 = shalt.err (!%p3711_p11)
}
  0x5a   :  { %131 = dma.hbm_to_vmem [thread:$0]  %s4492_s10, 128, %s129_s16, [#allocation21]  }
  0x5b   :  { %s3942_s22 = smov [#allocation23]   ;;  %s3943_s24 = smov [#allocation5]  }
  0x5c   :  { %s148_s23 = sshll.u32 %s3942_s22, 4  ;;  %s34_s25 = sshll.u32 %s3943_s24, 4  ;;  %s149_s23 = int_to_ptr.vmem [resolvable:$true] %s148_s23  ;;  %s35_s25 = int_to_ptr.vmem [resolvable:$true] %s34_s25 }
  0x5d   :  { %s3715_s3 = scalar_lea.hbm %s4494_s12, 128 }
  0x5e   :  { %p3716_p12 = scmp.ne.s32.totalorder %s4494_s12, %s3715_s3  ;;  %p3719_p13 = scmp.lt.u32.totalorder %s3715_s3, %s4494_s12 }
  0x60   :  { %p3721_p0 = pnand %p3719_p13, %p3716_p12 }
  0x62   :  { %3724 = shalt.err (!%p3721_p0)
}
  0x63   :  { %s3725_s10 = scalar_lea.vmem %s149_s23, 128  ;;  %p3730_p2 = scmp.lt.s32.totalorder %s149_s23, %s149_s23 }
  0x64   :  { %p3726_p1 = scmp.ne.s32.totalorder %s149_s23, %s3725_s10  ;;  %p3731_p3 = scmp.lt.s32.totalorder %s3725_s10, %s3725_s10 }
  0x66   :  { %p3732_p4 = por %p3731_p3, %p3730_p2 }
  0x68   :  { %p3733_p5 = pnand %p3732_p4, %p3726_p1 }
  0x6a   :  { %3736 = shalt.err (!%p3733_p5)
}
  0x6b   :  { %151 = dma.hbm_to_vmem [thread:$0]  %s4494_s12, 128, %s149_s23, [#allocation24]  }
  0x6c   :  { %s3737_s15 = scalar_lea.hbm %s4482_s0, 128 }
  0x6d   :  { %p3738_p6 = scmp.ne.s32.totalorder %s4482_s0, %s3737_s15  ;;  %p3741_p7 = scmp.lt.u32.totalorder %s3737_s15, %s4482_s0 }
  0x6f   :  { %p3743_p8 = pnand %p3741_p7, %p3738_p6 }
  0x71   :  { %3746 = shalt.err (!%p3743_p8)
}
  0x72   :  { %s3747_s5 = scalar_lea.vmem %s35_s25, 128  ;;  %p3752_p10 = scmp.lt.s32.totalorder %s35_s25, %s35_s25 }
  0x73   :  { %p3748_p9 = scmp.ne.s32.totalorder %s35_s25, %s3747_s5  ;;  %p3753_p11 = scmp.lt.s32.totalorder %s3747_s5, %s3747_s5 }
  0x75   :  { %p3754_p12 = por %p3753_p11, %p3752_p10 }
  0x77   :  { %p3755_p13 = pnand %p3754_p12, %p3748_p9 }
  0x79   :  { %3758 = shalt.err (!%p3755_p13)
}
  0x7a   :  { %37 = dma.hbm_to_vmem [thread:$0]  %s4482_s0, 128, %s35_s25, [#allocation6]  }
  0x7b   :  { %s3944_s21 = smov [#allocation10]   ;;  %s3945_s18 = smov [#allocation13]  }
  0x7c   :  { %s56_s3 = sshll.u32 %s3944_s21, 4  ;;  %s76_s26 = sshll.u32 %s3945_s18, 4  ;;  %s57_s3 = int_to_ptr.vmem [resolvable:$true] %s56_s3  ;;  %s77_s26 = int_to_ptr.vmem [resolvable:$true] %s76_s26 }
  0x7d   :  { %s3759_s10 = scalar_lea.hbm %s4484_s2, 32 }
  0x7e   :  { %p3760_p0 = scmp.ne.s32.totalorder %s4484_s2, %s3759_s10  ;;  %p3763_p1 = scmp.lt.u32.totalorder %s3759_s10, %s4484_s2 }
  0x80   :  { %p3765_p2 = pnand %p3763_p1, %p3760_p0 }
  0x82   :  { %3768 = shalt.err (!%p3765_p2)
}
  0x83   :  { %s3769_s0 = scalar_lea.vmem %s57_s3, 32  ;;  %p3774_p4 = scmp.lt.s32.totalorder %s57_s3, %s57_s3 }
  0x84   :  { %p3770_p3 = scmp.ne.s32.totalorder %s57_s3, %s3769_s0  ;;  %p3775_p5 = scmp.lt.s32.totalorder %s3769_s0, %s3769_s0 }
  0x86   :  { %p3776_p6 = por %p3775_p5, %p3774_p4 }
  0x88   :  { %p3777_p7 = pnand %p3776_p6, %p3770_p3 }
  0x8a   :  { %3780 = shalt.err (!%p3777_p7)
}
  0x8b   :  { %59 = dma.hbm_to_vmem [thread:$0]  %s4484_s2, 32, %s57_s3, [#allocation9]  }
  0x8c   :  { %s3781_s22 = scalar_lea.hbm %s4486_s4, 32 }
  0x8d   :  { %p3782_p8 = scmp.ne.s32.totalorder %s4486_s4, %s3781_s22  ;;  %p3785_p9 = scmp.lt.u32.totalorder %s3781_s22, %s4486_s4 }
  0x8f   :  { %p3787_p10 = pnand %p3785_p9, %p3782_p8 }
  0x91   :  { %3790 = shalt.err (!%p3787_p10)
}
  0x92   :  { %s3791_s21 = scalar_lea.vmem %s77_s26, 32  ;;  %p3796_p12 = scmp.lt.s32.totalorder %s77_s26, %s77_s26 }
  0x93   :  { %p3792_p11 = scmp.ne.s32.totalorder %s77_s26, %s3791_s21  ;;  %p3797_p13 = scmp.lt.s32.totalorder %s3791_s21, %s3791_s21 }
  0x95   :  { %p3798_p0 = por %p3797_p13, %p3796_p12 }
  0x97   :  { %p3799_p1 = pnand %p3798_p0, %p3792_p11 }
  0x99   :  { %3802 = shalt.err (!%p3799_p1)
}
  0x9a   :  { %79 = dma.hbm_to_vmem [thread:$0]  %s4486_s4, 32, %s77_s26, [#allocation12]  }
  0x9b   :  { %s3946_s18 = smov [#allocation16]   ;;  %s3947_s1 = smov [#allocation19]  }
  0x9c   :  { %s98_s27 = sshll.u32 %s3946_s18, 4  ;;  %s118_s10 = sshll.u32 %s3947_s1, 4  ;;  %s99_s27 = int_to_ptr.vmem [resolvable:$true] %s98_s27  ;;  %s119_s10 = int_to_ptr.vmem [resolvable:$true] %s118_s10 }
  0x9d   :  { %s3803_s17 = scalar_lea.hbm %s4488_s6, 64 }
  0x9e   :  { %p3804_p2 = scmp.ne.s32.totalorder %s4488_s6, %s3803_s17  ;;  %p3807_p3 = scmp.lt.u32.totalorder %s3803_s17, %s4488_s6 }
  0xa0   :  { %p3809_p4 = pnand %p3807_p3, %p3804_p2 }
  0xa2   :  { %3812 = shalt.err (!%p3809_p4)
}
  0xa3   :  { %s3813_s4 = scalar_lea.vmem %s99_s27, 64  ;;  %p3818_p6 = scmp.lt.s32.totalorder %s99_s27, %s99_s27 }
  0xa4   :  { %p3814_p5 = scmp.ne.s32.totalorder %s99_s27, %s3813_s4  ;;  %p3819_p7 = scmp.lt.s32.totalorder %s3813_s4, %s3813_s4 }
  0xa6   :  { %p3820_p8 = por %p3819_p7, %p3818_p6 }
  0xa8   :  { %p3821_p9 = pnand %p3820_p8, %p3814_p5 }
  0xaa   :  { %3824 = shalt.err (!%p3821_p9)
}
  0xab   :  { %101 = dma.hbm_to_vmem [thread:$0]  %s4488_s6, 64, %s99_s27, [#allocation15]  }
  0xac   :  { %s3825_s24 = scalar_lea.hbm %s4490_s8, 64 }
  0xad   :  { %p3826_p10 = scmp.ne.s32.totalorder %s4490_s8, %s3825_s24  ;;  %p3829_p11 = scmp.lt.u32.totalorder %s3825_s24, %s4490_s8 }
  0xaf   :  { %p3831_p12 = pnand %p3829_p11, %p3826_p10 }
  0xb1   :  { %3834 = shalt.err (!%p3831_p12)
}
  0xb2   :  { %s3835_s2 = scalar_lea.vmem %s119_s10, 64  ;;  %p3840_p0 = scmp.lt.s32.totalorder %s119_s10, %s119_s10 }
  0xb3   :  { %p3836_p13 = scmp.ne.s32.totalorder %s119_s10, %s3835_s2  ;;  %p3841_p1 = scmp.lt.s32.totalorder %s3835_s2, %s3835_s2 }
  0xb5   :  { %p3842_p2 = por %p3841_p1, %p3840_p0 }
  0xb7   :  { %p3843_p3 = pnand %p3842_p2, %p3836_p13 }
  0xb9   :  { %3846 = shalt.err (!%p3843_p3)
}
  0xba   :  { %121 = dma.hbm_to_vmem [thread:$0]  %s4490_s8, 64, %s119_s10, [#allocation18]  }
  0xbb   :  { %s3948_s18 = smov [#allocation22]   ;;  %s3949_s1 = smov [#allocation25]  }
  0xbc   :  { %s138_s27 = sshll.u32 %s3948_s18, 4  ;;  %s158_s16 = sshll.u32 %s3949_s1, 4  ;;  %s139_s27 = int_to_ptr.vmem [resolvable:$true] %s138_s27  ;;  %s159_s16 = int_to_ptr.vmem [resolvable:$true] %s158_s16 }
  0xbd   :  { %s3847_s20 = scalar_lea.hbm %s4493_s11, 128 }
  0xbe   :  { %p3848_p4 = scmp.ne.s32.totalorder %s4493_s11, %s3847_s20  ;;  %p3851_p5 = scmp.lt.u32.totalorder %s3847_s20, %s4493_s11 }
  0xc0   :  { %p3853_p6 = pnand %p3851_p5, %p3848_p4 }
  0xc2   :  { %3856 = shalt.err (!%p3853_p6)
}
  0xc3   :  { %s3857_s8 = scalar_lea.vmem %s139_s27, 128  ;;  %p3862_p8 = scmp.lt.s32.totalorder %s139_s27, %s139_s27 }
  0xc4   :  { %p3858_p7 = scmp.ne.s32.totalorder %s139_s27, %s3857_s8  ;;  %p3863_p9 = scmp.lt.s32.totalorder %s3857_s8, %s3857_s8 }
  0xc6   :  { %p3864_p10 = por %p3863_p9, %p3862_p8 }
  0xc8   :  { %p3865_p11 = pnand %p3864_p10, %p3858_p7 }
  0xca   :  { %3868 = shalt.err (!%p3865_p11)
}
  0xcb   :  { %141 = dma.hbm_to_vmem [thread:$0]  %s4493_s11, 128, %s139_s27, [#allocation21]  }
  0xcc   :  { %s3869_s22 = scalar_lea.hbm %s4496_s14, 112 }
  0xcd   :  { %p3870_p12 = scmp.ne.s32.totalorder %s4496_s14, %s3869_s22  ;;  %p3873_p13 = scmp.lt.u32.totalorder %s3869_s22, %s4496_s14 }
  0xcf   :  { %p3875_p0 = pnand %p3873_p13, %p3870_p12 }
  0xd1   :  { %3878 = shalt.err (!%p3875_p0)
}
  0xd2   :  { %s3879_s21 = scalar_lea.vmem %s159_s16, 112  ;;  %s3883_s2 = scalar_lea.vmem %s159_s16, 128 }
  0xd3   :  { %p3880_p1 = scmp.ne.s32.totalorder %s159_s16, %s3879_s21  ;;  %p3884_p2 = scmp.lt.s32.totalorder %s159_s16, %s159_s16 }
  0xd4   :  { %p3885_p3 = scmp.lt.s32.totalorder %s3883_s2, %s3879_s21 }
  0xd6   :  { %p3886_p4 = por %p3885_p3, %p3884_p2 }
  0xd8   :  { %p3887_p5 = pnand %p3886_p4, %p3880_p1 }
  0xda   :  { %3890 = shalt.err (!%p3887_p5)
}
  0xdb   :  { %161 = dma.hbm_to_vmem [thread:$0]  %s4496_s14, 112, %s159_s16, [#allocation24]  }
  0xdc   :  { %3913 = dma.done.wait [#allocation6], 128  }
  0xdd   :  { %3914 = vsyncadd [#allocation6], 4294967168 }
  0xde   :  { %3915 = dma.done.wait [#allocation9], 1056  }
  0xdf   :  { %3916 = vsyncadd [#allocation9], 4294966240 }
  0xe0   :  { %3917 = dma.done.wait [#allocation12], 64  }
  0xe1   :  { %3918 = vsyncadd [#allocation12], 4294967232 }
  0xe2   :  { %3919 = dma.done.wait [#allocation15], 8256  }
  0xe3   :  { %3920 = vsyncadd [#allocation15], 4294959040 }
  0xe4   :  { %3921 = dma.done.wait [#allocation18], 128  }
  0xe5   :  { %3922 = vsyncadd [#allocation18], 4294967168 }
  0xe6   :  { %3923 = dma.done.wait [#allocation21], 256  }
  0xe7   :  { %3924 = vsyncadd [#allocation21], 4294967040 }
  0xe8   :  { %3925 = dma.done.wait [#allocation24], 240  }
  0xe9   :  { %3926 = vsyncadd [#allocation24], 4294967056  ;;  %s206_s3 = sld [smem:[#allocation0]]   ;;  %s3950_s18 = smov 1024   ;;  %v3951_v0 = vmov 0   ;;  %vm334_vm0 = vcmask 523264   ;;  %v284_v44 = vlaneseq }
  0xea   :  { %218 = sst [smem:[#allocation28]] %s3950_s18  ;;  %370 = vmatprep.mubr.bf16.mxu0 %v3951_v0  ;;  %s3952_s14 = smov [#allocation2]  }
  0xeb   :  { %220 = sst [smem:[#allocation28 + $0x1]] %s3950_s18  ;;  %s214_s27 = sshll.u32 %s3952_s14, 4  ;;  %v4214_v45 = vshrl.u32 %v284_v44, 7  ;;  %s215_s27 = int_to_ptr.vmem [resolvable:$true] %s214_s27 }
  0xec   :  { %222 = sst [smem:[#allocation28 + $0x2]] %s3935_s29  ;;  %s3953_s1 = smov 512  }
  0xed   :  { %226 = sst [smem:[#allocation28 + $0x4]] %s3934_s28  ;;  %s3954_s16 = smov 64   ;;  %v4217_v46 = vsub.s32 0, %v4214_v45  ;;  %v4220_v48 = vsub.s32 1, %v4214_v45 }
  0xee   :  { %230 = sst [smem:[#allocation28 + $0x6]] %s3953_s1  ;;  %s3955_s17 = smov 2  }
  0xef   :  { %224 = sst [smem:[#allocation28 + $0x3]] %s3954_s16  ;;  %s3189_s30 = sshll.u32 %s206_s3, 26 }
  0xf0   :  { %228 = sst [smem:[#allocation28 + $0x5]] %s3955_s17  ;;  %s3190_s20 = sadd.s32 134217728, %s3189_s30 }
  0xf1   :  { %232 = sst [smem:[#allocation28 + $0x7]] %s3954_s16  ;;  %s3956_s0 = smov 4  }
  0xf2   :  { %234 = sst [smem:[#allocation28 + $0x8]] %s3956_s0  ;;  %s3957_s25 = smov [#allocation4]  }
  0xf3   :  { %s3958_s15 = smov [#allocation27]   ;;  %s3959_s8 = smov 896  }
  0xf4   :  { %236 = dma.general %s4491_s9, 32768, %s215_s27, %s3957_s25, %s3958_s15, [#allocation28], %s3190_s20, 0  }
  0xf5   :  { %253 = sst [smem:[#allocation30]] %s3959_s8  ;;  %s3960_s10 = smov 7  }
  0xf6   :  { %255 = sst [smem:[#allocation30 + $0x1]] %s3959_s8  ;;  %s3961_s26 = smov [#allocation3]  }
  0xf7   :  { %257 = sst [smem:[#allocation30 + $0x2]] %s3960_s10  ;;  %s249_s7 = sshll.u32 %s3961_s26, 4  ;;  %s250_s7 = int_to_ptr.vmem [resolvable:$true] %s249_s7 }
  0xf8   :  { %259 = sst [smem:[#allocation30 + $0x3]] %s3954_s16  ;;  %s3962_s19 = smov 448  }
  0xf9   :  { %261 = sst [smem:[#allocation30 + $0x4]] %s3934_s28  ;;  %s3963_s22 = smov [#allocation4 + $0x1]  }
  0xfa   :  { %263 = sst [smem:[#allocation30 + $0x5]] %s3955_s17  ;;  %s3964_s24 = smov [#allocation29]  }
  0xfb   :  { %265 = sst [smem:[#allocation30 + $0x6]] %s3962_s19 }
  0xfc   :  { %267 = sst [smem:[#allocation30 + $0x7]] %s3954_s16 }
  0xfd   :  { %269 = sst [smem:[#allocation30 + $0x8]] %s3956_s0 }
  0xfe   :  { %271 = dma.general %s4495_s13, 57344, %s250_s7, %s3963_s22, %s3964_s24, [#allocation30], %s3190_s20, 0  }
  0xff   :  { %v3455_v1 = vld [vmem:[#allocation8 + $0x4] ss:$8 sps:$4 sm:$0xff]   ;;  %v3457_v2 = vld [vmem:[#allocation8] ss:$8 sps:$4 sm:$0xff]   ;;  %v3458_v3 = vld [vmem:[#allocation8 + $0x14] ss:$8 sps:$4 sm:$0xff]  }
 0x100   :  { %338 = vmatprep.subr.bf16.mxu0 %v3455_v1  ;;  %v3460_v4 = vld [vmem:[#allocation8 + $0x10] ss:$8 sps:$4 sm:$0xff]   ;;  %v3461_v5 = vld [vmem:[#allocation8 + $0x24] ss:$8 sps:$4 sm:$0xff]   ;;  %v3463_v6 = vld [vmem:[#allocation8 + $0x20] ss:$8 sps:$4 sm:$0xff]  }
 0x101   :  { %339 = vmatpush1.bf16.msra.mxu0 %v3457_v2  ;;  %v3464_v7 = vld [vmem:[#allocation8 + $0x34] ss:$8 sps:$4 sm:$0xff]   ;;  %v3466_v8 = vld [vmem:[#allocation8 + $0x30] ss:$8 sps:$4 sm:$0xff]   ;;  %v282_v47 = vld [vmem:[#allocation10] sm:$0x3] }
 0x102   :  { %340 = vmatprep.subr.bf16.mxu0 %v3458_v3  ;;  %v272_v9 = vld [vmem:[#allocation5] sm:$0xff]  ;;  %v3517_v43 = vld [vmem:[#allocation14 + $0xc] ss:$16 sps:$4 sm:$0xff]   ;;  %v287_v49 = vrot.slane %v282_v47, %v4217_v46  ;;  %v291_v50 = vrot.slane %v282_v47, %v4220_v48 }
 0x103   :  { %v3469_v10 = vld [vmem:[#allocation14 + $0x4] ss:$16 sps:$4 sm:$0xff]   ;;  %v3467_v11 = vld [vmem:[#allocation14] ss:$16 sps:$4 sm:$0xff]   ;;  %v273_v12 = vpack.c.bf16 %v272_v9, %v272_v9 }
 0x104   :  { %v3472_v13 = vld [vmem:[#allocation14 + $0x24] ss:$16 sps:$4 sm:$0xff]   ;;  %v3470_v14 = vld [vmem:[#allocation14 + $0x20] ss:$16 sps:$4 sm:$0xff]  }
 0x105   :  { %341 = vmatpush1.bf16.msra.mxu0 %v3460_v4  ;;  %v3475_v15 = vld [vmem:[#allocation14 + $0x44] ss:$16 sps:$4 sm:$0xff]   ;;  %v3473_v16 = vld [vmem:[#allocation14 + $0x40] ss:$16 sps:$4 sm:$0xff]  }
 0x106   :  { %342 = vmatprep.subr.bf16.mxu0 %v3461_v5  ;;  %v3478_v17 = vld [vmem:[#allocation14 + $0x64] ss:$16 sps:$4 sm:$0xff]   ;;  %v3476_v18 = vld [vmem:[#allocation14 + $0x60] ss:$16 sps:$4 sm:$0xff]  }
 0x107   :  { %v3481_v19 = vld [vmem:[#allocation14 + $0x84] ss:$16 sps:$4 sm:$0xff]   ;;  %v3479_v20 = vld [vmem:[#allocation14 + $0x80] ss:$16 sps:$4 sm:$0xff]  }
 0x108   :  { %v3484_v21 = vld [vmem:[#allocation14 + $0xa4] ss:$16 sps:$4 sm:$0xff]   ;;  %v3482_v22 = vld [vmem:[#allocation14 + $0xa0] ss:$16 sps:$4 sm:$0xff]  }
 0x109   :  { %343 = vmatpush1.bf16.msra.mxu0 %v3463_v6  ;;  %v3487_v23 = vld [vmem:[#allocation14 + $0xc4] ss:$16 sps:$4 sm:$0xff]   ;;  %v3485_v24 = vld [vmem:[#allocation14 + $0xc0] ss:$16 sps:$4 sm:$0xff]  }
 0x10a   :  { %344 = vmatprep.subr.bf16.mxu0 %v3464_v7  ;;  %v3490_v25 = vld [vmem:[#allocation14 + $0xe4] ss:$16 sps:$4 sm:$0xff]   ;;  %v3488_v26 = vld [vmem:[#allocation14 + $0xe0] ss:$16 sps:$4 sm:$0xff]  }
 0x10b   :  { %v3493_v27 = vld [vmem:[#allocation14 + $0x104] ss:$16 sps:$4 sm:$0xff]   ;;  %v3491_v28 = vld [vmem:[#allocation14 + $0x100] ss:$16 sps:$4 sm:$0xff]  }
 0x10c   :  { %v3496_v29 = vld [vmem:[#allocation14 + $0x124] ss:$16 sps:$4 sm:$0xff]   ;;  %v3494_v30 = vld [vmem:[#allocation14 + $0x120] ss:$16 sps:$4 sm:$0xff]  }
 0x10d   :  { %345 = vmatpush1.bf16.msra.mxu0 %v3466_v8  ;;  %v3499_v31 = vld [vmem:[#allocation14 + $0x144] ss:$16 sps:$4 sm:$0xff]   ;;  %v3497_v32 = vld [vmem:[#allocation14 + $0x140] ss:$16 sps:$4 sm:$0xff]  }
 0x10e   :  { %860 = vmatprep.subr.bf16.mxu0 %v3469_v10  ;;  %v3502_v33 = vld [vmem:[#allocation14 + $0x164] ss:$16 sps:$4 sm:$0xff]   ;;  %v3500_v34 = vld [vmem:[#allocation14 + $0x160] ss:$16 sps:$4 sm:$0xff]  }
 0x10f   :  { %v3505_v35 = vld [vmem:[#allocation14 + $0x184] ss:$16 sps:$4 sm:$0xff]   ;;  %v3503_v36 = vld [vmem:[#allocation14 + $0x180] ss:$16 sps:$4 sm:$0xff]  }
 0x110   :  { %3201 = vmatmul.mubr.msk.bf16.vlgmr.msra.gmra.mrb[0].mxu0 %vm334_vm0, %v273_v12  ;;  %v3508_v37 = vld [vmem:[#allocation14 + $0x1a4] ss:$16 sps:$4 sm:$0xff]   ;;  %v3506_v38 = vld [vmem:[#allocation14 + $0x1a0] ss:$16 sps:$4 sm:$0xff]  }
 0x111   :  { %861 = vmatpush1.bf16.msra.mxu0 %v3467_v11  ;;  %v3511_v39 = vld [vmem:[#allocation14 + $0x1c4] ss:$16 sps:$4 sm:$0xff]   ;;  %v3509_v40 = vld [vmem:[#allocation14 + $0x1c0] ss:$16 sps:$4 sm:$0xff]  }
 0x112   :  { %862 = vmatprep.subr.bf16.mxu0 %v3472_v13  ;;  %v3514_v41 = vld [vmem:[#allocation14 + $0x1e4] ss:$16 sps:$4 sm:$0xff]   ;;  %v3512_v42 = vld [vmem:[#allocation14 + $0x1e0] ss:$16 sps:$4 sm:$0xff]  }
 0x115   :  { %863 = vmatpush1.bf16.msra.mxu0 %v3470_v14 }
 0x116   :  { %864 = vmatprep.subr.bf16.mxu0 %v3475_v15 }
 0x119   :  { %865 = vmatpush1.bf16.msra.mxu0 %v3473_v16 }
 0x11a   :  { %866 = vmatprep.subr.bf16.mxu0 %v3478_v17 }
 0x11d   :  { %867 = vmatpush1.bf16.msra.mxu0 %v3476_v18 }
 0x11e   :  { %868 = vmatprep.subr.bf16.mxu0 %v3481_v19 }
 0x121   :  { %869 = vmatpush1.bf16.msra.mxu0 %v3479_v20 }
 0x122   :  { %870 = vmatprep.subr.bf16.mxu0 %v3484_v21 }
 0x125   :  { %871 = vmatpush1.bf16.msra.mxu0 %v3482_v22 }
 0x126   :  { %872 = vmatprep.subr.bf16.mxu0 %v3487_v23 }
 0x129   :  { %873 = vmatpush1.bf16.msra.mxu0 %v3485_v24 }
 0x12a   :  { %874 = vmatprep.subr.bf16.mxu0 %v3490_v25 }
 0x12d   :  { %875 = vmatpush1.bf16.msra.mxu0 %v3488_v26 }
 0x12e   :  { %876 = vmatprep.subr.bf16.mxu0 %v3493_v27 }
 0x131   :  { %877 = vmatpush1.bf16.msra.mxu0 %v3491_v28 }
 0x132   :  { %878 = vmatprep.subr.bf16.mxu0 %v3496_v29 }
 0x135   :  { %879 = vmatpush1.bf16.msra.mxu0 %v3494_v30 }
 0x136   :  { %880 = vmatprep.subr.bf16.mxu0 %v3499_v31  ;;  %v385_v31 = vld [vmem:[#allocation11] sm:$0x3] }
 0x139   :  { %881 = vmatpush1.bf16.msra.mxu0 %v3497_v32  ;;  %v386_v32 = vld [vmem:[#allocation13] sm:$0x3] }
 0x13a   :  { %882 = vmatprep.subr.bf16.mxu0 %v3502_v33  ;;  %v430_v33 = vrot.slane %v385_v31, %v4217_v46 }
 0x13d   :  { %883 = vmatpush1.bf16.msra.mxu0 %v3500_v34 }
 0x13e   :  { %884 = vmatprep.subr.bf16.mxu0 %v3505_v35  ;;  %v434_v35 = vrot.slane %v385_v31, %v4220_v48 }
 0x141   :  { %885 = vmatpush1.bf16.msra.mxu0 %v3503_v36 }
 0x142   :  { %886 = vmatprep.subr.bf16.mxu0 %v3508_v37 }
 0x145   :  { %887 = vmatpush1.bf16.msra.mxu0 %v3506_v38  ;;  %v443_v38 = vrot.slane %v386_v32, %v4217_v46 }
 0x146   :  { %888 = vmatprep.subr.bf16.mxu0 %v3511_v39 }
 0x149   :  { %889 = vmatpush1.bf16.msra.mxu0 %v3509_v40  ;;  %v447_v40 = vrot.slane %v386_v32, %v4220_v48 }
 0x14a   :  { %890 = vmatprep.subr.bf16.mxu0 %v3514_v41 }
 0x14d   :  { %891 = vmatpush1.bf16.msra.mxu0 %v3512_v42 }
 0x14e   :  { %901 = vmatprep.subr.bf16.mxu0 %v3517_v43 }
 0x1e3   :  { %v372_v51 = vpop.f32.mrb[0].mxu0 }
 0x1e4   :  { %v373_v52 = vadd.f32 %v372_v51, %v287_v49  ;;  %v374_v53 = vpop.f32.mrb[1].mxu0  ;;  %v3515_v49 = vld [vmem:[#allocation14 + $0x8] ss:$16 sps:$4 sm:$0xff]   ;;  %v3520_v51 = vld [vmem:[#allocation14 + $0x2c] ss:$16 sps:$4 sm:$0xff]  }
 0x1e5   :  { %v375_v54 = vadd.f32 %v374_v53, %v291_v50  ;;  %v376_v55 = vpop.f32.mrb[2].mxu0  ;;  %v3523_v53 = vld [vmem:[#allocation14 + $0x4c] ss:$16 sps:$4 sm:$0xff]  }
 0x1e6   :  { %vm379_vm1 = vcmp.gt.f32.partialorder %v373_v52, 0.0  ;;  %v381_v56 = vmul.f32 0.2, %v373_v52  ;;  %v377_v57 = vpop.f32.mrb[3].mxu0  ;;  %v3526_v55 = vld [vmem:[#allocation14 + $0x6c] ss:$16 sps:$4 sm:$0xff]  }
 0x1e7   :  { %vm380_vm2 = vcmp.gt.f32.partialorder %v375_v54, 0.0  ;;  %v382_v58 = vmul.f32 0.2, %v375_v54  ;;  %v3529_v57 = vld [vmem:[#allocation14 + $0x8c] ss:$16 sps:$4 sm:$0xff]  }
 0x1e8   :  { %v383_v59 = vsel %vm379_vm1, %v373_v52, %v381_v56  ;;  %v3518_v52 = vld [vmem:[#allocation14 + $0x28] ss:$16 sps:$4 sm:$0xff]  }
 0x1e9   :  { %v387_v60 = vrot.slane %v383_v59, 4  ;;  %v384_v61 = vsel %vm380_vm2, %v375_v54, %v382_v58  ;;  %v3521_v54 = vld [vmem:[#allocation14 + $0x48] ss:$16 sps:$4 sm:$0xff]  }
 0x1ea   :  { %v393_v62 = vrot.slane %v384_v61, 4  ;;  %v3524_v56 = vld [vmem:[#allocation14 + $0x68] ss:$16 sps:$4 sm:$0xff]  }
 0x1eb   :  { %v388_v63 = vadd.f32 %v387_v60, %v383_v59  ;;  %v3527_v58 = vld [vmem:[#allocation14 + $0x88] ss:$16 sps:$4 sm:$0xff]  }
 0x1ec   :  { %v394_v0 = vadd.f32 %v393_v62, %v384_v61  ;;  %v3530_v60 = vld [vmem:[#allocation14 + $0xa8] ss:$16 sps:$4 sm:$0xff]  }
 0x1ed   :  { %v389_v1 = vrot.slane %v388_v63, 2  ;;  %v3533_v62 = vld [vmem:[#allocation14 + $0xc8] ss:$16 sps:$4 sm:$0xff]  }
 0x1ee   :  { %v395_v2 = vrot.slane %v394_v0, 2 }
 0x1ef   :  { %v390_v3 = vadd.f32 %v389_v1, %v388_v63  ;;  %v3538_v63 = vld [vmem:[#allocation14 + $0xec] ss:$16 sps:$4 sm:$0xff]  }
 0x1f0   :  { %v396_v4 = vadd.f32 %v395_v2, %v394_v0  ;;  %v3536_v0 = vld [vmem:[#allocation14 + $0xe8] ss:$16 sps:$4 sm:$0xff]   ;;  %v3541_v1 = vld [vmem:[#allocation14 + $0x10c] ss:$16 sps:$4 sm:$0xff]  }
 0x1f1   :  { %v391_v5 = vrot.slane %v390_v3, 1  ;;  %v3539_v2 = vld [vmem:[#allocation14 + $0x108] ss:$16 sps:$4 sm:$0xff]  }
 0x1f2   :  { %v397_v6 = vrot.slane %v396_v4, 1 }
 0x1f3   :  { %v392_v7 = vadd.f32 %v391_v5, %v390_v3  ;;  %v3544_v3 = vld [vmem:[#allocation14 + $0x12c] ss:$16 sps:$4 sm:$0xff]  }
 0x1f4   :  { %v398_v8 = vadd.f32 %v397_v6, %v396_v4  ;;  %v3542_v4 = vld [vmem:[#allocation14 + $0x128] ss:$16 sps:$4 sm:$0xff]   ;;  %v3547_v5 = vld [vmem:[#allocation14 + $0x14c] ss:$16 sps:$4 sm:$0xff]  }
 0x1f5   :  { %v400_v9 = vmul.f32 0.125, %v392_v7  ;;  %v3545_v6 = vld [vmem:[#allocation14 + $0x148] ss:$16 sps:$4 sm:$0xff]   ;;  %v3550_v7 = vld [vmem:[#allocation14 + $0x16c] ss:$16 sps:$4 sm:$0xff]  }
 0x1f6   :  { %v401_v10 = vmul.f32 0.125, %v398_v8  ;;  %v3548_v8 = vld [vmem:[#allocation14 + $0x168] ss:$16 sps:$4 sm:$0xff]  }
 0x1f7   :  { %v402_v11 = vsub.f32 %v383_v59, %v400_v9  ;;  %v3532_v59 = vld [vmem:[#allocation14 + $0xac] ss:$16 sps:$4 sm:$0xff]  }
 0x1f8   :  { %v403_v12 = vsub.f32 %v384_v61, %v401_v10  ;;  %v3535_v61 = vld [vmem:[#allocation14 + $0xcc] ss:$16 sps:$4 sm:$0xff]   ;;  %v3551_v10 = vld [vmem:[#allocation14 + $0x188] ss:$16 sps:$4 sm:$0xff]  }
 0x1f9   :  { %v404_v13 = vmul.f32 %v402_v11, %v402_v11  ;;  %v3553_v9 = vld [vmem:[#allocation14 + $0x18c] ss:$16 sps:$4 sm:$0xff]  }
 0x1fa   :  { %v405_v14 = vmul.f32 %v403_v12, %v403_v12 }
 0x1fb   :  { %v406_v15 = vrot.slane %v404_v13, 4 }
 0x1fc   :  { %v412_v16 = vrot.slane %v405_v14, 4 }
 0x1fd   :  { %v407_v17 = vadd.f32 %v406_v15, %v404_v13  ;;  %v3559_v13 = vld [vmem:[#allocation14 + $0x1cc] ss:$16 sps:$4 sm:$0xff]  }
 0x1fe   :  { %v413_v18 = vadd.f32 %v412_v16, %v405_v14  ;;  %v3557_v14 = vld [vmem:[#allocation14 + $0x1c8] ss:$16 sps:$4 sm:$0xff]   ;;  %v3562_v15 = vld [vmem:[#allocation14 + $0x1ec] ss:$16 sps:$4 sm:$0xff]  }
 0x1ff   :  { %v408_v19 = vrot.slane %v407_v17, 2  ;;  %v3560_v16 = vld [vmem:[#allocation14 + $0x1e8] ss:$16 sps:$4 sm:$0xff]  }
 0x200   :  { %v414_v20 = vrot.slane %v413_v18, 2 }
 0x201   :  { %v409_v21 = vadd.f32 %v408_v19, %v407_v17  ;;  %v4232_v17 = vld [vmem:[#allocation16] sm:$0xf] }
 0x202   :  { %v415_v22 = vadd.f32 %v414_v20, %v413_v18  ;;  %v523_v18 = vrot.slane %v4232_v17, %v4217_v46  ;;  %v527_v19 = vrot.slane %v4232_v17, %v4220_v48 }
 0x203   :  { %v410_v23 = vrot.slane %v409_v21, 1 }
 0x204   :  { %v416_v24 = vrot.slane %v415_v22, 1 }
 0x205   :  { %v411_v25 = vadd.f32 %v410_v23, %v409_v21 }
 0x206   :  { %v417_v26 = vadd.f32 %v416_v24, %v415_v22 }
 0x207   :  { %v418_v27 = vmul.f32 0.125, %v411_v25 }
 0x208   :  { %v419_v28 = vmul.f32 0.125, %v417_v26 }
 0x209   :  { %v420_v29 = vadd.f32 1e-05, %v418_v27 }
 0x20a   :  { %v421_v30 = vadd.f32 1e-05, %v419_v28 }
 0x20b   :  { %3563 = vrsqrt.f32 %v420_v29 }
 0x20c   :  { %3565 = vrsqrt.f32 %v421_v30 }
 0x215   :  { %v3564_v34 = vpop.eup %3563 }
 0x216   :  { %v3566_v36 = vpop.eup %3565  ;;  %v424_v37 = vmul.f32 %v3564_v34, %v402_v11  ;;  %v3556_v11 = vld [vmem:[#allocation14 + $0x1ac] ss:$16 sps:$4 sm:$0xff]  }
 0x217   :  { %v425_v39 = vmul.f32 %v3566_v36, %v403_v12  ;;  %v3554_v12 = vld [vmem:[#allocation14 + $0x1a8] ss:$16 sps:$4 sm:$0xff]  }
 0x218   :  { %v437_v41 = vmul.f32 %v430_v33, %v424_v37 }
 0x219   :  { %v438_v42 = vmul.f32 %v434_v35, %v425_v39 }
 0x21a   :  { %v450_v43 = vadd.f32 %v443_v38, %v437_v41 }
 0x21b   :  { %v451_v44 = vadd.f32 %v447_v40, %v438_v42 }
 0x21c   :  { %v4228_v50 = vpack.c.bf16 %v450_v43, %v450_v43 }
 0x21d   :  { %v453_v47 = vpack.c.bf16 %v451_v44, %v451_v44 }
 0x21f   :  { %892 = vmatprep.mubr.bf16.mxu0 %v453_v47 }
 0x220   :  { %893 = vmatmul.mubr.bf16.vlgmr.msra.gmra.mrb[4].mxu0 %v4228_v50 }
 0x221   :  { %902 = vmatpush1.bf16.msra.mxu0 %v3515_v49  ;;  %933 = vmatprep.mubr.bf16.mxu0 %v453_v47 }
 0x222   :  { %903 = vmatprep.subr.bf16.mxu0 %v3520_v51 }
 0x225   :  { %904 = vmatpush1.bf16.msra.mxu0 %v3518_v52 }
 0x226   :  { %905 = vmatprep.subr.bf16.mxu0 %v3523_v53 }
 0x229   :  { %906 = vmatpush1.bf16.msra.mxu0 %v3521_v54 }
 0x22a   :  { %907 = vmatprep.subr.bf16.mxu0 %v3526_v55 }
 0x22d   :  { %908 = vmatpush1.bf16.msra.mxu0 %v3524_v56 }
 0x22e   :  { %909 = vmatprep.subr.bf16.mxu0 %v3529_v57 }
 0x231   :  { %910 = vmatpush1.bf16.msra.mxu0 %v3527_v58 }
 0x232   :  { %911 = vmatprep.subr.bf16.mxu0 %v3532_v59 }
 0x235   :  { %912 = vmatpush1.bf16.msra.mxu0 %v3530_v60 }
 0x236   :  { %913 = vmatprep.subr.bf16.mxu0 %v3535_v61 }
 0x239   :  { %914 = vmatpush1.bf16.msra.mxu0 %v3533_v62 }
 0x23a   :  { %915 = vmatprep.subr.bf16.mxu0 %v3538_v63 }
 0x23d   :  { %916 = vmatpush1.bf16.msra.mxu0 %v3536_v0 }
 0x23e   :  { %917 = vmatprep.subr.bf16.mxu0 %v3541_v1 }
 0x241   :  { %918 = vmatpush1.bf16.msra.mxu0 %v3539_v2 }
 0x242   :  { %919 = vmatprep.subr.bf16.mxu0 %v3544_v3  ;;  %v4238_v3 = vld [vmem:[#allocation17] sm:$0xf] }
 0x245   :  { %920 = vmatpush1.bf16.msra.mxu0 %v3542_v4  ;;  %v4240_v4 = vld [vmem:[#allocation19] sm:$0xf] }
 0x246   :  { %921 = vmatprep.subr.bf16.mxu0 %v3547_v5  ;;  %v1036_v5 = vrot.slane %v4238_v3, %v4217_v46 }
 0x249   :  { %922 = vmatpush1.bf16.msra.mxu0 %v3545_v6 }
 0x24a   :  { %923 = vmatprep.subr.bf16.mxu0 %v3550_v7  ;;  %v1040_v7 = vrot.slane %v4238_v3, %v4220_v48 }
 0x24d   :  { %924 = vmatpush1.bf16.msra.mxu0 %v3548_v8 }
 0x24e   :  { %925 = vmatprep.subr.bf16.mxu0 %v3553_v9 }
 0x251   :  { %926 = vmatpush1.bf16.msra.mxu0 %v3551_v10  ;;  %v1061_v10 = vrot.slane %v4240_v4, %v4217_v46 }
 0x252   :  { %927 = vmatprep.subr.bf16.mxu0 %v3556_v11 }
 0x255   :  { %928 = vmatpush1.bf16.msra.mxu0 %v3554_v12  ;;  %v1065_v12 = vrot.slane %v4240_v4, %v4220_v48 }
 0x256   :  { %929 = vmatprep.subr.bf16.mxu0 %v3559_v13 }
 0x259   :  { %930 = vmatpush1.bf16.msra.mxu0 %v3557_v14 }
 0x25a   :  { %931 = vmatprep.subr.bf16.mxu0 %v3562_v15 }
 0x25d   :  { %932 = vmatpush1.bf16.msra.mxu0 %v3560_v16 }
 0x260   :  { %934 = vmatmul.mubr.bf16.vlgmr.msra.gmra.mrb[8].mxu0 %v4228_v50 }
 0x2f3   :  { %v894_v20 = vpop.f32.mrb[4].mxu0 }
 0x2f4   :  { %v895_v21 = vadd.f32 %v894_v20, %v523_v18  ;;  %v896_v22 = vpop.f32.mrb[5].mxu0  ;;  %v4255_v18 = vsub.s32 2, %v4214_v45 }
 0x2f5   :  { %v897_v23 = vadd.f32 %v896_v22, %v527_v19  ;;  %v898_v24 = vpop.f32.mrb[6].mxu0  ;;  %v4258_v19 = vsub.s32 3, %v4214_v45 }
 0x2f6   :  { %vm942_vm3 = vcmp.gt.f32.partialorder %v895_v21, 0.0  ;;  %v946_v25 = vmul.f32 0.2, %v895_v21  ;;  %v899_v26 = vpop.f32.mrb[7].mxu0  ;;  %v531_v20 = vrot.slane %v4232_v17, %v4255_v18 }
 0x2f7   :  { %vm943_vm4 = vcmp.gt.f32.partialorder %v897_v23, 0.0  ;;  %v947_v27 = vmul.f32 0.2, %v897_v23 }
 0x2f8   :  { %v950_v28 = vsel %vm942_vm3, %v895_v21, %v946_v25  ;;  %v535_v21 = vrot.slane %v4232_v17, %v4258_v19 }
 0x2f9   :  { %v956_v29 = vrot.slane %v950_v28, 4  ;;  %v951_v30 = vsel %vm943_vm4, %v897_v23, %v947_v27 }
 0x2fa   :  { %v962_v31 = vrot.slane %v951_v30, 4 }
 0x2fb   :  { %v957_v32 = vadd.f32 %v956_v29, %v950_v28 }
 0x2fc   :  { %v963_v33 = vadd.f32 %v962_v31, %v951_v30 }
 0x2fd   :  { %v958_v34 = vrot.slane %v957_v32, 2 }
 0x2fe   :  { %v964_v35 = vrot.slane %v963_v33, 2 }
 0x2ff   :  { %v959_v36 = vadd.f32 %v958_v34, %v957_v32 }
 0x300   :  { %v965_v37 = vadd.f32 %v964_v35, %v963_v33 }
 0x301   :  { %v960_v38 = vrot.slane %v959_v36, 1 }
 0x302   :  { %v966_v39 = vrot.slane %v965_v37, 1 }
 0x303   :  { %v961_v40 = vadd.f32 %v960_v38, %v959_v36 }
 0x304   :  { %v967_v41 = vadd.f32 %v966_v39, %v965_v37 }
 0x305   :  { %v980_v42 = vmul.f32 0.125, %v961_v40 }
 0x306   :  { %v981_v43 = vmul.f32 0.125, %v967_v41 }
 0x307   :  { %v984_v44 = vsub.f32 %v950_v28, %v980_v42 }
 0x308   :  { %v985_v47 = vsub.f32 %v951_v30, %v981_v43 }
 0x309   :  { %v988_v49 = vmul.f32 %v984_v44, %v984_v44 }
 0x30a   :  { %v989_v50 = vmul.f32 %v985_v47, %v985_v47 }
 0x30b   :  { %v992_v51 = vrot.slane %v988_v49, 4 }
 0x30c   :  { %v998_v52 = vrot.slane %v989_v50, 4 }
 0x30d   :  { %v993_v53 = vadd.f32 %v992_v51, %v988_v49 }
 0x30e   :  { %v999_v54 = vadd.f32 %v998_v52, %v989_v50 }
 0x30f   :  { %v994_v55 = vrot.slane %v993_v53, 2 }
 0x310   :  { %v1000_v56 = vrot.slane %v999_v54, 2 }
 0x311   :  { %v995_v57 = vadd.f32 %v994_v55, %v993_v53 }
 0x312   :  { %v1001_v58 = vadd.f32 %v1000_v56, %v999_v54 }
 0x313   :  { %v996_v59 = vrot.slane %v995_v57, 1 }
 0x314   :  { %v1002_v60 = vrot.slane %v1001_v58, 1 }
 0x315   :  { %v997_v61 = vadd.f32 %v996_v59, %v995_v57 }
 0x316   :  { %v1003_v62 = vadd.f32 %v1002_v60, %v1001_v58 }
 0x317   :  { %v1016_v63 = vmul.f32 0.125, %v997_v61 }
 0x318   :  { %v1017_v0 = vmul.f32 0.125, %v1003_v62 }
 0x319   :  { %v1020_v1 = vadd.f32 1e-05, %v1016_v63 }
 0x31a   :  { %v1021_v2 = vadd.f32 1e-05, %v1017_v0 }
 0x31b   :  { %3567 = vrsqrt.f32 %v1020_v1 }
 0x31c   :  { %3569 = vrsqrt.f32 %v1021_v2 }
 0x325   :  { %v3568_v6 = vpop.eup %3567 }
 0x326   :  { %v3570_v8 = vpop.eup %3569  ;;  %v1028_v9 = vmul.f32 %v3568_v6, %v984_v44  ;;  %v1044_v6 = vrot.slane %v4238_v3, %v4255_v18 }
 0x327   :  { %v1029_v11 = vmul.f32 %v3570_v8, %v985_v47  ;;  %v1048_v8 = vrot.slane %v4238_v3, %v4258_v19 }
 0x328   :  { %v1053_v13 = vmul.f32 %v1036_v5, %v1028_v9 }
 0x329   :  { %v1054_v14 = vmul.f32 %v1040_v7, %v1029_v11  ;;  %v1069_v11 = vrot.slane %v4240_v4, %v4255_v18 }
 0x32a   :  { %v4250_v15 = vadd.f32 %v1061_v10, %v1053_v13  ;;  %v1073_v13 = vrot.slane %v4240_v4, %v4258_v19 }
 0x32b   :  { %v4252_v16 = vadd.f32 %v1065_v12, %v1054_v14 }
 0x333   :  { %v935_v22 = vpop.f32.mrb[8].mxu0 }
 0x334   :  { %v936_v23 = vadd.f32 %v935_v22, %v531_v20  ;;  %v937_v24 = vpop.f32.mrb[9].mxu0 }
 0x335   :  { %v938_v25 = vadd.f32 %v937_v24, %v535_v21  ;;  %v939_v26 = vpop.f32.mrb[10].mxu0 }
 0x336   :  { %vm944_vm5 = vcmp.gt.f32.partialorder %v936_v23, 0.0  ;;  %v948_v27 = vmul.f32 0.2, %v936_v23  ;;  %v940_v28 = vpop.f32.mrb[11].mxu0 }
 0x337   :  { %vm945_vm6 = vcmp.gt.f32.partialorder %v938_v25, 0.0  ;;  %v949_v29 = vmul.f32 0.2, %v938_v25 }
 0x338   :  { %v952_v30 = vsel %vm944_vm5, %v936_v23, %v948_v27 }
 0x339   :  { %v968_v31 = vrot.slane %v952_v30, 4  ;;  %v953_v32 = vsel %vm945_vm6, %v938_v25, %v949_v29 }
 0x33a   :  { %v974_v33 = vrot.slane %v953_v32, 4 }
 0x33b   :  { %v969_v34 = vadd.f32 %v968_v31, %v952_v30 }
 0x33c   :  { %v975_v35 = vadd.f32 %v974_v33, %v953_v32 }
 0x33d   :  { %v970_v36 = vrot.slane %v969_v34, 2 }
 0x33e   :  { %v976_v37 = vrot.slane %v975_v35, 2 }
 0x33f   :  { %v971_v38 = vadd.f32 %v970_v36, %v969_v34 }
 0x340   :  { %v977_v17 = vadd.f32 %v976_v37, %v975_v35 }
 0x341   :  { %v972_v39 = vrot.slane %v971_v38, 1 }
 0x342   :  { %v978_v40 = vrot.slane %v977_v17, 1 }
 0x343   :  { %v973_v41 = vadd.f32 %v972_v39, %v971_v38 }
 0x344   :  { %v979_v42 = vadd.f32 %v978_v40, %v977_v17 }
 0x345   :  { %v982_v43 = vmul.f32 0.125, %v973_v41 }
 0x346   :  { %v983_v44 = vmul.f32 0.125, %v979_v42 }
 0x347   :  { %v986_v47 = vsub.f32 %v952_v30, %v982_v43 }
 0x348   :  { %v987_v49 = vsub.f32 %v953_v32, %v983_v44 }
 0x349   :  { %v990_v50 = vmul.f32 %v986_v47, %v986_v47 }
 0x34a   :  { %v991_v51 = vmul.f32 %v987_v49, %v987_v49 }
 0x34b   :  { %v1004_v52 = vrot.slane %v990_v50, 4 }
 0x34c   :  { %v1010_v53 = vrot.slane %v991_v51, 4 }
 0x34d   :  { %v1005_v54 = vadd.f32 %v1004_v52, %v990_v50 }
 0x34e   :  { %v1011_v55 = vadd.f32 %v1010_v53, %v991_v51 }
 0x34f   :  { %v1006_v56 = vrot.slane %v1005_v54, 2 }
 0x350   :  { %v1012_v57 = vrot.slane %v1011_v55, 2 }
 0x351   :  { %v1007_v58 = vadd.f32 %v1006_v56, %v1005_v54 }
 0x352   :  { %v1013_v59 = vadd.f32 %v1012_v57, %v1011_v55 }
 0x353   :  { %v1008_v60 = vrot.slane %v1007_v58, 1 }
 0x354   :  { %v1014_v61 = vrot.slane %v1013_v59, 1 }
 0x355   :  { %v1009_v62 = vadd.f32 %v1008_v60, %v1007_v58 }
 0x356   :  { %v1015_v63 = vadd.f32 %v1014_v61, %v1013_v59 }
 0x357   :  { %v1018_v0 = vmul.f32 0.125, %v1009_v62 }
 0x358   :  { %v1019_v1 = vmul.f32 0.125, %v1015_v63 }
 0x359   :  { %v1022_v2 = vadd.f32 1e-05, %v1018_v0 }
 0x35a   :  { %v1023_v5 = vadd.f32 1e-05, %v1019_v1 }
 0x35b   :  { %3571 = vrsqrt.f32 %v1022_v2 }
 0x35c   :  { %3573 = vrsqrt.f32 %v1023_v5 }
 0x365   :  { %v3572_v7 = vpop.eup %3571 }
 0x366   :  { %v3574_v9 = vpop.eup %3573  ;;  %v1030_v10 = vmul.f32 %v3572_v7, %v986_v47 }
 0x367   :  { %v1031_v12 = vmul.f32 %v3574_v9, %v987_v49 }
 0x368   :  { %v1055_v14 = vmul.f32 %v1044_v6, %v1030_v10 }
 0x369   :  { %v1056_v20 = vmul.f32 %v1048_v8, %v1031_v12 }
 0x36a   :  { %v4272_v21 = vadd.f32 %v1069_v11, %v1055_v14 }
 0x36b   :  { %v4274_v22 = vadd.f32 %v1073_v13, %v1056_v20 }
 0x36c   :  { %3927 = dma.done.wait [#allocation4], 32768 }
 0x36d   :  { %3928 = vsyncadd [#allocation4], 4294934528  ;;  %v4278_v3 = vpack.c.bf16 %v4252_v16, %v4252_v16  ;;  %v1091_v23 = vld [vmem:[#allocation2 + $0x8] sm:$0xff]  ;;  %v1093_v24 = vld [vmem:[#allocation2 + $0x18] sm:$0xff] }
 0x36e   :  { %v1090_v25 = vld [vmem:[#allocation2] sm:$0xff]  ;;  %1388 = vmatprep.subr.bf16.mxu1 %v1091_v23  ;;  %1470 = vmatprep.subr.bf16.mxu0 %v1093_v24  ;;  %v1092_v4 = vld [vmem:[#allocation2 + $0x10] sm:$0xff]  ;;  %v1099_v26 = vld [vmem:[#allocation2 + $0x48] sm:$0xff] }
 0x36f   :  { %1420 = vmatprep.mubr.bf16.mxu1 %v4278_v3  ;;  %1502 = vmatprep.mubr.bf16.mxu0 %v4278_v3  ;;  %v1101_v27 = vld [vmem:[#allocation2 + $0x58] sm:$0xff]  ;;  %v1098_v28 = vld [vmem:[#allocation2 + $0x40] sm:$0xff]  ;;  %v1100_v29 = vld [vmem:[#allocation2 + $0x50] sm:$0xff] }
 0x370   :  { %1389 = vmatpush1.bf16.msra.mxu1 %v1090_v25  ;;  %1471 = vmatpush1.bf16.msra.mxu0 %v1092_v4  ;;  %v1107_v16 = vld [vmem:[#allocation2 + $0x88] sm:$0xff]  ;;  %v1109_v30 = vld [vmem:[#allocation2 + $0x98] sm:$0xff]  ;;  %v1106_v31 = vld [vmem:[#allocation2 + $0x80] sm:$0xff] }
 0x371   :  { %1390 = vmatprep.subr.bf16.mxu1 %v1099_v26  ;;  %1472 = vmatprep.subr.bf16.mxu0 %v1101_v27  ;;  %v1108_v32 = vld [vmem:[#allocation2 + $0x90] sm:$0xff]  ;;  %v1115_v33 = vld [vmem:[#allocation2 + $0xc8] sm:$0xff]  ;;  %v1117_v34 = vld [vmem:[#allocation2 + $0xd8] sm:$0xff] }
 0x372   :  { %v1114_v35 = vld [vmem:[#allocation2 + $0xc0] sm:$0xff]  ;;  %v1116_v36 = vld [vmem:[#allocation2 + $0xd0] sm:$0xff]  ;;  %v1123_v37 = vld [vmem:[#allocation2 + $0x108] sm:$0xff] }
 0x373   :  { %v1125_v38 = vld [vmem:[#allocation2 + $0x118] sm:$0xff]  ;;  %v1122_v17 = vld [vmem:[#allocation2 + $0x100] sm:$0xff]  ;;  %v1124_v39 = vld [vmem:[#allocation2 + $0x110] sm:$0xff] }
 0x374   :  { %1391 = vmatpush1.bf16.msra.mxu1 %v1098_v28  ;;  %1473 = vmatpush1.bf16.msra.mxu0 %v1100_v29  ;;  %v1131_v40 = vld [vmem:[#allocation2 + $0x148] sm:$0xff]  ;;  %v1133_v41 = vld [vmem:[#allocation2 + $0x158] sm:$0xff]  ;;  %v1130_v42 = vld [vmem:[#allocation2 + $0x140] sm:$0xff] }
 0x375   :  { %1392 = vmatprep.subr.bf16.mxu1 %v1107_v16  ;;  %1474 = vmatprep.subr.bf16.mxu0 %v1109_v30  ;;  %v1132_v43 = vld [vmem:[#allocation2 + $0x150] sm:$0xff]  ;;  %v1139_v44 = vld [vmem:[#allocation2 + $0x188] sm:$0xff]  ;;  %v1141_v47 = vld [vmem:[#allocation2 + $0x198] sm:$0xff] }
 0x376   :  { %v1138_v49 = vld [vmem:[#allocation2 + $0x180] sm:$0xff]  ;;  %v1140_v50 = vld [vmem:[#allocation2 + $0x190] sm:$0xff]  ;;  %v1147_v51 = vld [vmem:[#allocation2 + $0x1c8] sm:$0xff] }
 0x377   :  { %v1149_v52 = vld [vmem:[#allocation2 + $0x1d8] sm:$0xff]  ;;  %v1146_v53 = vld [vmem:[#allocation2 + $0x1c0] sm:$0xff]  ;;  %v1148_v54 = vld [vmem:[#allocation2 + $0x1d0] sm:$0xff] }
 0x378   :  { %1393 = vmatpush1.bf16.msra.mxu1 %v1106_v31  ;;  %1475 = vmatpush1.bf16.msra.mxu0 %v1108_v32  ;;  %v1155_v55 = vld [vmem:[#allocation2 + $0x208] sm:$0xff]  ;;  %v1157_v56 = vld [vmem:[#allocation2 + $0x218] sm:$0xff]  ;;  %v1154_v57 = vld [vmem:[#allocation2 + $0x200] sm:$0xff]  ;;  %v4284_v32 = vpack.c.bf16 %v4250_v15, %v4250_v15 }
 0x379   :  { %1394 = vmatprep.subr.bf16.mxu1 %v1115_v33  ;;  %1476 = vmatprep.subr.bf16.mxu0 %v1117_v34  ;;  %v1156_v58 = vld [vmem:[#allocation2 + $0x210] sm:$0xff]  ;;  %v1163_v59 = vld [vmem:[#allocation2 + $0x248] sm:$0xff]  ;;  %v1165_v60 = vld [vmem:[#allocation2 + $0x258] sm:$0xff] }
 0x37a   :  { %v1162_v61 = vld [vmem:[#allocation2 + $0x240] sm:$0xff]  ;;  %v1164_v62 = vld [vmem:[#allocation2 + $0x250] sm:$0xff]  ;;  %v1171_v63 = vld [vmem:[#allocation2 + $0x288] sm:$0xff] }
 0x37b   :  { %v1173_v0 = vld [vmem:[#allocation2 + $0x298] sm:$0xff]  ;;  %v1170_v1 = vld [vmem:[#allocation2 + $0x280] sm:$0xff]  ;;  %v1172_v2 = vld [vmem:[#allocation2 + $0x290] sm:$0xff] }
 0x37c   :  { %1395 = vmatpush1.bf16.msra.mxu1 %v1114_v35  ;;  %1477 = vmatpush1.bf16.msra.mxu0 %v1116_v36  ;;  %v1179_v5 = vld [vmem:[#allocation2 + $0x2c8] sm:$0xff]  ;;  %v1181_v6 = vld [vmem:[#allocation2 + $0x2d8] sm:$0xff]  ;;  %v1178_v7 = vld [vmem:[#allocation2 + $0x2c0] sm:$0xff] }
 0x37d   :  { %1396 = vmatprep.subr.bf16.mxu1 %v1123_v37  ;;  %1478 = vmatprep.subr.bf16.mxu0 %v1125_v38  ;;  %v1180_v8 = vld [vmem:[#allocation2 + $0x2d0] sm:$0xff]  ;;  %v1187_v9 = vld [vmem:[#allocation2 + $0x308] sm:$0xff]  ;;  %v1189_v10 = vld [vmem:[#allocation2 + $0x318] sm:$0xff]  ;;  %v4288_v37 = vpack.c.bf16 %v4274_v22, %v4274_v22 }
 0x37e   :  { %v1186_v11 = vld [vmem:[#allocation2 + $0x300] sm:$0xff]  ;;  %v1188_v12 = vld [vmem:[#allocation2 + $0x310] sm:$0xff]  ;;  %v1195_v13 = vld [vmem:[#allocation2 + $0x348] sm:$0xff] }
 0x37f   :  { %v1197_v14 = vld [vmem:[#allocation2 + $0x358] sm:$0xff]  ;;  %v1194_v20 = vld [vmem:[#allocation2 + $0x340] sm:$0xff]  ;;  %v1196_v23 = vld [vmem:[#allocation2 + $0x350] sm:$0xff] }
 0x380   :  { %1397 = vmatpush1.bf16.msra.mxu1 %v1122_v17  ;;  %1479 = vmatpush1.bf16.msra.mxu0 %v1124_v39  ;;  %v1203_v24 = vld [vmem:[#allocation2 + $0x388] sm:$0xff]  ;;  %v1205_v25 = vld [vmem:[#allocation2 + $0x398] sm:$0xff]  ;;  %v1202_v4 = vld [vmem:[#allocation2 + $0x380] sm:$0xff] }
 0x381   :  { %1398 = vmatprep.subr.bf16.mxu1 %v1131_v40  ;;  %1480 = vmatprep.subr.bf16.mxu0 %v1133_v41  ;;  %v1204_v26 = vld [vmem:[#allocation2 + $0x390] sm:$0xff]  ;;  %v1211_v27 = vld [vmem:[#allocation2 + $0x3c8] sm:$0xff]  ;;  %v1213_v28 = vld [vmem:[#allocation2 + $0x3d8] sm:$0xff] }
 0x382   :  { %v1210_v29 = vld [vmem:[#allocation2 + $0x3c0] sm:$0xff]  ;;  %v1212_v16 = vld [vmem:[#allocation2 + $0x3d0] sm:$0xff]  ;;  %v1219_v30 = vld [vmem:[#allocation2 + $0x408] sm:$0xff] }
 0x383   :  { %v1221_v31 = vld [vmem:[#allocation2 + $0x418] sm:$0xff]  ;;  %v1218_v33 = vld [vmem:[#allocation2 + $0x400] sm:$0xff]  ;;  %v1220_v34 = vld [vmem:[#allocation2 + $0x410] sm:$0xff] }
 0x384   :  { %1399 = vmatpush1.bf16.msra.mxu1 %v1130_v42  ;;  %1481 = vmatpush1.bf16.msra.mxu0 %v1132_v43  ;;  %v1227_v35 = vld [vmem:[#allocation2 + $0x448] sm:$0xff]  ;;  %v1229_v36 = vld [vmem:[#allocation2 + $0x458] sm:$0xff]  ;;  %v1226_v15 = vld [vmem:[#allocation2 + $0x440] sm:$0xff] }
 0x385   :  { %1400 = vmatprep.subr.bf16.mxu1 %v1139_v44  ;;  %1482 = vmatprep.subr.bf16.mxu0 %v1141_v47  ;;  %v1228_v38 = vld [vmem:[#allocation2 + $0x450] sm:$0xff]  ;;  %v1235_v17 = vld [vmem:[#allocation2 + $0x488] sm:$0xff]  ;;  %v1237_v39 = vld [vmem:[#allocation2 + $0x498] sm:$0xff] }
 0x386   :  { %v1234_v22 = vld [vmem:[#allocation2 + $0x480] sm:$0xff]  ;;  %v1236_v40 = vld [vmem:[#allocation2 + $0x490] sm:$0xff]  ;;  %v1243_v41 = vld [vmem:[#allocation2 + $0x4c8] sm:$0xff] }
 0x387   :  { %v1245_v42 = vld [vmem:[#allocation2 + $0x4d8] sm:$0xff]  ;;  %v1242_v43 = vld [vmem:[#allocation2 + $0x4c0] sm:$0xff]  ;;  %v1244_v44 = vld [vmem:[#allocation2 + $0x4d0] sm:$0xff] }
 0x388   :  { %1401 = vmatpush1.bf16.msra.mxu1 %v1138_v49  ;;  %1483 = vmatpush1.bf16.msra.mxu0 %v1140_v50  ;;  %v1251_v47 = vld [vmem:[#allocation2 + $0x508] sm:$0xff]  ;;  %v1253_v49 = vld [vmem:[#allocation2 + $0x518] sm:$0xff]  ;;  %v1250_v50 = vld [vmem:[#allocation2 + $0x500] sm:$0xff] }
 0x389   :  { %1402 = vmatprep.subr.bf16.mxu1 %v1147_v51  ;;  %1484 = vmatprep.subr.bf16.mxu0 %v1149_v52  ;;  %v1252_v51 = vld [vmem:[#allocation2 + $0x510] sm:$0xff]  ;;  %v1259_v52 = vld [vmem:[#allocation2 + $0x548] sm:$0xff] }
 0x38c   :  { %1403 = vmatpush1.bf16.msra.mxu1 %v1146_v53  ;;  %1485 = vmatpush1.bf16.msra.mxu0 %v1148_v54  ;;  %v1261_v53 = vld [vmem:[#allocation2 + $0x558] sm:$0xff]  ;;  %v1258_v54 = vld [vmem:[#allocation2 + $0x540] sm:$0xff] }
 0x38d   :  { %1404 = vmatprep.subr.bf16.mxu1 %v1155_v55  ;;  %1486 = vmatprep.subr.bf16.mxu0 %v1157_v56  ;;  %v1260_v55 = vld [vmem:[#allocation2 + $0x550] sm:$0xff]  ;;  %v1267_v56 = vld [vmem:[#allocation2 + $0x588] sm:$0xff] }
 0x390   :  { %1405 = vmatpush1.bf16.msra.mxu1 %v1154_v57  ;;  %1487 = vmatpush1.bf16.msra.mxu0 %v1156_v58  ;;  %v1269_v57 = vld [vmem:[#allocation2 + $0x598] sm:$0xff]  ;;  %v1266_v58 = vld [vmem:[#allocation2 + $0x580] sm:$0xff] }
 0x391   :  { %1406 = vmatprep.subr.bf16.mxu1 %v1163_v59  ;;  %1488 = vmatprep.subr.bf16.mxu0 %v1165_v60  ;;  %v1268_v59 = vld [vmem:[#allocation2 + $0x590] sm:$0xff]  ;;  %v1275_v60 = vld [vmem:[#allocation2 + $0x5c8] sm:$0xff] }
 0x394   :  { %1407 = vmatpush1.bf16.msra.mxu1 %v1162_v61  ;;  %1489 = vmatpush1.bf16.msra.mxu0 %v1164_v62  ;;  %v1277_v61 = vld [vmem:[#allocation2 + $0x5d8] sm:$0xff]  ;;  %v1274_v62 = vld [vmem:[#allocation2 + $0x5c0] sm:$0xff] }
 0x395   :  { %1408 = vmatprep.subr.bf16.mxu1 %v1171_v63  ;;  %1490 = vmatprep.subr.bf16.mxu0 %v1173_v0  ;;  %v1276_v63 = vld [vmem:[#allocation2 + $0x5d0] sm:$0xff]  ;;  %v1283_v0 = vld [vmem:[#allocation2 + $0x608] sm:$0xff] }
 0x398   :  { %1409 = vmatpush1.bf16.msra.mxu1 %v1170_v1  ;;  %1491 = vmatpush1.bf16.msra.mxu0 %v1172_v2  ;;  %v1285_v1 = vld [vmem:[#allocation2 + $0x618] sm:$0xff]  ;;  %v1282_v2 = vld [vmem:[#allocation2 + $0x600] sm:$0xff] }
 0x399   :  { %1410 = vmatprep.subr.bf16.mxu1 %v1179_v5  ;;  %1492 = vmatprep.subr.bf16.mxu0 %v1181_v6  ;;  %v1284_v5 = vld [vmem:[#allocation2 + $0x610] sm:$0xff]  ;;  %v1291_v6 = vld [vmem:[#allocation2 + $0x648] sm:$0xff] }
 0x39c   :  { %1411 = vmatpush1.bf16.msra.mxu1 %v1178_v7  ;;  %1493 = vmatpush1.bf16.msra.mxu0 %v1180_v8  ;;  %v1293_v7 = vld [vmem:[#allocation2 + $0x658] sm:$0xff]  ;;  %v1290_v8 = vld [vmem:[#allocation2 + $0x640] sm:$0xff] }
 0x39d   :  { %1412 = vmatprep.subr.bf16.mxu1 %v1187_v9  ;;  %1494 = vmatprep.subr.bf16.mxu0 %v1189_v10  ;;  %v1292_v9 = vld [vmem:[#allocation2 + $0x650] sm:$0xff]  ;;  %v1299_v10 = vld [vmem:[#allocation2 + $0x688] sm:$0xff] }
 0x3a0   :  { %1413 = vmatpush1.bf16.msra.mxu1 %v1186_v11  ;;  %1495 = vmatpush1.bf16.msra.mxu0 %v1188_v12  ;;  %v1301_v11 = vld [vmem:[#allocation2 + $0x698] sm:$0xff]  ;;  %v1298_v12 = vld [vmem:[#allocation2 + $0x680] sm:$0xff] }
 0x3a1   :  { %1414 = vmatprep.subr.bf16.mxu1 %v1195_v13  ;;  %1496 = vmatprep.subr.bf16.mxu0 %v1197_v14  ;;  %v1300_v13 = vld [vmem:[#allocation2 + $0x690] sm:$0xff]  ;;  %v1307_v14 = vld [vmem:[#allocation2 + $0x6c8] sm:$0xff] }
 0x3a4   :  { %1415 = vmatpush1.bf16.msra.mxu1 %v1194_v20  ;;  %1497 = vmatpush1.bf16.msra.mxu0 %v1196_v23  ;;  %v1309_v20 = vld [vmem:[#allocation2 + $0x6d8] sm:$0xff]  ;;  %v1306_v23 = vld [vmem:[#allocation2 + $0x6c0] sm:$0xff] }
 0x3a5   :  { %1416 = vmatprep.subr.bf16.mxu1 %v1203_v24  ;;  %1498 = vmatprep.subr.bf16.mxu0 %v1205_v25  ;;  %v1308_v24 = vld [vmem:[#allocation2 + $0x6d0] sm:$0xff]  ;;  %v1315_v25 = vld [vmem:[#allocation2 + $0x708] sm:$0xff] }
 0x3a8   :  { %1417 = vmatpush1.bf16.msra.mxu1 %v1202_v4  ;;  %1499 = vmatpush1.bf16.msra.mxu0 %v1204_v26  ;;  %v1317_v4 = vld [vmem:[#allocation2 + $0x718] sm:$0xff]  ;;  %v1314_v26 = vld [vmem:[#allocation2 + $0x700] sm:$0xff] }
 0x3a9   :  { %1418 = vmatprep.subr.bf16.mxu1 %v1211_v27  ;;  %1500 = vmatprep.subr.bf16.mxu0 %v1213_v28  ;;  %v1316_v27 = vld [vmem:[#allocation2 + $0x710] sm:$0xff]  ;;  %v1323_v28 = vld [vmem:[#allocation2 + $0x748] sm:$0xff] }
 0x3ac   :  { %1419 = vmatpush1.bf16.msra.mxu1 %v1210_v29  ;;  %1501 = vmatpush1.bf16.msra.mxu0 %v1212_v16  ;;  %v1325_v29 = vld [vmem:[#allocation2 + $0x758] sm:$0xff]  ;;  %v1322_v16 = vld [vmem:[#allocation2 + $0x740] sm:$0xff] }
 0x3ad   :  { %1429 = vmatprep.subr.bf16.mxu1 %v1219_v30  ;;  %1511 = vmatprep.subr.bf16.mxu0 %v1221_v31  ;;  %v1324_v30 = vld [vmem:[#allocation2 + $0x750] sm:$0xff]  ;;  %v1331_v31 = vld [vmem:[#allocation2 + $0x788] sm:$0xff] }
 0x3af   :  { %1421 = vmatmul.mubr.bf16.vlgmr.msra.gmra.mrb[0].mxu1 %v4284_v32  ;;  %1503 = vmatmul.mubr.bf16.vlgmr.msra.gmra.mrb[12].mxu0 %v4284_v32 }
 0x3b0   :  { %1430 = vmatpush1.bf16.msra.mxu1 %v1218_v33  ;;  %1512 = vmatpush1.bf16.msra.mxu0 %v1220_v34  ;;  %v1333_v33 = vld [vmem:[#allocation2 + $0x798] sm:$0xff]  ;;  %v1330_v34 = vld [vmem:[#allocation2 + $0x780] sm:$0xff] }
 0x3b1   :  { %1431 = vmatprep.subr.bf16.mxu1 %v1227_v35  ;;  %1513 = vmatprep.subr.bf16.mxu0 %v1229_v36  ;;  %v1332_v35 = vld [vmem:[#allocation2 + $0x790] sm:$0xff]  ;;  %v1339_v36 = vld [vmem:[#allocation2 + $0x7c8] sm:$0xff] }
 0x3b2   :  { %1461 = vmatprep.mubr.bf16.mxu1 %v4288_v37  ;;  %1543 = vmatprep.mubr.bf16.mxu0 %v4288_v37 }
 0x3b4   :  { %1432 = vmatpush1.bf16.msra.mxu1 %v1226_v15  ;;  %1514 = vmatpush1.bf16.msra.mxu0 %v1228_v38  ;;  %v1341_v15 = vld [vmem:[#allocation2 + $0x7d8] sm:$0xff]  ;;  %v1338_v38 = vld [vmem:[#allocation2 + $0x7c0] sm:$0xff] }
 0x3b5   :  { %1433 = vmatprep.subr.bf16.mxu1 %v1235_v17  ;;  %1515 = vmatprep.subr.bf16.mxu0 %v1237_v39  ;;  %v1340_v17 = vld [vmem:[#allocation2 + $0x7d0] sm:$0xff]  ;;  %v1095_v39 = vld [vmem:[#allocation2 + $0x28] sm:$0xff] }
 0x3b8   :  { %1434 = vmatpush1.bf16.msra.mxu1 %v1234_v22  ;;  %1516 = vmatpush1.bf16.msra.mxu0 %v1236_v40  ;;  %v1097_v22 = vld [vmem:[#allocation2 + $0x38] sm:$0xff]  ;;  %v4296_v40 = vpack.c.bf16 %v4272_v21, %v4272_v21  ;;  %v1111_v21 = vld [vmem:[#allocation2 + $0xa8] sm:$0xff] }
 0x3b9   :  { %1435 = vmatprep.subr.bf16.mxu1 %v1243_v41  ;;  %1517 = vmatprep.subr.bf16.mxu0 %v1245_v42  ;;  %v1094_v41 = vld [vmem:[#allocation2 + $0x20] sm:$0xff]  ;;  %v1096_v42 = vld [vmem:[#allocation2 + $0x30] sm:$0xff] }
 0x3bc   :  { %1436 = vmatpush1.bf16.msra.mxu1 %v1242_v43  ;;  %1518 = vmatpush1.bf16.msra.mxu0 %v1244_v44  ;;  %v1103_v43 = vld [vmem:[#allocation2 + $0x68] sm:$0xff]  ;;  %v1105_v44 = vld [vmem:[#allocation2 + $0x78] sm:$0xff] }
 0x3bd   :  { %1437 = vmatprep.subr.bf16.mxu1 %v1251_v47  ;;  %1519 = vmatprep.subr.bf16.mxu0 %v1253_v49  ;;  %v1102_v47 = vld [vmem:[#allocation2 + $0x60] sm:$0xff]  ;;  %v1104_v49 = vld [vmem:[#allocation2 + $0x70] sm:$0xff] }
 0x3c0   :  { %1438 = vmatpush1.bf16.msra.mxu1 %v1250_v50  ;;  %1520 = vmatpush1.bf16.msra.mxu0 %v1252_v51  ;;  %v1113_v50 = vld [vmem:[#allocation2 + $0xb8] sm:$0xff]  ;;  %v1110_v51 = vld [vmem:[#allocation2 + $0xa0] sm:$0xff] }
 0x3c1   :  { %1439 = vmatprep.subr.bf16.mxu1 %v1259_v52  ;;  %1521 = vmatprep.subr.bf16.mxu0 %v1261_v53  ;;  %v1112_v52 = vld [vmem:[#allocation2 + $0xb0] sm:$0xff]  ;;  %v1119_v53 = vld [vmem:[#allocation2 + $0xe8] sm:$0xff] }
 0x3c4   :  { %1440 = vmatpush1.bf16.msra.mxu1 %v1258_v54  ;;  %1522 = vmatpush1.bf16.msra.mxu0 %v1260_v55  ;;  %v1121_v54 = vld [vmem:[#allocation2 + $0xf8] sm:$0xff]  ;;  %v1118_v55 = vld [vmem:[#allocation2 + $0xe0] sm:$0xff] }
 0x3c5   :  { %1441 = vmatprep.subr.bf16.mxu1 %v1267_v56  ;;  %1523 = vmatprep.subr.bf16.mxu0 %v1269_v57  ;;  %v1120_v56 = vld [vmem:[#allocation2 + $0xf0] sm:$0xff]  ;;  %v1127_v57 = vld [vmem:[#allocation2 + $0x128] sm:$0xff] }
 0x3c8   :  { %1442 = vmatpush1.bf16.msra.mxu1 %v1266_v58  ;;  %1524 = vmatpush1.bf16.msra.mxu0 %v1268_v59  ;;  %v1129_v58 = vld [vmem:[#allocation2 + $0x138] sm:$0xff]  ;;  %v1128_v59 = vld [vmem:[#allocation2 + $0x130] sm:$0xff] }
 0x3c9   :  { %1443 = vmatprep.subr.bf16.mxu1 %v1275_v60  ;;  %1525 = vmatprep.subr.bf16.mxu0 %v1277_v61  ;;  %v1135_v60 = vld [vmem:[#allocation2 + $0x168] sm:$0xff]  ;;  %v1137_v61 = vld [vmem:[#allocation2 + $0x178] sm:$0xff] }
 0x3cc   :  { %1444 = vmatpush1.bf16.msra.mxu1 %v1274_v62  ;;  %1526 = vmatpush1.bf16.msra.mxu0 %v1276_v63  ;;  %v1134_v62 = vld [vmem:[#allocation2 + $0x160] sm:$0xff]  ;;  %v1136_v63 = vld [vmem:[#allocation2 + $0x170] sm:$0xff] }
 0x3cd   :  { %1445 = vmatprep.subr.bf16.mxu1 %v1283_v0  ;;  %1527 = vmatprep.subr.bf16.mxu0 %v1285_v1  ;;  %v1143_v0 = vld [vmem:[#allocation2 + $0x1a8] sm:$0xff]  ;;  %v1145_v1 = vld [vmem:[#allocation2 + $0x1b8] sm:$0xff] }
 0x3d0   :  { %1446 = vmatpush1.bf16.msra.mxu1 %v1282_v2  ;;  %1528 = vmatpush1.bf16.msra.mxu0 %v1284_v5  ;;  %v1142_v2 = vld [vmem:[#allocation2 + $0x1a0] sm:$0xff]  ;;  %v1144_v5 = vld [vmem:[#allocation2 + $0x1b0] sm:$0xff] }
 0x3d1   :  { %1447 = vmatprep.subr.bf16.mxu1 %v1291_v6  ;;  %1529 = vmatprep.subr.bf16.mxu0 %v1293_v7  ;;  %v1151_v6 = vld [vmem:[#allocation2 + $0x1e8] sm:$0xff]  ;;  %v1153_v7 = vld [vmem:[#allocation2 + $0x1f8] sm:$0xff] }
 0x3d4   :  { %1448 = vmatpush1.bf16.msra.mxu1 %v1290_v8  ;;  %1530 = vmatpush1.bf16.msra.mxu0 %v1292_v9  ;;  %v1150_v8 = vld [vmem:[#allocation2 + $0x1e0] sm:$0xff]  ;;  %v1152_v9 = vld [vmem:[#allocation2 + $0x1f0] sm:$0xff] }
 0x3d5   :  { %1449 = vmatprep.subr.bf16.mxu1 %v1299_v10  ;;  %1531 = vmatprep.subr.bf16.mxu0 %v1301_v11  ;;  %v1159_v10 = vld [vmem:[#allocation2 + $0x228] sm:$0xff]  ;;  %v1161_v11 = vld [vmem:[#allocation2 + $0x238] sm:$0xff] }
 0x3d8   :  { %1450 = vmatpush1.bf16.msra.mxu1 %v1298_v12  ;;  %1532 = vmatpush1.bf16.msra.mxu0 %v1300_v13  ;;  %v1158_v12 = vld [vmem:[#allocation2 + $0x220] sm:$0xff]  ;;  %v1160_v13 = vld [vmem:[#allocation2 + $0x230] sm:$0xff] }
 0x3d9   :  { %1451 = vmatprep.subr.bf16.mxu1 %v1307_v14  ;;  %1533 = vmatprep.subr.bf16.mxu0 %v1309_v20  ;;  %v1167_v14 = vld [vmem:[#allocation2 + $0x268] sm:$0xff]  ;;  %v1169_v20 = vld [vmem:[#allocation2 + $0x278] sm:$0xff] }
 0x3dc   :  { %1452 = vmatpush1.bf16.msra.mxu1 %v1306_v23  ;;  %1534 = vmatpush1.bf16.msra.mxu0 %v1308_v24  ;;  %v1166_v23 = vld [vmem:[#allocation2 + $0x260] sm:$0xff]  ;;  %v1168_v24 = vld [vmem:[#allocation2 + $0x270] sm:$0xff] }
 0x3dd   :  { %1453 = vmatprep.subr.bf16.mxu1 %v1315_v25  ;;  %1535 = vmatprep.subr.bf16.mxu0 %v1317_v4  ;;  %v1175_v25 = vld [vmem:[#allocation2 + $0x2a8] sm:$0xff]  ;;  %v1177_v4 = vld [vmem:[#allocation2 + $0x2b8] sm:$0xff] }
 0x3e0   :  { %1454 = vmatpush1.bf16.msra.mxu1 %v1314_v26  ;;  %1536 = vmatpush1.bf16.msra.mxu0 %v1316_v27  ;;  %v1174_v26 = vld [vmem:[#allocation2 + $0x2a0] sm:$0xff]  ;;  %v1176_v27 = vld [vmem:[#allocation2 + $0x2b0] sm:$0xff] }
 0x3e1   :  { %1455 = vmatprep.subr.bf16.mxu1 %v1323_v28  ;;  %1537 = vmatprep.subr.bf16.mxu0 %v1325_v29  ;;  %v1183_v28 = vld [vmem:[#allocation2 + $0x2e8] sm:$0xff]  ;;  %v1185_v29 = vld [vmem:[#allocation2 + $0x2f8] sm:$0xff] }
 0x3e4   :  { %1456 = vmatpush1.bf16.msra.mxu1 %v1322_v16  ;;  %1538 = vmatpush1.bf16.msra.mxu0 %v1324_v30  ;;  %v1182_v16 = vld [vmem:[#allocation2 + $0x2e0] sm:$0xff]  ;;  %v1184_v30 = vld [vmem:[#allocation2 + $0x2f0] sm:$0xff] }
 0x3e5   :  { %1457 = vmatprep.subr.bf16.mxu1 %v1331_v31  ;;  %1539 = vmatprep.subr.bf16.mxu0 %v1333_v33  ;;  %v1191_v31 = vld [vmem:[#allocation2 + $0x328] sm:$0xff]  ;;  %v1193_v33 = vld [vmem:[#allocation2 + $0x338] sm:$0xff] }
 0x3e8   :  { %1458 = vmatpush1.bf16.msra.mxu1 %v1330_v34  ;;  %1540 = vmatpush1.bf16.msra.mxu0 %v1332_v35  ;;  %v1190_v34 = vld [vmem:[#allocation2 + $0x320] sm:$0xff]  ;;  %v1192_v35 = vld [vmem:[#allocation2 + $0x330] sm:$0xff] }
 0x3e9   :  { %1459 = vmatprep.subr.bf16.mxu1 %v1339_v36  ;;  %1541 = vmatprep.subr.bf16.mxu0 %v1341_v15  ;;  %v1199_v36 = vld [vmem:[#allocation2 + $0x368] sm:$0xff]  ;;  %v1201_v15 = vld [vmem:[#allocation2 + $0x378] sm:$0xff] }
 0x3ec   :  { %1460 = vmatpush1.bf16.msra.mxu1 %v1338_v38  ;;  %1542 = vmatpush1.bf16.msra.mxu0 %v1340_v17  ;;  %v1198_v38 = vld [vmem:[#allocation2 + $0x360] sm:$0xff]  ;;  %v1200_v17 = vld [vmem:[#allocation2 + $0x370] sm:$0xff] }
 0x3ed   :  { %1552 = vmatprep.subr.bf16.mxu1 %v1095_v39  ;;  %1634 = vmatprep.subr.bf16.mxu0 %v1097_v22  ;;  %v1207_v39 = vld [vmem:[#allocation2 + $0x3a8] sm:$0xff]  ;;  %v1209_v22 = vld [vmem:[#allocation2 + $0x3b8] sm:$0xff] }
 0x3ef   :  { %1462 = vmatmul.mubr.bf16.vlgmr.msra.gmra.mrb[0].mxu1 %v4296_v40  ;;  %1544 = vmatmul.mubr.bf16.vlgmr.msra.gmra.mrb[12].mxu0 %v4296_v40 }
 0x3f0   :  { %1553 = vmatpush1.bf16.msra.mxu1 %v1094_v41  ;;  %1635 = vmatpush1.bf16.msra.mxu0 %v1096_v42  ;;  %v1206_v41 = vld [vmem:[#allocation2 + $0x3a0] sm:$0xff]  ;;  %v1208_v42 = vld [vmem:[#allocation2 + $0x3b0] sm:$0xff] }
 0x3f1   :  { %1554 = vmatprep.subr.bf16.mxu1 %v1103_v43  ;;  %1636 = vmatprep.subr.bf16.mxu0 %v1105_v44  ;;  %v1215_v43 = vld [vmem:[#allocation2 + $0x3e8] sm:$0xff]  ;;  %v1217_v44 = vld [vmem:[#allocation2 + $0x3f8] sm:$0xff] }
 0x3f2   :  { %1584 = vmatprep.mubr.bf16.mxu1 %v4278_v3  ;;  %1666 = vmatprep.mubr.bf16.mxu0 %v4278_v3  ;;  %v1126_v3 = vld [vmem:[#allocation2 + $0x120] sm:$0xff] }
 0x3f4   :  { %1555 = vmatpush1.bf16.msra.mxu1 %v1102_v47  ;;  %1637 = vmatpush1.bf16.msra.mxu0 %v1104_v49  ;;  %v1214_v47 = vld [vmem:[#allocation2 + $0x3e0] sm:$0xff]  ;;  %v1216_v49 = vld [vmem:[#allocation2 + $0x3f0] sm:$0xff] }
 0x3f5   :  { %1556 = vmatprep.subr.bf16.mxu1 %v1111_v21  ;;  %1638 = vmatprep.subr.bf16.mxu0 %v1113_v50  ;;  %v1223_v21 = vld [vmem:[#allocation2 + $0x428] sm:$0xff]  ;;  %v1225_v50 = vld [vmem:[#allocation2 + $0x438] sm:$0xff] }
 0x3f8   :  { %1557 = vmatpush1.bf16.msra.mxu1 %v1110_v51  ;;  %1639 = vmatpush1.bf16.msra.mxu0 %v1112_v52  ;;  %v1222_v51 = vld [vmem:[#allocation2 + $0x420] sm:$0xff]  ;;  %v1224_v52 = vld [vmem:[#allocation2 + $0x430] sm:$0xff] }
 0x3f9   :  { %1558 = vmatprep.subr.bf16.mxu1 %v1119_v53  ;;  %1640 = vmatprep.subr.bf16.mxu0 %v1121_v54  ;;  %v1231_v53 = vld [vmem:[#allocation2 + $0x468] sm:$0xff]  ;;  %v1233_v54 = vld [vmem:[#allocation2 + $0x478] sm:$0xff] }
 0x3fc   :  { %1559 = vmatpush1.bf16.msra.mxu1 %v1118_v55  ;;  %1641 = vmatpush1.bf16.msra.mxu0 %v1120_v56  ;;  %v1230_v55 = vld [vmem:[#allocation2 + $0x460] sm:$0xff]  ;;  %v1232_v56 = vld [vmem:[#allocation2 + $0x470] sm:$0xff] }
 0x3fd   :  { %1560 = vmatprep.subr.bf16.mxu1 %v1127_v57  ;;  %1642 = vmatprep.subr.bf16.mxu0 %v1129_v58  ;;  %v1239_v57 = vld [vmem:[#allocation2 + $0x4a8] sm:$0xff]  ;;  %v1241_v58 = vld [vmem:[#allocation2 + $0x4b8] sm:$0xff] }
 0x400   :  { %1561 = vmatpush1.bf16.msra.mxu1 %v1126_v3  ;;  %1643 = vmatpush1.bf16.msra.mxu0 %v1128_v59  ;;  %v1238_v3 = vld [vmem:[#allocation2 + $0x4a0] sm:$0xff]  ;;  %v1240_v59 = vld [vmem:[#allocation2 + $0x4b0] sm:$0xff] }
 0x401   :  { %1562 = vmatprep.subr.bf16.mxu1 %v1135_v60  ;;  %1644 = vmatprep.subr.bf16.mxu0 %v1137_v61  ;;  %v1247_v60 = vld [vmem:[#allocation2 + $0x4e8] sm:$0xff]  ;;  %v1246_v61 = vld [vmem:[#allocation2 + $0x4e0] sm:$0xff] }
 0x404   :  { %1563 = vmatpush1.bf16.msra.mxu1 %v1134_v62  ;;  %1645 = vmatpush1.bf16.msra.mxu0 %v1136_v63  ;;  %v1248_v62 = vld [vmem:[#allocation2 + $0x4f0] sm:$0xff]  ;;  %v1255_v63 = vld [vmem:[#allocation2 + $0x528] sm:$0xff] }
 0x405   :  { %1564 = vmatprep.subr.bf16.mxu1 %v1143_v0  ;;  %1646 = vmatprep.subr.bf16.mxu0 %v1145_v1  ;;  %v1257_v0 = vld [vmem:[#allocation2 + $0x538] sm:$0xff]  ;;  %v1256_v1 = vld [vmem:[#allocation2 + $0x530] sm:$0xff] }
 0x408   :  { %1565 = vmatpush1.bf16.msra.mxu1 %v1142_v2  ;;  %1647 = vmatpush1.bf16.msra.mxu0 %v1144_v5  ;;  %v1263_v2 = vld [vmem:[#allocation2 + $0x568] sm:$0xff]  ;;  %v1265_v5 = vld [vmem:[#allocation2 + $0x578] sm:$0xff] }
 0x409   :  { %1566 = vmatprep.subr.bf16.mxu1 %v1151_v6  ;;  %1648 = vmatprep.subr.bf16.mxu0 %v1153_v7  ;;  %v1262_v6 = vld [vmem:[#allocation2 + $0x560] sm:$0xff]  ;;  %v1264_v7 = vld [vmem:[#allocation2 + $0x570] sm:$0xff] }
 0x40c   :  { %1567 = vmatpush1.bf16.msra.mxu1 %v1150_v8  ;;  %1649 = vmatpush1.bf16.msra.mxu0 %v1152_v9  ;;  %v1271_v8 = vld [vmem:[#allocation2 + $0x5a8] sm:$0xff]  ;;  %v1273_v9 = vld [vmem:[#allocation2 + $0x5b8] sm:$0xff] }
 0x40d   :  { %1568 = vmatprep.subr.bf16.mxu1 %v1159_v10  ;;  %1650 = vmatprep.subr.bf16.mxu0 %v1161_v11  ;;  %v1270_v10 = vld [vmem:[#allocation2 + $0x5a0] sm:$0xff]  ;;  %v1272_v11 = vld [vmem:[#allocation2 + $0x5b0] sm:$0xff] }
 0x410   :  { %1569 = vmatpush1.bf16.msra.mxu1 %v1158_v12  ;;  %1651 = vmatpush1.bf16.msra.mxu0 %v1160_v13  ;;  %v1279_v12 = vld [vmem:[#allocation2 + $0x5e8] sm:$0xff]  ;;  %v1281_v13 = vld [vmem:[#allocation2 + $0x5f8] sm:$0xff] }
 0x411   :  { %1570 = vmatprep.subr.bf16.mxu1 %v1167_v14  ;;  %1652 = vmatprep.subr.bf16.mxu0 %v1169_v20  ;;  %v1278_v14 = vld [vmem:[#allocation2 + $0x5e0] sm:$0xff]  ;;  %v1280_v20 = vld [vmem:[#allocation2 + $0x5f0] sm:$0xff] }
 0x414   :  { %1571 = vmatpush1.bf16.msra.mxu1 %v1166_v23  ;;  %1653 = vmatpush1.bf16.msra.mxu0 %v1168_v24  ;;  %v1287_v23 = vld [vmem:[#allocation2 + $0x628] sm:$0xff]  ;;  %v1289_v24 = vld [vmem:[#allocation2 + $0x638] sm:$0xff] }
 0x415   :  { %1572 = vmatprep.subr.bf16.mxu1 %v1175_v25  ;;  %1654 = vmatprep.subr.bf16.mxu0 %v1177_v4  ;;  %v1286_v25 = vld [vmem:[#allocation2 + $0x620] sm:$0xff]  ;;  %v1288_v4 = vld [vmem:[#allocation2 + $0x630] sm:$0xff] }
 0x418   :  { %1573 = vmatpush1.bf16.msra.mxu1 %v1174_v26  ;;  %1655 = vmatpush1.bf16.msra.mxu0 %v1176_v27  ;;  %v1295_v26 = vld [vmem:[#allocation2 + $0x668] sm:$0xff]  ;;  %v1297_v27 = vld [vmem:[#allocation2 + $0x678] sm:$0xff] }
 0x419   :  { %1574 = vmatprep.subr.bf16.mxu1 %v1183_v28  ;;  %1656 = vmatprep.subr.bf16.mxu0 %v1185_v29  ;;  %v1294_v28 = vld [vmem:[#allocation2 + $0x660] sm:$0xff]  ;;  %v1296_v29 = vld [vmem:[#allocation2 + $0x670] sm:$0xff] }
 0x41c   :  { %1575 = vmatpush1.bf16.msra.mxu1 %v1182_v16  ;;  %1657 = vmatpush1.bf16.msra.mxu0 %v1184_v30  ;;  %v1303_v16 = vld [vmem:[#allocation2 + $0x6a8] sm:$0xff]  ;;  %v1305_v30 = vld [vmem:[#allocation2 + $0x6b8] sm:$0xff] }
 0x41d   :  { %1576 = vmatprep.subr.bf16.mxu1 %v1191_v31  ;;  %1658 = vmatprep.subr.bf16.mxu0 %v1193_v33  ;;  %v1302_v31 = vld [vmem:[#allocation2 + $0x6a0] sm:$0xff]  ;;  %v1304_v33 = vld [vmem:[#allocation2 + $0x6b0] sm:$0xff] }
 0x420   :  { %1577 = vmatpush1.bf16.msra.mxu1 %v1190_v34  ;;  %1659 = vmatpush1.bf16.msra.mxu0 %v1192_v35  ;;  %v1311_v34 = vld [vmem:[#allocation2 + $0x6e8] sm:$0xff]  ;;  %v1313_v35 = vld [vmem:[#allocation2 + $0x6f8] sm:$0xff] }
 0x421   :  { %1578 = vmatprep.subr.bf16.mxu1 %v1199_v36  ;;  %1660 = vmatprep.subr.bf16.mxu0 %v1201_v15  ;;  %v1310_v36 = vld [vmem:[#allocation2 + $0x6e0] sm:$0xff]  ;;  %v1312_v15 = vld [vmem:[#allocation2 + $0x6f0] sm:$0xff] }
 0x424   :  { %1579 = vmatpush1.bf16.msra.mxu1 %v1198_v38  ;;  %1661 = vmatpush1.bf16.msra.mxu0 %v1200_v17  ;;  %v1319_v38 = vld [vmem:[#allocation2 + $0x728] sm:$0xff]  ;;  %v1321_v17 = vld [vmem:[#allocation2 + $0x738] sm:$0xff] }
 0x425   :  { %1580 = vmatprep.subr.bf16.mxu1 %v1207_v39  ;;  %1662 = vmatprep.subr.bf16.mxu0 %v1209_v22  ;;  %v1318_v39 = vld [vmem:[#allocation2 + $0x720] sm:$0xff]  ;;  %v1320_v22 = vld [vmem:[#allocation2 + $0x730] sm:$0xff] }
 0x428   :  { %1581 = vmatpush1.bf16.msra.mxu1 %v1206_v41  ;;  %1663 = vmatpush1.bf16.msra.mxu0 %v1208_v42  ;;  %v1327_v41 = vld [vmem:[#allocation2 + $0x768] sm:$0xff]  ;;  %v1329_v42 = vld [vmem:[#allocation2 + $0x778] sm:$0xff] }
 0x429   :  { %1582 = vmatprep.subr.bf16.mxu1 %v1215_v43  ;;  %1664 = vmatprep.subr.bf16.mxu0 %v1217_v44  ;;  %v1326_v43 = vld [vmem:[#allocation2 + $0x760] sm:$0xff]  ;;  %v1328_v44 = vld [vmem:[#allocation2 + $0x770] sm:$0xff] }
 0x42c   :  { %1583 = vmatpush1.bf16.msra.mxu1 %v1214_v47  ;;  %1665 = vmatpush1.bf16.msra.mxu0 %v1216_v49  ;;  %v1335_v47 = vld [vmem:[#allocation2 + $0x7a8] sm:$0xff]  ;;  %v1337_v49 = vld [vmem:[#allocation2 + $0x7b8] sm:$0xff] }
 0x42d   :  { %1593 = vmatprep.subr.bf16.mxu1 %v1223_v21  ;;  %1675 = vmatprep.subr.bf16.mxu0 %v1225_v50  ;;  %v1334_v21 = vld [vmem:[#allocation2 + $0x7a0] sm:$0xff]  ;;  %v1336_v50 = vld [vmem:[#allocation2 + $0x7b0] sm:$0xff] }
 0x42f   :  { %1585 = vmatmul.mubr.bf16.vlgmr.msra.gmra.mrb[4].mxu1 %v4284_v32  ;;  %1667 = vmatmul.mubr.bf16.vlgmr.msra.gmra.mrb[16].mxu0 %v4284_v32  ;;  %v1249_v32 = vld [vmem:[#allocation2 + $0x4f8] sm:$0xff] }
 0x430   :  { %1594 = vmatpush1.bf16.msra.mxu1 %v1222_v51  ;;  %1676 = vmatpush1.bf16.msra.mxu0 %v1224_v52  ;;  %v1343_v51 = vld [vmem:[#allocation2 + $0x7e8] sm:$0xff]  ;;  %v1345_v52 = vld [vmem:[#allocation2 + $0x7f8] sm:$0xff] }
 0x431   :  { %1595 = vmatprep.subr.bf16.mxu1 %v1231_v53  ;;  %1677 = vmatprep.subr.bf16.mxu0 %v1233_v54  ;;  %v1342_v53 = vld [vmem:[#allocation2 + $0x7e0] sm:$0xff]  ;;  %v1344_v54 = vld [vmem:[#allocation2 + $0x7f0] sm:$0xff] }
 0x432   :  { %1625 = vmatprep.mubr.bf16.mxu1 %v4288_v37  ;;  %1707 = vmatprep.mubr.bf16.mxu0 %v4288_v37  ;;  %v1254_v37 = vld [vmem:[#allocation2 + $0x520] sm:$0xff] }
 0x434   :  { %1596 = vmatpush1.bf16.msra.mxu1 %v1230_v55  ;;  %1678 = vmatpush1.bf16.msra.mxu0 %v1232_v56  ;;  %v4308_v55 = vld [vmem:[#allocation20] sm:$0xff] }
 0x435   :  { %1597 = vmatprep.subr.bf16.mxu1 %v1239_v57  ;;  %1679 = vmatprep.subr.bf16.mxu0 %v1241_v58  ;;  %v1351_v56 = vrot.slane %v4308_v55, %v4217_v46  ;;  %v1359_v57 = vrot.slane %v4308_v55, %v4255_v18  ;;  %v1355_v58 = vrot.slane %v4308_v55, %v4220_v48 }
 0x438   :  { %1598 = vmatpush1.bf16.msra.mxu1 %v1238_v3  ;;  %1680 = vmatpush1.bf16.msra.mxu0 %v1240_v59  ;;  %v1363_v3 = vrot.slane %v4308_v55, %v4258_v19 }
 0x439   :  { %1599 = vmatprep.subr.bf16.mxu1 %v1247_v60  ;;  %1681 = vmatprep.subr.bf16.mxu0 %v1249_v32 }
 0x43c   :  { %1600 = vmatpush1.bf16.msra.mxu1 %v1246_v61  ;;  %1682 = vmatpush1.bf16.msra.mxu0 %v1248_v62 }
 0x43d   :  { %1601 = vmatprep.subr.bf16.mxu1 %v1255_v63  ;;  %1683 = vmatprep.subr.bf16.mxu0 %v1257_v0 }
 0x440   :  { %1602 = vmatpush1.bf16.msra.mxu1 %v1254_v37  ;;  %1684 = vmatpush1.bf16.msra.mxu0 %v1256_v1 }
 0x441   :  { %1603 = vmatprep.subr.bf16.mxu1 %v1263_v2  ;;  %1685 = vmatprep.subr.bf16.mxu0 %v1265_v5 }
 0x444   :  { %1604 = vmatpush1.bf16.msra.mxu1 %v1262_v6  ;;  %1686 = vmatpush1.bf16.msra.mxu0 %v1264_v7 }
 0x445   :  { %1605 = vmatprep.subr.bf16.mxu1 %v1271_v8  ;;  %1687 = vmatprep.subr.bf16.mxu0 %v1273_v9 }
 0x448   :  { %1606 = vmatpush1.bf16.msra.mxu1 %v1270_v10  ;;  %1688 = vmatpush1.bf16.msra.mxu0 %v1272_v11 }
 0x449   :  { %1607 = vmatprep.subr.bf16.mxu1 %v1279_v12  ;;  %1689 = vmatprep.subr.bf16.mxu0 %v1281_v13 }
 0x44c   :  { %1608 = vmatpush1.bf16.msra.mxu1 %v1278_v14  ;;  %1690 = vmatpush1.bf16.msra.mxu0 %v1280_v20 }
 0x44d   :  { %1609 = vmatprep.subr.bf16.mxu1 %v1287_v23  ;;  %1691 = vmatprep.subr.bf16.mxu0 %v1289_v24 }
 0x450   :  { %1610 = vmatpush1.bf16.msra.mxu1 %v1286_v25  ;;  %1692 = vmatpush1.bf16.msra.mxu0 %v1288_v4 }
 0x451   :  { %1611 = vmatprep.subr.bf16.mxu1 %v1295_v26  ;;  %1693 = vmatprep.subr.bf16.mxu0 %v1297_v27 }
 0x454   :  { %1612 = vmatpush1.bf16.msra.mxu1 %v1294_v28  ;;  %1694 = vmatpush1.bf16.msra.mxu0 %v1296_v29 }
 0x455   :  { %1613 = vmatprep.subr.bf16.mxu1 %v1303_v16  ;;  %1695 = vmatprep.subr.bf16.mxu0 %v1305_v30 }
 0x458   :  { %1614 = vmatpush1.bf16.msra.mxu1 %v1302_v31  ;;  %1696 = vmatpush1.bf16.msra.mxu0 %v1304_v33 }
 0x459   :  { %1615 = vmatprep.subr.bf16.mxu1 %v1311_v34  ;;  %1697 = vmatprep.subr.bf16.mxu0 %v1313_v35 }
 0x45c   :  { %1616 = vmatpush1.bf16.msra.mxu1 %v1310_v36  ;;  %1698 = vmatpush1.bf16.msra.mxu0 %v1312_v15 }
 0x45d   :  { %1617 = vmatprep.subr.bf16.mxu1 %v1319_v38  ;;  %1699 = vmatprep.subr.bf16.mxu0 %v1321_v17 }
 0x460   :  { %1618 = vmatpush1.bf16.msra.mxu1 %v1318_v39  ;;  %1700 = vmatpush1.bf16.msra.mxu0 %v1320_v22 }
 0x461   :  { %1619 = vmatprep.subr.bf16.mxu1 %v1327_v41  ;;  %1701 = vmatprep.subr.bf16.mxu0 %v1329_v42 }
 0x464   :  { %1620 = vmatpush1.bf16.msra.mxu1 %v1326_v43  ;;  %1702 = vmatpush1.bf16.msra.mxu0 %v1328_v44 }
 0x465   :  { %1621 = vmatprep.subr.bf16.mxu1 %v1335_v47  ;;  %1703 = vmatprep.subr.bf16.mxu0 %v1337_v49 }
 0x468   :  { %1622 = vmatpush1.bf16.msra.mxu1 %v1334_v21  ;;  %1704 = vmatpush1.bf16.msra.mxu0 %v1336_v50 }
 0x469   :  { %1623 = vmatprep.subr.bf16.mxu1 %v1343_v51  ;;  %1705 = vmatprep.subr.bf16.mxu0 %v1345_v52 }
 0x46c   :  { %1624 = vmatpush1.bf16.msra.mxu1 %v1342_v53  ;;  %1706 = vmatpush1.bf16.msra.mxu0 %v1344_v54 }
 0x46f   :  { %1626 = vmatmul.mubr.bf16.vlgmr.msra.gmra.mrb[4].mxu1 %v4296_v40  ;;  %1708 = vmatmul.mubr.bf16.vlgmr.msra.gmra.mrb[16].mxu0 %v4296_v40 }
 0x4c2   :  { %v1463_v59 = vpop.f32.mrb[0].mxu1  ;;  %v1545_v60 = vpop.f32.mrb[12].mxu0 }
 0x4c3   :  { %v3356_v32 = vadd.f32 %v1463_v59, %v1351_v56  ;;  %v3358_v61 = vadd.f32 %v1545_v60, %v1359_v57  ;;  %v1465_v62 = vpop.f32.mrb[1].mxu1  ;;  %v1547_v40 = vpop.f32.mrb[13].mxu0 }
 0x4c4   :  { %v3357_v63 = vadd.f32 %v1465_v62, %v1355_v58  ;;  %v3359_v0 = vadd.f32 %v1547_v40, %v1363_v3  ;;  %v1467_v37 = vpop.f32.mrb[2].mxu1  ;;  %v1549_v1 = vpop.f32.mrb[14].mxu0 }
 0x4c5   :  { %vm1716_vm7 = vcmp.gt.f32.partialorder %v3356_v32, 0.0  ;;  %v1724_v2 = vmul.f32 0.2, %v3356_v32  ;;  %vm1718_vm8 = vcmp.gt.f32.partialorder %v3358_v61, 0.0  ;;  %v1726_v5 = vmul.f32 0.2, %v3358_v61 }
 0x4c6   :  { %vm1717_vm9 = vcmp.gt.f32.partialorder %v3357_v63, 0.0  ;;  %v1725_v6 = vmul.f32 0.2, %v3357_v63  ;;  %vm1719_vm10 = vcmp.gt.f32.partialorder %v3359_v0, 0.0  ;;  %v1727_v7 = vmul.f32 0.2, %v3359_v0 }
 0x4c7   :  { %v1732_v8 = vsel %vm1716_vm7, %v3356_v32, %v1724_v2  ;;  %v1734_v9 = vsel %vm1718_vm8, %v3358_v61, %v1726_v5  ;;  %v1468_v10 = vpop.f32.mrb[3].mxu1  ;;  %v1550_v11 = vpop.f32.mrb[15].mxu0 }
 0x4c8   :  { %v1742_v12 = vrot.slane %v1732_v8, 4  ;;  %v1754_v13 = vrot.slane %v1734_v9, 4  ;;  %v1733_v14 = vsel %vm1717_vm9, %v3357_v63, %v1725_v6  ;;  %v1735_v20 = vsel %vm1719_vm10, %v3359_v0, %v1727_v7 }
 0x4c9   :  { %v1748_v23 = vrot.slane %v1733_v14, 4  ;;  %v1760_v24 = vrot.slane %v1735_v20, 4 }
 0x4ca   :  { %v1743_v25 = vadd.f32 %v1742_v12, %v1732_v8  ;;  %v1755_v4 = vadd.f32 %v1754_v13, %v1734_v9 }
 0x4cb   :  { %v1749_v26 = vadd.f32 %v1748_v23, %v1733_v14  ;;  %v1761_v27 = vadd.f32 %v1760_v24, %v1735_v20 }
 0x4cc   :  { %v1744_v28 = vrot.slane %v1743_v25, 2  ;;  %v1756_v29 = vrot.slane %v1755_v4, 2 }
 0x4cd   :  { %v1750_v16 = vrot.slane %v1749_v26, 2  ;;  %v1762_v30 = vrot.slane %v1761_v27, 2 }
 0x4ce   :  { %v1745_v31 = vadd.f32 %v1744_v28, %v1743_v25  ;;  %v1757_v33 = vadd.f32 %v1756_v29, %v1755_v4 }
 0x4cf   :  { %v1751_v34 = vadd.f32 %v1750_v16, %v1749_v26  ;;  %v1763_v35 = vadd.f32 %v1762_v30, %v1761_v27  ;;  %v4318_v16 = vld [vmem:[#allocation22] sm:$0xff]  ;;  %v4320_v30 = vld [vmem:[#allocation23] sm:$0xff] }
 0x4d0   :  { %v1746_v36 = vrot.slane %v1745_v31, 1  ;;  %v1758_v15 = vrot.slane %v1757_v33, 1 }
 0x4d1   :  { %v1752_v38 = vrot.slane %v1751_v34, 1  ;;  %v1764_v17 = vrot.slane %v1763_v35, 1 }
 0x4d2   :  { %v1747_v39 = vadd.f32 %v1746_v36, %v1745_v31  ;;  %v1759_v22 = vadd.f32 %v1758_v15, %v1757_v33  ;;  %v1898_v31 = vrot.slane %v4318_v16, %v4217_v46  ;;  %v1947_v15 = vrot.slane %v4320_v30, %v4217_v46 }
 0x4d3   :  { %v1753_v41 = vadd.f32 %v1752_v38, %v1751_v34  ;;  %v1765_v42 = vadd.f32 %v1764_v17, %v1763_v35  ;;  %v1906_v34 = vrot.slane %v4318_v16, %v4255_v18  ;;  %v1902_v38 = vrot.slane %v4318_v16, %v4220_v48 }
 0x4d4   :  { %v1790_v43 = vmul.f32 0.125, %v1747_v39  ;;  %v1792_v44 = vmul.f32 0.125, %v1759_v22  ;;  %v1955_v22 = vrot.slane %v4320_v30, %v4255_v18 }
 0x4d5   :  { %v1791_v47 = vmul.f32 0.125, %v1753_v41  ;;  %v1793_v49 = vmul.f32 0.125, %v1765_v42  ;;  %v1910_v41 = vrot.slane %v4318_v16, %v4258_v19 }
 0x4d6   :  { %v1798_v21 = vsub.f32 %v1732_v8, %v1790_v43  ;;  %v1800_v50 = vsub.f32 %v1734_v9, %v1792_v44 }
 0x4d7   :  { %v1799_v51 = vsub.f32 %v1733_v14, %v1791_v47  ;;  %v1801_v52 = vsub.f32 %v1735_v20, %v1793_v49  ;;  %v1951_v47 = vrot.slane %v4320_v30, %v4220_v48 }
 0x4d8   :  { %v1806_v53 = vmul.f32 %v1798_v21, %v1798_v21  ;;  %v1808_v54 = vmul.f32 %v1800_v50, %v1800_v50 }
 0x4d9   :  { %v1807_v56 = vmul.f32 %v1799_v51, %v1799_v51  ;;  %v1809_v57 = vmul.f32 %v1801_v52, %v1801_v52 }
 0x4da   :  { %v1814_v58 = vrot.slane %v1806_v53, 4  ;;  %v1826_v3 = vrot.slane %v1808_v54, 4 }
 0x4db   :  { %v1820_v59 = vrot.slane %v1807_v56, 4  ;;  %v1832_v60 = vrot.slane %v1809_v57, 4 }
 0x4dc   :  { %v1815_v32 = vadd.f32 %v1814_v58, %v1806_v53  ;;  %v1827_v61 = vadd.f32 %v1826_v3, %v1808_v54  ;;  %v1959_v53 = vrot.slane %v4320_v30, %v4258_v19 }
 0x4dd   :  { %v1821_v62 = vadd.f32 %v1820_v59, %v1807_v56  ;;  %v1833_v40 = vadd.f32 %v1832_v60, %v1809_v57  ;;  %v4350_v59 = vsub.s32 6, %v4214_v45  ;;  %v4356_v60 = vsub.s32 7, %v4214_v45 }
 0x4de   :  { %v1816_v63 = vrot.slane %v1815_v32, 2  ;;  %v1828_v0 = vrot.slane %v1827_v61, 2 }
 0x4df   :  { %v1822_v37 = vrot.slane %v1821_v62, 2  ;;  %v1834_v1 = vrot.slane %v1833_v40, 2 }
 0x4e0   :  { %v1817_v2 = vadd.f32 %v1816_v63, %v1815_v32  ;;  %v1829_v5 = vadd.f32 %v1828_v0, %v1827_v61  ;;  %v1375_v61 = vrot.slane %v4308_v55, %v4350_v59 }
 0x4e1   :  { %v1823_v6 = vadd.f32 %v1822_v37, %v1821_v62  ;;  %v1835_v7 = vadd.f32 %v1834_v1, %v1833_v40  ;;  %v1379_v40 = vrot.slane %v4308_v55, %v4356_v60 }
 0x4e2   :  { %v1818_v8 = vrot.slane %v1817_v2, 1  ;;  %v1830_v9 = vrot.slane %v1829_v5, 1 }
 0x4e3   :  { %v1824_v10 = vrot.slane %v1823_v6, 1  ;;  %v1836_v11 = vrot.slane %v1835_v7, 1 }
 0x4e4   :  { %v1819_v12 = vadd.f32 %v1818_v8, %v1817_v2  ;;  %v1831_v13 = vadd.f32 %v1830_v9, %v1829_v5 }
 0x4e5   :  { %v1825_v14 = vadd.f32 %v1824_v10, %v1823_v6  ;;  %v1837_v20 = vadd.f32 %v1836_v11, %v1835_v7 }
 0x4e6   :  { %v1862_v23 = vmul.f32 0.125, %v1819_v12  ;;  %v1864_v24 = vmul.f32 0.125, %v1831_v13 }
 0x4e7   :  { %v1863_v25 = vmul.f32 0.125, %v1825_v14  ;;  %v1865_v4 = vmul.f32 0.125, %v1837_v20 }
 0x4e8   :  { %v1870_v26 = vadd.f32 1e-05, %v1862_v23  ;;  %v1872_v27 = vadd.f32 1e-05, %v1864_v24 }
 0x4e9   :  { %v1871_v28 = vadd.f32 1e-05, %v1863_v25  ;;  %v1873_v29 = vadd.f32 1e-05, %v1865_v4 }
 0x4ea   :  { %3575 = vrsqrt.f32 %v1870_v26 }
 0x4eb   :  { %3577 = vrsqrt.f32 %v1872_v27 }
 0x4ec   :  { %3579 = vrsqrt.f32 %v1871_v28 }
 0x4ed   :  { %3581 = vrsqrt.f32 %v1873_v29 }
 0x4f4   :  { %v3576_v33 = vpop.eup %3575 }
 0x4f5   :  { %v3578_v35 = vpop.eup %3577  ;;  %v1886_v36 = vmul.f32 %v3576_v33, %v1798_v21 }
 0x4f6   :  { %v3580_v17 = vpop.eup %3579  ;;  %v1888_v39 = vmul.f32 %v3578_v35, %v1800_v50 }
 0x4f7   :  { %v3582_v42 = vpop.eup %3581  ;;  %v1935_v43 = vmul.f32 %v1898_v31, %v1886_v36  ;;  %v1887_v44 = vmul.f32 %v3580_v17, %v1799_v51  ;;  %v4347_v51 = vsub.s32 4, %v4214_v45 }
 0x4f8   :  { %v1937_v49 = vmul.f32 %v1906_v34, %v1888_v39  ;;  %v1889_v21 = vmul.f32 %v3582_v42, %v1801_v52  ;;  %v4353_v52 = vsub.s32 5, %v4214_v45 }
 0x4f9   :  { %v4338_v54 = vadd.f32 %v1947_v15, %v1935_v43  ;;  %v1936_v50 = vmul.f32 %v1902_v38, %v1887_v44  ;;  %v1367_v32 = vrot.slane %v4308_v55, %v4347_v51 }
 0x4fa   :  { %v4340_v56 = vadd.f32 %v1955_v22, %v1937_v49  ;;  %v1938_v57 = vmul.f32 %v1910_v41, %v1889_v21  ;;  %v1371_v62 = vrot.slane %v4308_v55, %v4353_v52 }
 0x4fb   :  { %v4342_v58 = vadd.f32 %v1951_v47, %v1936_v50 }
 0x4fc   :  { %v4344_v3 = vadd.f32 %v1959_v53, %v1938_v57 }
 0x542   :  { %v1627_v63 = vpop.f32.mrb[4].mxu1  ;;  %v1709_v0 = vpop.f32.mrb[16].mxu0 }
 0x543   :  { %v3360_v37 = vadd.f32 %v1627_v63, %v1367_v32  ;;  %v3362_v1 = vadd.f32 %v1709_v0, %v1375_v61  ;;  %v1629_v2 = vpop.f32.mrb[5].mxu1  ;;  %v1711_v5 = vpop.f32.mrb[17].mxu0 }
 0x544   :  { %v3361_v45 = vadd.f32 %v1629_v2, %v1371_v62  ;;  %v3363_v6 = vadd.f32 %v1711_v5, %v1379_v40  ;;  %v1631_v7 = vpop.f32.mrb[6].mxu1  ;;  %v1713_v8 = vpop.f32.mrb[18].mxu0 }
 0x545   :  { %vm1720_vm11 = vcmp.gt.f32.partialorder %v3360_v37, 0.0  ;;  %v1728_v9 = vmul.f32 0.2, %v3360_v37  ;;  %vm1722_vm12 = vcmp.gt.f32.partialorder %v3362_v1, 0.0  ;;  %v1730_v10 = vmul.f32 0.2, %v3362_v1 }
 0x546   :  { %vm1721_vm13 = vcmp.gt.f32.partialorder %v3361_v45, 0.0  ;;  %v1729_v11 = vmul.f32 0.2, %v3361_v45  ;;  %vm1723_vm14 = vcmp.gt.f32.partialorder %v3363_v6, 0.0  ;;  %v1731_v12 = vmul.f32 0.2, %v3363_v6 }
 0x547   :  { %v1736_v13 = vsel %vm1720_vm11, %v3360_v37, %v1728_v9  ;;  %v1738_v55 = vsel %vm1722_vm12, %v3362_v1, %v1730_v10  ;;  %v1632_v14 = vpop.f32.mrb[7].mxu1  ;;  %v1714_v20 = vpop.f32.mrb[19].mxu0 }
 0x548   :  { %v1766_v23 = vrot.slane %v1736_v13, 4  ;;  %v1778_v24 = vrot.slane %v1738_v55, 4  ;;  %v1737_v25 = vsel %vm1721_vm13, %v3361_v45, %v1729_v11  ;;  %v1739_v4 = vsel %vm1723_vm14, %v3363_v6, %v1731_v12 }
 0x549   :  { %v1772_v26 = vrot.slane %v1737_v25, 4  ;;  %v1784_v27 = vrot.slane %v1739_v4, 4 }
 0x54a   :  { %v1767_v28 = vadd.f32 %v1766_v23, %v1736_v13  ;;  %v1779_v29 = vadd.f32 %v1778_v24, %v1738_v55 }
 0x54b   :  { %v1773_v31 = vadd.f32 %v1772_v26, %v1737_v25  ;;  %v1785_v33 = vadd.f32 %v1784_v27, %v1739_v4 }
 0x54c   :  { %v1768_v34 = vrot.slane %v1767_v28, 2  ;;  %v1780_v35 = vrot.slane %v1779_v29, 2 }
 0x54d   :  { %v1774_v36 = vrot.slane %v1773_v31, 2  ;;  %v1786_v15 = vrot.slane %v1785_v33, 2 }
 0x54e   :  { %v1769_v38 = vadd.f32 %v1768_v34, %v1767_v28  ;;  %v1781_v17 = vadd.f32 %v1780_v35, %v1779_v29 }
 0x54f   :  { %v1775_v39 = vadd.f32 %v1774_v36, %v1773_v31  ;;  %v1787_v22 = vadd.f32 %v1786_v15, %v1785_v33 }
 0x550   :  { %v1770_v41 = vrot.slane %v1769_v38, 1  ;;  %v1782_v42 = vrot.slane %v1781_v17, 1 }
 0x551   :  { %v1776_v43 = vrot.slane %v1775_v39, 1  ;;  %v1788_v44 = vrot.slane %v1787_v22, 1 }
 0x552   :  { %v1771_v47 = vadd.f32 %v1770_v41, %v1769_v38  ;;  %v1783_v49 = vadd.f32 %v1782_v42, %v1781_v17 }
 0x553   :  { %v1777_v21 = vadd.f32 %v1776_v43, %v1775_v39  ;;  %v1789_v53 = vadd.f32 %v1788_v44, %v1787_v22  ;;  %v1914_v43 = vrot.slane %v4318_v16, %v4347_v51 }
 0x554   :  { %v1794_v50 = vmul.f32 0.125, %v1771_v47  ;;  %v1796_v57 = vmul.f32 0.125, %v1783_v49  ;;  %v1922_v47 = vrot.slane %v4318_v16, %v4350_v59 }
 0x555   :  { %v1795_v32 = vmul.f32 0.125, %v1777_v21  ;;  %v1797_v61 = vmul.f32 0.125, %v1789_v53  ;;  %v1963_v53 = vrot.slane %v4320_v30, %v4347_v51 }
 0x556   :  { %v1802_v62 = vsub.f32 %v1736_v13, %v1794_v50  ;;  %v1804_v40 = vsub.f32 %v1738_v55, %v1796_v57  ;;  %v1918_v50 = vrot.slane %v4318_v16, %v4353_v52 }
 0x557   :  { %v1803_v63 = vsub.f32 %v1737_v25, %v1795_v32  ;;  %v1805_v0 = vsub.f32 %v1739_v4, %v1797_v61  ;;  %v1971_v61 = vrot.slane %v4320_v30, %v4350_v59 }
 0x558   :  { %v1810_v37 = vmul.f32 %v1802_v62, %v1802_v62  ;;  %v1812_v1 = vmul.f32 %v1804_v40, %v1804_v40 }
 0x559   :  { %v1811_v2 = vmul.f32 %v1803_v63, %v1803_v63  ;;  %v1813_v5 = vmul.f32 %v1805_v0, %v1805_v0 }
 0x55a   :  { %v1838_v45 = vrot.slane %v1810_v37, 4  ;;  %v1850_v6 = vrot.slane %v1812_v1, 4 }
 0x55b   :  { %v1844_v7 = vrot.slane %v1811_v2, 4  ;;  %v1856_v8 = vrot.slane %v1813_v5, 4 }
 0x55c   :  { %v1839_v9 = vadd.f32 %v1838_v45, %v1810_v37  ;;  %v1851_v10 = vadd.f32 %v1850_v6, %v1812_v1  ;;  %v1926_v37 = vrot.slane %v4318_v16, %v4356_v60 }
 0x55d   :  { %v1845_v11 = vadd.f32 %v1844_v7, %v1811_v2  ;;  %v1857_v12 = vadd.f32 %v1856_v8, %v1813_v5  ;;  %v1975_v7 = vrot.slane %v4320_v30, %v4356_v60 }
 0x55e   :  { %v1840_v14 = vrot.slane %v1839_v9, 2  ;;  %v1852_v20 = vrot.slane %v1851_v10, 2 }
 0x55f   :  { %v1846_v23 = vrot.slane %v1845_v11, 2  ;;  %v1858_v24 = vrot.slane %v1857_v12, 2 }
 0x560   :  { %v1841_v13 = vadd.f32 %v1840_v14, %v1839_v9  ;;  %v1853_v55 = vadd.f32 %v1852_v20, %v1851_v10 }
 0x561   :  { %v1847_v25 = vadd.f32 %v1846_v23, %v1845_v11  ;;  %v1859_v4 = vadd.f32 %v1858_v24, %v1857_v12 }
 0x562   :  { %v1842_v26 = vrot.slane %v1841_v13, 1  ;;  %v1854_v27 = vrot.slane %v1853_v55, 1 }
 0x563   :  { %v1848_v28 = vrot.slane %v1847_v25, 1  ;;  %v1860_v29 = vrot.slane %v1859_v4, 1 }
 0x564   :  { %v1843_v31 = vadd.f32 %v1842_v26, %v1841_v13  ;;  %v1855_v33 = vadd.f32 %v1854_v27, %v1853_v55 }
 0x565   :  { %v1849_v34 = vadd.f32 %v1848_v28, %v1847_v25  ;;  %v1861_v35 = vadd.f32 %v1860_v29, %v1859_v4 }
 0x566   :  { %v1866_v36 = vmul.f32 0.125, %v1843_v31  ;;  %v1868_v15 = vmul.f32 0.125, %v1855_v33 }
 0x567   :  { %v1867_v38 = vmul.f32 0.125, %v1849_v34  ;;  %v1869_v17 = vmul.f32 0.125, %v1861_v35 }
 0x568   :  { %v1874_v39 = vadd.f32 1e-05, %v1866_v36  ;;  %v1876_v22 = vadd.f32 1e-05, %v1868_v15 }
 0x569   :  { %v1875_v41 = vadd.f32 1e-05, %v1867_v38  ;;  %v1877_v42 = vadd.f32 1e-05, %v1869_v17 }
 0x56a   :  { %3583 = vrsqrt.f32 %v1874_v39 }
 0x56b   :  { %3585 = vrsqrt.f32 %v1876_v22 }
 0x56c   :  { %3587 = vrsqrt.f32 %v1875_v41 }
 0x56d   :  { %3589 = vrsqrt.f32 %v1877_v42 }
 0x574   :  { %v3584_v44 = vpop.eup %3583 }
 0x575   :  { %v3586_v49 = vpop.eup %3585  ;;  %v1890_v21 = vmul.f32 %v3584_v44, %v1802_v62  ;;  %v1967_v62 = vrot.slane %v4320_v30, %v4353_v52 }
 0x576   :  { %v3588_v57 = vpop.eup %3587  ;;  %v1892_v32 = vmul.f32 %v3586_v49, %v1804_v40 }
 0x577   :  { %v3590_v1 = vpop.eup %3589  ;;  %v1939_v2 = vmul.f32 %v1914_v43, %v1890_v21  ;;  %v1891_v5 = vmul.f32 %v3588_v57, %v1803_v63 }
 0x578   :  { %v1941_v45 = vmul.f32 %v1922_v47, %v1892_v32  ;;  %v1893_v6 = vmul.f32 %v3590_v1, %v1805_v0 }
 0x579   :  { %v4382_v8 = vadd.f32 %v1963_v53, %v1939_v2  ;;  %v1940_v40 = vmul.f32 %v1918_v50, %v1891_v5 }
 0x57a   :  { %v4384_v9 = vadd.f32 %v1971_v61, %v1941_v45  ;;  %v1942_v10 = vmul.f32 %v1926_v37, %v1893_v6 }
 0x57b   :  { %v4386_v11 = vadd.f32 %v1967_v62, %v1940_v40 }
 0x57c   :  { %v4388_v16 = vadd.f32 %v1975_v7, %v1942_v10 }
 0x57d   :  { %3929 = dma.done.wait [#allocation4 + $0x1], 57344 }
 0x57e   :  { %3930 = vsyncadd [#allocation4 + $0x1], 4294909952  ;;  %v4392_v63 = vpack.c.bf16 %v4342_v58, %v4342_v58  ;;  %v2005_v30 = vld [vmem:[#allocation3 + $0x8] sm:$0xff]  ;;  %v2007_v60 = vld [vmem:[#allocation3 + $0x18] sm:$0xff]  ;;  %s3965_s13 = smov [#allocation26]  }
 0x57f   :  { %v2004_v0 = vld [vmem:[#allocation3] sm:$0xff]  ;;  %2489 = vmatprep.subr.bf16.mxu1 %v2005_v30  ;;  %2653 = vmatprep.subr.bf16.mxu0 %v2007_v60  ;;  %v2006_v12 = vld [vmem:[#allocation3 + $0x10] sm:$0xff]  ;;  %v2011_v23 = vld [vmem:[#allocation3 + $0x38] sm:$0xff]  ;;  %s3161_s28 = sshll.u32 %s3965_s13, 4  ;;  %s3162_s28 = int_to_ptr.vmem [resolvable:$true] %s3161_s28 }
 0x580   :  { %2521 = vmatprep.mubr.bf16.mxu1 %v4392_v63  ;;  %2685 = vmatprep.mubr.bf16.mxu0 %v4392_v63  ;;  %v2012_v14 = vld [vmem:[#allocation3 + $0x40] sm:$0xff]  ;;  %v2014_v20 = vld [vmem:[#allocation3 + $0x50] sm:$0xff]  ;;  %v2013_v24 = vld [vmem:[#allocation3 + $0x48] sm:$0xff]  ;;  %s3891_s12 = scalar_lea.vmem %s3162_s28, 896  ;;  %p3896_p7 = scmp.lt.s32.totalorder %s3162_s28, %s3162_s28 }
 0x581   :  { %2490 = vmatpush1.bf16.msra.mxu1 %v2004_v0  ;;  %2654 = vmatpush1.bf16.msra.mxu0 %v2006_v12  ;;  %v2019_v58 = vld [vmem:[#allocation3 + $0x78] sm:$0xff]  ;;  %v2021_v13 = vld [vmem:[#allocation3 + $0x88] sm:$0xff]  ;;  %v2018_v55 = vld [vmem:[#allocation3 + $0x70] sm:$0xff]  ;;  %p3892_p6 = scmp.ne.s32.totalorder %s3162_s28, %s3891_s12  ;;  %p3897_p8 = scmp.lt.s32.totalorder %s3891_s12, %s3891_s12 }
 0x582   :  { %2491 = vmatprep.subr.bf16.mxu1 %v2012_v14  ;;  %2655 = vmatprep.subr.bf16.mxu0 %v2014_v20  ;;  %v2020_v25 = vld [vmem:[#allocation3 + $0x80] sm:$0xff]  ;;  %v2026_v4 = vld [vmem:[#allocation3 + $0xb0] sm:$0xff]  ;;  %v2025_v27 = vld [vmem:[#allocation3 + $0xa8] sm:$0xff] }
 0x583   :  { %v2028_v26 = vld [vmem:[#allocation3 + $0xc0] sm:$0xff]  ;;  %v2027_v28 = vld [vmem:[#allocation3 + $0xb8] sm:$0xff]  ;;  %v2033_v29 = vld [vmem:[#allocation3 + $0xe8] sm:$0xff]  ;;  %p3898_p9 = por %p3897_p8, %p3896_p7 }
 0x584   :  { %v2035_v31 = vld [vmem:[#allocation3 + $0xf8] sm:$0xff]  ;;  %v2032_v33 = vld [vmem:[#allocation3 + $0xe0] sm:$0xff]  ;;  %v2034_v34 = vld [vmem:[#allocation3 + $0xf0] sm:$0xff] }
 0x585   :  { %2492 = vmatpush1.bf16.msra.mxu1 %v2011_v23  ;;  %2656 = vmatpush1.bf16.msra.mxu0 %v2013_v24  ;;  %v2040_v35 = vld [vmem:[#allocation3 + $0x120] sm:$0xff]  ;;  %v2042_v36 = vld [vmem:[#allocation3 + $0x130] sm:$0xff]  ;;  %v2039_v15 = vld [vmem:[#allocation3 + $0x118] sm:$0xff]  ;;  %p3899_p10 = pnand %p3898_p9, %p3892_p6 }
 0x586   :  { %2493 = vmatprep.subr.bf16.mxu1 %v2019_v58  ;;  %2657 = vmatprep.subr.bf16.mxu0 %v2021_v13  ;;  %v2041_v38 = vld [vmem:[#allocation3 + $0x128] sm:$0xff]  ;;  %v2047_v17 = vld [vmem:[#allocation3 + $0x158] sm:$0xff]  ;;  %v2046_v22 = vld [vmem:[#allocation3 + $0x150] sm:$0xff] }
 0x587   :  { %v2049_v39 = vld [vmem:[#allocation3 + $0x168] sm:$0xff]  ;;  %v2048_v41 = vld [vmem:[#allocation3 + $0x160] sm:$0xff]  ;;  %v2054_v42 = vld [vmem:[#allocation3 + $0x190] sm:$0xff] }
 0x588   :  { %v2056_v43 = vld [vmem:[#allocation3 + $0x1a0] sm:$0xff]  ;;  %v2053_v44 = vld [vmem:[#allocation3 + $0x188] sm:$0xff]  ;;  %v2055_v47 = vld [vmem:[#allocation3 + $0x198] sm:$0xff] }
 0x589   :  { %2494 = vmatpush1.bf16.msra.mxu1 %v2018_v55  ;;  %2658 = vmatpush1.bf16.msra.mxu0 %v2020_v25  ;;  %v2061_v49 = vld [vmem:[#allocation3 + $0x1c8] sm:$0xff]  ;;  %v2063_v21 = vld [vmem:[#allocation3 + $0x1d8] sm:$0xff]  ;;  %v2060_v53 = vld [vmem:[#allocation3 + $0x1c0] sm:$0xff] }
 0x58a   :  { %2495 = vmatprep.subr.bf16.mxu1 %v2026_v4  ;;  %2659 = vmatprep.subr.bf16.mxu0 %v2028_v26  ;;  %v2062_v50 = vld [vmem:[#allocation3 + $0x1d0] sm:$0xff]  ;;  %v2068_v57 = vld [vmem:[#allocation3 + $0x200] sm:$0xff]  ;;  %v2067_v61 = vld [vmem:[#allocation3 + $0x1f8] sm:$0xff] }
 0x58b   :  { %v2070_v32 = vld [vmem:[#allocation3 + $0x210] sm:$0xff]  ;;  %v2069_v37 = vld [vmem:[#allocation3 + $0x208] sm:$0xff]  ;;  %v2075_v1 = vld [vmem:[#allocation3 + $0x238] sm:$0xff] }
 0x58c   :  { %v2077_v2 = vld [vmem:[#allocation3 + $0x248] sm:$0xff]  ;;  %v2074_v5 = vld [vmem:[#allocation3 + $0x230] sm:$0xff]  ;;  %v2076_v62 = vld [vmem:[#allocation3 + $0x240] sm:$0xff] }
 0x58d   :  { %2496 = vmatpush1.bf16.msra.mxu1 %v2025_v27  ;;  %2660 = vmatpush1.bf16.msra.mxu0 %v2027_v28  ;;  %v2082_v45 = vld [vmem:[#allocation3 + $0x270] sm:$0xff]  ;;  %v2084_v6 = vld [vmem:[#allocation3 + $0x280] sm:$0xff]  ;;  %v2081_v7 = vld [vmem:[#allocation3 + $0x268] sm:$0xff] }
 0x58e   :  { %2497 = vmatprep.subr.bf16.mxu1 %v2033_v29  ;;  %2661 = vmatprep.subr.bf16.mxu0 %v2035_v31  ;;  %v2083_v40 = vld [vmem:[#allocation3 + $0x278] sm:$0xff]  ;;  %v2089_v10 = vld [vmem:[#allocation3 + $0x2a8] sm:$0xff]  ;;  %v2088_v60 = vld [vmem:[#allocation3 + $0x2a0] sm:$0xff]  ;;  %v4398_v31 = vpack.c.bf16 %v4338_v54, %v4338_v54 }
 0x58f   :  { %v2091_v30 = vld [vmem:[#allocation3 + $0x2b8] sm:$0xff]  ;;  %v2090_v0 = vld [vmem:[#allocation3 + $0x2b0] sm:$0xff]  ;;  %v2096_v12 = vld [vmem:[#allocation3 + $0x2e0] sm:$0xff] }
 0x590   :  { %v2098_v14 = vld [vmem:[#allocation3 + $0x2f0] sm:$0xff]  ;;  %v2095_v20 = vld [vmem:[#allocation3 + $0x2d8] sm:$0xff]  ;;  %v2097_v23 = vld [vmem:[#allocation3 + $0x2e8] sm:$0xff] }
 0x591   :  { %2498 = vmatpush1.bf16.msra.mxu1 %v2032_v33  ;;  %2662 = vmatpush1.bf16.msra.mxu0 %v2034_v34  ;;  %v2103_v24 = vld [vmem:[#allocation3 + $0x318] sm:$0xff]  ;;  %v2105_v58 = vld [vmem:[#allocation3 + $0x328] sm:$0xff]  ;;  %v2102_v13 = vld [vmem:[#allocation3 + $0x310] sm:$0xff] }
 0x592   :  { %2499 = vmatprep.subr.bf16.mxu1 %v2040_v35  ;;  %2663 = vmatprep.subr.bf16.mxu0 %v2042_v36  ;;  %v2104_v55 = vld [vmem:[#allocation3 + $0x320] sm:$0xff]  ;;  %v2110_v25 = vld [vmem:[#allocation3 + $0x350] sm:$0xff]  ;;  %v2109_v26 = vld [vmem:[#allocation3 + $0x348] sm:$0xff] }
 0x593   :  { %v2112_v4 = vld [vmem:[#allocation3 + $0x360] sm:$0xff]  ;;  %v2111_v27 = vld [vmem:[#allocation3 + $0x358] sm:$0xff]  ;;  %v2117_v28 = vld [vmem:[#allocation3 + $0x388] sm:$0xff] }
 0x594   :  { %v2119_v29 = vld [vmem:[#allocation3 + $0x398] sm:$0xff]  ;;  %v2116_v33 = vld [vmem:[#allocation3 + $0x380] sm:$0xff]  ;;  %v2118_v34 = vld [vmem:[#allocation3 + $0x390] sm:$0xff] }
 0x595   :  { %2500 = vmatpush1.bf16.msra.mxu1 %v2039_v15  ;;  %2664 = vmatpush1.bf16.msra.mxu0 %v2041_v38  ;;  %v2124_v35 = vld [vmem:[#allocation3 + $0x3c0] sm:$0xff]  ;;  %v2126_v36 = vld [vmem:[#allocation3 + $0x3d0] sm:$0xff]  ;;  %v4402_v15 = vpack.c.bf16 %v4344_v3, %v4344_v3  ;;  %v2123_v54 = vld [vmem:[#allocation3 + $0x3b8] sm:$0xff] }
 0x596   :  { %2501 = vmatprep.subr.bf16.mxu1 %v2047_v17  ;;  %2665 = vmatprep.subr.bf16.mxu0 %v2049_v39  ;;  %v2125_v38 = vld [vmem:[#allocation3 + $0x3c8] sm:$0xff]  ;;  %v2131_v17 = vld [vmem:[#allocation3 + $0x3f8] sm:$0xff]  ;;  %v2130_v3 = vld [vmem:[#allocation3 + $0x3f0] sm:$0xff] }
 0x597   :  { %v2133_v39 = vld [vmem:[#allocation3 + $0x408] sm:$0xff] }
 0x599   :  { %2502 = vmatpush1.bf16.msra.mxu1 %v2046_v22  ;;  %2666 = vmatpush1.bf16.msra.mxu0 %v2048_v41  ;;  %v2132_v22 = vld [vmem:[#allocation3 + $0x400] sm:$0xff]  ;;  %v2138_v41 = vld [vmem:[#allocation3 + $0x430] sm:$0xff] }
 0x59a   :  { %2503 = vmatprep.subr.bf16.mxu1 %v2054_v42  ;;  %2667 = vmatprep.subr.bf16.mxu0 %v2056_v43  ;;  %v2140_v42 = vld [vmem:[#allocation3 + $0x440] sm:$0xff]  ;;  %v2137_v43 = vld [vmem:[#allocation3 + $0x428] sm:$0xff] }
 0x59d   :  { %2504 = vmatpush1.bf16.msra.mxu1 %v2053_v44  ;;  %2668 = vmatpush1.bf16.msra.mxu0 %v2055_v47  ;;  %v2139_v44 = vld [vmem:[#allocation3 + $0x438] sm:$0xff]  ;;  %v2145_v47 = vld [vmem:[#allocation3 + $0x468] sm:$0xff] }
 0x59e   :  { %2505 = vmatprep.subr.bf16.mxu1 %v2061_v49  ;;  %2669 = vmatprep.subr.bf16.mxu0 %v2063_v21  ;;  %v2147_v49 = vld [vmem:[#allocation3 + $0x478] sm:$0xff]  ;;  %v2144_v21 = vld [vmem:[#allocation3 + $0x460] sm:$0xff] }
 0x5a1   :  { %2506 = vmatpush1.bf16.msra.mxu1 %v2060_v53  ;;  %2670 = vmatpush1.bf16.msra.mxu0 %v2062_v50  ;;  %v2146_v53 = vld [vmem:[#allocation3 + $0x470] sm:$0xff]  ;;  %v2152_v50 = vld [vmem:[#allocation3 + $0x4a0] sm:$0xff] }
 0x5a2   :  { %2507 = vmatprep.subr.bf16.mxu1 %v2068_v57  ;;  %2671 = vmatprep.subr.bf16.mxu0 %v2070_v32  ;;  %v2154_v57 = vld [vmem:[#allocation3 + $0x4b0] sm:$0xff]  ;;  %v2151_v32 = vld [vmem:[#allocation3 + $0x498] sm:$0xff] }
 0x5a5   :  { %2508 = vmatpush1.bf16.msra.mxu1 %v2067_v61  ;;  %2672 = vmatpush1.bf16.msra.mxu0 %v2069_v37  ;;  %v2153_v61 = vld [vmem:[#allocation3 + $0x4a8] sm:$0xff]  ;;  %v2159_v37 = vld [vmem:[#allocation3 + $0x4d8] sm:$0xff] }
 0x5a6   :  { %2509 = vmatprep.subr.bf16.mxu1 %v2075_v1  ;;  %2673 = vmatprep.subr.bf16.mxu0 %v2077_v2  ;;  %v2161_v1 = vld [vmem:[#allocation3 + $0x4e8] sm:$0xff]  ;;  %v2158_v2 = vld [vmem:[#allocation3 + $0x4d0] sm:$0xff] }
 0x5a9   :  { %2510 = vmatpush1.bf16.msra.mxu1 %v2074_v5  ;;  %2674 = vmatpush1.bf16.msra.mxu0 %v2076_v62  ;;  %v2160_v5 = vld [vmem:[#allocation3 + $0x4e0] sm:$0xff]  ;;  %v2166_v62 = vld [vmem:[#allocation3 + $0x510] sm:$0xff] }
 0x5aa   :  { %2511 = vmatprep.subr.bf16.mxu1 %v2082_v45  ;;  %2675 = vmatprep.subr.bf16.mxu0 %v2084_v6  ;;  %v2168_v45 = vld [vmem:[#allocation3 + $0x520] sm:$0xff]  ;;  %v2165_v6 = vld [vmem:[#allocation3 + $0x508] sm:$0xff] }
 0x5ad   :  { %2512 = vmatpush1.bf16.msra.mxu1 %v2081_v7  ;;  %2676 = vmatpush1.bf16.msra.mxu0 %v2083_v40  ;;  %v2167_v7 = vld [vmem:[#allocation3 + $0x518] sm:$0xff]  ;;  %v2173_v40 = vld [vmem:[#allocation3 + $0x548] sm:$0xff] }
 0x5ae   :  { %2513 = vmatprep.subr.bf16.mxu1 %v2089_v10  ;;  %2677 = vmatprep.subr.bf16.mxu0 %v2091_v30  ;;  %v2175_v10 = vld [vmem:[#allocation3 + $0x558] sm:$0xff]  ;;  %v2172_v30 = vld [vmem:[#allocation3 + $0x540] sm:$0xff] }
 0x5b1   :  { %2514 = vmatpush1.bf16.msra.mxu1 %v2088_v60  ;;  %2678 = vmatpush1.bf16.msra.mxu0 %v2090_v0  ;;  %v2174_v60 = vld [vmem:[#allocation3 + $0x550] sm:$0xff]  ;;  %v2180_v0 = vld [vmem:[#allocation3 + $0x580] sm:$0xff] }
 0x5b2   :  { %2515 = vmatprep.subr.bf16.mxu1 %v2096_v12  ;;  %2679 = vmatprep.subr.bf16.mxu0 %v2098_v14  ;;  %v2182_v12 = vld [vmem:[#allocation3 + $0x590] sm:$0xff]  ;;  %v2179_v14 = vld [vmem:[#allocation3 + $0x578] sm:$0xff] }
 0x5b5   :  { %2516 = vmatpush1.bf16.msra.mxu1 %v2095_v20  ;;  %2680 = vmatpush1.bf16.msra.mxu0 %v2097_v23  ;;  %v2181_v20 = vld [vmem:[#allocation3 + $0x588] sm:$0xff]  ;;  %v2187_v23 = vld [vmem:[#allocation3 + $0x5b8] sm:$0xff] }
 0x5b6   :  { %2517 = vmatprep.subr.bf16.mxu1 %v2103_v24  ;;  %2681 = vmatprep.subr.bf16.mxu0 %v2105_v58  ;;  %v2189_v24 = vld [vmem:[#allocation3 + $0x5c8] sm:$0xff]  ;;  %v2186_v58 = vld [vmem:[#allocation3 + $0x5b0] sm:$0xff] }
 0x5b9   :  { %2518 = vmatpush1.bf16.msra.mxu1 %v2102_v13  ;;  %2682 = vmatpush1.bf16.msra.mxu0 %v2104_v55  ;;  %v2188_v13 = vld [vmem:[#allocation3 + $0x5c0] sm:$0xff]  ;;  %v2194_v55 = vld [vmem:[#allocation3 + $0x5f0] sm:$0xff] }
 0x5ba   :  { %2519 = vmatprep.subr.bf16.mxu1 %v2110_v25  ;;  %2683 = vmatprep.subr.bf16.mxu0 %v2112_v4  ;;  %v2196_v25 = vld [vmem:[#allocation3 + $0x600] sm:$0xff]  ;;  %v2193_v4 = vld [vmem:[#allocation3 + $0x5e8] sm:$0xff] }
 0x5bd   :  { %2520 = vmatpush1.bf16.msra.mxu1 %v2109_v26  ;;  %2684 = vmatpush1.bf16.msra.mxu0 %v2111_v27  ;;  %v2195_v26 = vld [vmem:[#allocation3 + $0x5f8] sm:$0xff]  ;;  %v2201_v27 = vld [vmem:[#allocation3 + $0x628] sm:$0xff] }
 0x5be   :  { %2530 = vmatprep.subr.bf16.mxu1 %v2117_v28  ;;  %2694 = vmatprep.subr.bf16.mxu0 %v2119_v29  ;;  %v2203_v28 = vld [vmem:[#allocation3 + $0x638] sm:$0xff]  ;;  %v2200_v29 = vld [vmem:[#allocation3 + $0x620] sm:$0xff] }
 0x5c0   :  { %2522 = vmatmul.mubr.bf16.vlgmr.msra.gmra.mrb[8].mxu1 %v4398_v31  ;;  %2686 = vmatmul.mubr.bf16.vlgmr.msra.gmra.mrb[20].mxu0 %v4398_v31 }
 0x5c1   :  { %2531 = vmatpush1.bf16.msra.mxu1 %v2116_v33  ;;  %2695 = vmatpush1.bf16.msra.mxu0 %v2118_v34  ;;  %v2202_v33 = vld [vmem:[#allocation3 + $0x630] sm:$0xff]  ;;  %v2208_v34 = vld [vmem:[#allocation3 + $0x660] sm:$0xff] }
 0x5c2   :  { %2532 = vmatprep.subr.bf16.mxu1 %v2124_v35  ;;  %2696 = vmatprep.subr.bf16.mxu0 %v2126_v36  ;;  %v2210_v35 = vld [vmem:[#allocation3 + $0x670] sm:$0xff]  ;;  %v2207_v36 = vld [vmem:[#allocation3 + $0x658] sm:$0xff] }
 0x5c3   :  { %2562 = vmatprep.mubr.bf16.mxu1 %v4402_v15  ;;  %2726 = vmatprep.mubr.bf16.mxu0 %v4402_v15 }
 0x5c5   :  { %2533 = vmatpush1.bf16.msra.mxu1 %v2123_v54  ;;  %2697 = vmatpush1.bf16.msra.mxu0 %v2125_v38  ;;  %v2209_v54 = vld [vmem:[#allocation3 + $0x668] sm:$0xff]  ;;  %v2215_v38 = vld [vmem:[#allocation3 + $0x698] sm:$0xff] }
 0x5c6   :  { %2534 = vmatprep.subr.bf16.mxu1 %v2131_v17  ;;  %2698 = vmatprep.subr.bf16.mxu0 %v2133_v39  ;;  %v2217_v17 = vld [vmem:[#allocation3 + $0x6a8] sm:$0xff]  ;;  %v2214_v39 = vld [vmem:[#allocation3 + $0x690] sm:$0xff] }
 0x5c9   :  { %2535 = vmatpush1.bf16.msra.mxu1 %v2130_v3  ;;  %2699 = vmatpush1.bf16.msra.mxu0 %v2132_v22  ;;  %v2216_v3 = vld [vmem:[#allocation3 + $0x6a0] sm:$0xff]  ;;  %v2222_v22 = vld [vmem:[#allocation3 + $0x6d0] sm:$0xff] }
 0x5ca   :  { %2536 = vmatprep.subr.bf16.mxu1 %v2138_v41  ;;  %2700 = vmatprep.subr.bf16.mxu0 %v2140_v42  ;;  %v2224_v41 = vld [vmem:[#allocation3 + $0x6e0] sm:$0xff]  ;;  %v2221_v42 = vld [vmem:[#allocation3 + $0x6c8] sm:$0xff] }
 0x5cd   :  { %2537 = vmatpush1.bf16.msra.mxu1 %v2137_v43  ;;  %2701 = vmatpush1.bf16.msra.mxu0 %v2139_v44  ;;  %v2223_v43 = vld [vmem:[#allocation3 + $0x6d8] sm:$0xff]  ;;  %v2229_v44 = vld [vmem:[#allocation3 + $0x708] sm:$0xff] }
 0x5ce   :  { %2538 = vmatprep.subr.bf16.mxu1 %v2145_v47  ;;  %2702 = vmatprep.subr.bf16.mxu0 %v2147_v49  ;;  %v2231_v47 = vld [vmem:[#allocation3 + $0x718] sm:$0xff]  ;;  %v4410_v49 = vpack.c.bf16 %v4340_v56, %v4340_v56 }
 0x5cf   :  { %v2235_v56 = vld [vmem:[#allocation3 + $0x738] sm:$0xff] }
 0x5d1   :  { %2539 = vmatpush1.bf16.msra.mxu1 %v2144_v21  ;;  %2703 = vmatpush1.bf16.msra.mxu0 %v2146_v53  ;;  %v2228_v21 = vld [vmem:[#allocation3 + $0x700] sm:$0xff]  ;;  %v2230_v53 = vld [vmem:[#allocation3 + $0x710] sm:$0xff] }
 0x5d2   :  { %2540 = vmatprep.subr.bf16.mxu1 %v2152_v50  ;;  %2704 = vmatprep.subr.bf16.mxu0 %v2154_v57  ;;  %v2236_v50 = vld [vmem:[#allocation3 + $0x740] sm:$0xff]  ;;  %v2238_v57 = vld [vmem:[#allocation3 + $0x750] sm:$0xff] }
 0x5d5   :  { %2541 = vmatpush1.bf16.msra.mxu1 %v2151_v32  ;;  %2705 = vmatpush1.bf16.msra.mxu0 %v2153_v61  ;;  %v4414_v32 = vpack.c.bf16 %v4386_v11, %v4386_v11  ;;  %v2237_v61 = vld [vmem:[#allocation3 + $0x748] sm:$0xff]  ;;  %v2242_v11 = vld [vmem:[#allocation3 + $0x770] sm:$0xff] }
 0x5d6   :  { %2542 = vmatprep.subr.bf16.mxu1 %v2159_v37  ;;  %2706 = vmatprep.subr.bf16.mxu0 %v2161_v1  ;;  %v2243_v37 = vld [vmem:[#allocation3 + $0x778] sm:$0xff]  ;;  %v2245_v1 = vld [vmem:[#allocation3 + $0x788] sm:$0xff] }
 0x5d9   :  { %2543 = vmatpush1.bf16.msra.mxu1 %v2158_v2  ;;  %2707 = vmatpush1.bf16.msra.mxu0 %v2160_v5  ;;  %v2244_v2 = vld [vmem:[#allocation3 + $0x780] sm:$0xff]  ;;  %v2250_v5 = vld [vmem:[#allocation3 + $0x7b0] sm:$0xff] }
 0x5da   :  { %2544 = vmatprep.subr.bf16.mxu1 %v2166_v62  ;;  %2708 = vmatprep.subr.bf16.mxu0 %v2168_v45  ;;  %v2252_v62 = vld [vmem:[#allocation3 + $0x7c0] sm:$0xff]  ;;  %v2249_v45 = vld [vmem:[#allocation3 + $0x7a8] sm:$0xff] }
 0x5dd   :  { %2545 = vmatpush1.bf16.msra.mxu1 %v2165_v6  ;;  %2709 = vmatpush1.bf16.msra.mxu0 %v2167_v7  ;;  %v2251_v6 = vld [vmem:[#allocation3 + $0x7b8] sm:$0xff]  ;;  %v2257_v7 = vld [vmem:[#allocation3 + $0x7e8] sm:$0xff] }
 0x5de   :  { %2546 = vmatprep.subr.bf16.mxu1 %v2173_v40  ;;  %2710 = vmatprep.subr.bf16.mxu0 %v2175_v10  ;;  %v2259_v40 = vld [vmem:[#allocation3 + $0x7f8] sm:$0xff]  ;;  %v2256_v10 = vld [vmem:[#allocation3 + $0x7e0] sm:$0xff] }
 0x5e1   :  { %2547 = vmatpush1.bf16.msra.mxu1 %v2172_v30  ;;  %2711 = vmatpush1.bf16.msra.mxu0 %v2174_v60  ;;  %v2258_v30 = vld [vmem:[#allocation3 + $0x7f0] sm:$0xff]  ;;  %v2264_v60 = vld [vmem:[#allocation3 + $0x820] sm:$0xff] }
 0x5e2   :  { %2548 = vmatprep.subr.bf16.mxu1 %v2180_v0  ;;  %2712 = vmatprep.subr.bf16.mxu0 %v2182_v12  ;;  %v2266_v0 = vld [vmem:[#allocation3 + $0x830] sm:$0xff]  ;;  %v2263_v12 = vld [vmem:[#allocation3 + $0x818] sm:$0xff] }
 0x5e5   :  { %2549 = vmatpush1.bf16.msra.mxu1 %v2179_v14  ;;  %2713 = vmatpush1.bf16.msra.mxu0 %v2181_v20  ;;  %v2265_v14 = vld [vmem:[#allocation3 + $0x828] sm:$0xff]  ;;  %v2271_v20 = vld [vmem:[#allocation3 + $0x858] sm:$0xff] }
 0x5e6   :  { %2550 = vmatprep.subr.bf16.mxu1 %v2187_v23  ;;  %2714 = vmatprep.subr.bf16.mxu0 %v2189_v24  ;;  %v2273_v23 = vld [vmem:[#allocation3 + $0x868] sm:$0xff]  ;;  %v2270_v24 = vld [vmem:[#allocation3 + $0x850] sm:$0xff] }
 0x5e9   :  { %2551 = vmatpush1.bf16.msra.mxu1 %v2186_v58  ;;  %2715 = vmatpush1.bf16.msra.mxu0 %v2188_v13  ;;  %v2272_v58 = vld [vmem:[#allocation3 + $0x860] sm:$0xff]  ;;  %v2278_v13 = vld [vmem:[#allocation3 + $0x890] sm:$0xff] }
 0x5ea   :  { %2552 = vmatprep.subr.bf16.mxu1 %v2194_v55  ;;  %2716 = vmatprep.subr.bf16.mxu0 %v2196_v25  ;;  %v2280_v55 = vld [vmem:[#allocation3 + $0x8a0] sm:$0xff]  ;;  %v2277_v25 = vld [vmem:[#allocation3 + $0x888] sm:$0xff] }
 0x5ed   :  { %2553 = vmatpush1.bf16.msra.mxu1 %v2193_v4  ;;  %2717 = vmatpush1.bf16.msra.mxu0 %v2195_v26  ;;  %v2279_v4 = vld [vmem:[#allocation3 + $0x898] sm:$0xff]  ;;  %v2285_v26 = vld [vmem:[#allocation3 + $0x8c8] sm:$0xff] }
 0x5ee   :  { %2554 = vmatprep.subr.bf16.mxu1 %v2201_v27  ;;  %2718 = vmatprep.subr.bf16.mxu0 %v2203_v28  ;;  %v2287_v27 = vld [vmem:[#allocation3 + $0x8d8] sm:$0xff]  ;;  %v2284_v28 = vld [vmem:[#allocation3 + $0x8c0] sm:$0xff] }
 0x5f1   :  { %2555 = vmatpush1.bf16.msra.mxu1 %v2200_v29  ;;  %2719 = vmatpush1.bf16.msra.mxu0 %v2202_v33  ;;  %v2286_v29 = vld [vmem:[#allocation3 + $0x8d0] sm:$0xff]  ;;  %v2292_v33 = vld [vmem:[#allocation3 + $0x900] sm:$0xff] }
 0x5f2   :  { %2556 = vmatprep.subr.bf16.mxu1 %v2208_v34  ;;  %2720 = vmatprep.subr.bf16.mxu0 %v2210_v35  ;;  %v2294_v34 = vld [vmem:[#allocation3 + $0x910] sm:$0xff]  ;;  %v2291_v35 = vld [vmem:[#allocation3 + $0x8f8] sm:$0xff] }
 0x5f5   :  { %2557 = vmatpush1.bf16.msra.mxu1 %v2207_v36  ;;  %2721 = vmatpush1.bf16.msra.mxu0 %v2209_v54  ;;  %v2293_v36 = vld [vmem:[#allocation3 + $0x908] sm:$0xff]  ;;  %v2299_v54 = vld [vmem:[#allocation3 + $0x938] sm:$0xff] }
 0x5f6   :  { %2558 = vmatprep.subr.bf16.mxu1 %v2215_v38  ;;  %2722 = vmatprep.subr.bf16.mxu0 %v2217_v17  ;;  %v2301_v38 = vld [vmem:[#allocation3 + $0x948] sm:$0xff]  ;;  %v2298_v17 = vld [vmem:[#allocation3 + $0x930] sm:$0xff] }
 0x5f9   :  { %2559 = vmatpush1.bf16.msra.mxu1 %v2214_v39  ;;  %2723 = vmatpush1.bf16.msra.mxu0 %v2216_v3  ;;  %v2300_v39 = vld [vmem:[#allocation3 + $0x940] sm:$0xff]  ;;  %v2306_v3 = vld [vmem:[#allocation3 + $0x970] sm:$0xff] }
 0x5fa   :  { %2560 = vmatprep.subr.bf16.mxu1 %v2222_v22  ;;  %2724 = vmatprep.subr.bf16.mxu0 %v2224_v41  ;;  %v2308_v22 = vld [vmem:[#allocation3 + $0x980] sm:$0xff]  ;;  %v2305_v41 = vld [vmem:[#allocation3 + $0x968] sm:$0xff] }
 0x5fd   :  { %2561 = vmatpush1.bf16.msra.mxu1 %v2221_v42  ;;  %2725 = vmatpush1.bf16.msra.mxu0 %v2223_v43  ;;  %v2307_v42 = vld [vmem:[#allocation3 + $0x978] sm:$0xff]  ;;  %v2313_v43 = vld [vmem:[#allocation3 + $0x9a8] sm:$0xff] }
 0x5fe   :  { %2571 = vmatprep.subr.bf16.mxu1 %v2229_v44  ;;  %2735 = vmatprep.subr.bf16.mxu0 %v2231_v47  ;;  %v2315_v44 = vld [vmem:[#allocation3 + $0x9b8] sm:$0xff]  ;;  %v2312_v47 = vld [vmem:[#allocation3 + $0x9a0] sm:$0xff] }
 0x600   :  { %2563 = vmatmul.mubr.bf16.vlgmr.msra.gmra.mrb[8].mxu1 %v4410_v49  ;;  %2727 = vmatmul.mubr.bf16.vlgmr.msra.gmra.mrb[20].mxu0 %v4410_v49 }
 0x601   :  { %2572 = vmatpush1.bf16.msra.mxu1 %v2228_v21  ;;  %2736 = vmatpush1.bf16.msra.mxu0 %v2230_v53  ;;  %v2314_v21 = vld [vmem:[#allocation3 + $0x9b0] sm:$0xff]  ;;  %v2320_v53 = vld [vmem:[#allocation3 + $0x9e0] sm:$0xff] }
 0x602   :  { %2573 = vmatprep.subr.bf16.mxu1 %v2236_v50  ;;  %2737 = vmatprep.subr.bf16.mxu0 %v2238_v57  ;;  %v2322_v50 = vld [vmem:[#allocation3 + $0x9f0] sm:$0xff]  ;;  %v2319_v57 = vld [vmem:[#allocation3 + $0x9d8] sm:$0xff] }
 0x603   :  { %2603 = vmatprep.mubr.bf16.mxu1 %v4414_v32  ;;  %2767 = vmatprep.mubr.bf16.mxu0 %v4414_v32 }
 0x605   :  { %2574 = vmatpush1.bf16.msra.mxu1 %v2235_v56  ;;  %2738 = vmatpush1.bf16.msra.mxu0 %v2237_v61  ;;  %v2321_v56 = vld [vmem:[#allocation3 + $0x9e8] sm:$0xff]  ;;  %v2327_v61 = vld [vmem:[#allocation3 + $0xa18] sm:$0xff] }
 0x606   :  { %2575 = vmatprep.subr.bf16.mxu1 %v2243_v37  ;;  %2739 = vmatprep.subr.bf16.mxu0 %v2245_v1  ;;  %v2329_v37 = vld [vmem:[#allocation3 + $0xa28] sm:$0xff]  ;;  %v2326_v1 = vld [vmem:[#allocation3 + $0xa10] sm:$0xff] }
 0x609   :  { %2576 = vmatpush1.bf16.msra.mxu1 %v2242_v11  ;;  %2740 = vmatpush1.bf16.msra.mxu0 %v2244_v2  ;;  %v2328_v11 = vld [vmem:[#allocation3 + $0xa20] sm:$0xff]  ;;  %v2334_v2 = vld [vmem:[#allocation3 + $0xa50] sm:$0xff] }
 0x60a   :  { %2577 = vmatprep.subr.bf16.mxu1 %v2250_v5  ;;  %2741 = vmatprep.subr.bf16.mxu0 %v2252_v62  ;;  %v2336_v5 = vld [vmem:[#allocation3 + $0xa60] sm:$0xff]  ;;  %v2333_v62 = vld [vmem:[#allocation3 + $0xa48] sm:$0xff] }
 0x60d   :  { %2578 = vmatpush1.bf16.msra.mxu1 %v2249_v45  ;;  %2742 = vmatpush1.bf16.msra.mxu0 %v2251_v6  ;;  %v2335_v45 = vld [vmem:[#allocation3 + $0xa58] sm:$0xff]  ;;  %v2341_v6 = vld [vmem:[#allocation3 + $0xa88] sm:$0xff] }
 0x60e   :  { %2579 = vmatprep.subr.bf16.mxu1 %v2257_v7  ;;  %2743 = vmatprep.subr.bf16.mxu0 %v2259_v40  ;;  %v2343_v7 = vld [vmem:[#allocation3 + $0xa98] sm:$0xff]  ;;  %v4422_v40 = vpack.c.bf16 %v4382_v8, %v4382_v8 }
 0x60f   :  { %v2347_v8 = vld [vmem:[#allocation3 + $0xab8] sm:$0xff] }
 0x611   :  { %2580 = vmatpush1.bf16.msra.mxu1 %v2256_v10  ;;  %2744 = vmatpush1.bf16.msra.mxu0 %v2258_v30  ;;  %v2340_v10 = vld [vmem:[#allocation3 + $0xa80] sm:$0xff]  ;;  %v2342_v30 = vld [vmem:[#allocation3 + $0xa90] sm:$0xff] }
 0x612   :  { %2581 = vmatprep.subr.bf16.mxu1 %v2264_v60  ;;  %2745 = vmatprep.subr.bf16.mxu0 %v2266_v0  ;;  %v2348_v60 = vld [vmem:[#allocation3 + $0xac0] sm:$0xff]  ;;  %v2350_v0 = vld [vmem:[#allocation3 + $0xad0] sm:$0xff] }
 0x615   :  { %2582 = vmatpush1.bf16.msra.mxu1 %v2263_v12  ;;  %2746 = vmatpush1.bf16.msra.mxu0 %v2265_v14  ;;  %v4426_v12 = vpack.c.bf16 %v4388_v16, %v4388_v16  ;;  %v2349_v14 = vld [vmem:[#allocation3 + $0xac8] sm:$0xff]  ;;  %v2354_v16 = vld [vmem:[#allocation3 + $0xaf0] sm:$0xff] }
 0x616   :  { %2583 = vmatprep.subr.bf16.mxu1 %v2271_v20  ;;  %2747 = vmatprep.subr.bf16.mxu0 %v2273_v23  ;;  %v2355_v20 = vld [vmem:[#allocation3 + $0xaf8] sm:$0xff]  ;;  %v2357_v23 = vld [vmem:[#allocation3 + $0xb08] sm:$0xff] }
 0x619   :  { %2584 = vmatpush1.bf16.msra.mxu1 %v2270_v24  ;;  %2748 = vmatpush1.bf16.msra.mxu0 %v2272_v58  ;;  %v2356_v24 = vld [vmem:[#allocation3 + $0xb00] sm:$0xff]  ;;  %v2362_v58 = vld [vmem:[#allocation3 + $0xb30] sm:$0xff] }
 0x61a   :  { %2585 = vmatprep.subr.bf16.mxu1 %v2278_v13  ;;  %2749 = vmatprep.subr.bf16.mxu0 %v2280_v55  ;;  %v2364_v13 = vld [vmem:[#allocation3 + $0xb40] sm:$0xff]  ;;  %v2361_v55 = vld [vmem:[#allocation3 + $0xb28] sm:$0xff] }
 0x61d   :  { %2586 = vmatpush1.bf16.msra.mxu1 %v2277_v25  ;;  %2750 = vmatpush1.bf16.msra.mxu0 %v2279_v4  ;;  %v2363_v25 = vld [vmem:[#allocation3 + $0xb38] sm:$0xff]  ;;  %v2369_v4 = vld [vmem:[#allocation3 + $0xb68] sm:$0xff] }
 0x61e   :  { %2587 = vmatprep.subr.bf16.mxu1 %v2285_v26  ;;  %2751 = vmatprep.subr.bf16.mxu0 %v2287_v27  ;;  %v2371_v26 = vld [vmem:[#allocation3 + $0xb78] sm:$0xff]  ;;  %v2368_v27 = vld [vmem:[#allocation3 + $0xb60] sm:$0xff] }
 0x621   :  { %2588 = vmatpush1.bf16.msra.mxu1 %v2284_v28  ;;  %2752 = vmatpush1.bf16.msra.mxu0 %v2286_v29  ;;  %v2370_v28 = vld [vmem:[#allocation3 + $0xb70] sm:$0xff]  ;;  %v2376_v29 = vld [vmem:[#allocation3 + $0xba0] sm:$0xff] }
 0x622   :  { %2589 = vmatprep.subr.bf16.mxu1 %v2292_v33  ;;  %2753 = vmatprep.subr.bf16.mxu0 %v2294_v34  ;;  %v2378_v33 = vld [vmem:[#allocation3 + $0xbb0] sm:$0xff]  ;;  %v2375_v34 = vld [vmem:[#allocation3 + $0xb98] sm:$0xff] }
 0x625   :  { %2590 = vmatpush1.bf16.msra.mxu1 %v2291_v35  ;;  %2754 = vmatpush1.bf16.msra.mxu0 %v2293_v36  ;;  %v2377_v35 = vld [vmem:[#allocation3 + $0xba8] sm:$0xff]  ;;  %v2383_v36 = vld [vmem:[#allocation3 + $0xbd8] sm:$0xff] }
 0x626   :  { %2591 = vmatprep.subr.bf16.mxu1 %v2299_v54  ;;  %2755 = vmatprep.subr.bf16.mxu0 %v2301_v38  ;;  %v2385_v54 = vld [vmem:[#allocation3 + $0xbe8] sm:$0xff]  ;;  %v2382_v38 = vld [vmem:[#allocation3 + $0xbd0] sm:$0xff] }
 0x629   :  { %2592 = vmatpush1.bf16.msra.mxu1 %v2298_v17  ;;  %2756 = vmatpush1.bf16.msra.mxu0 %v2300_v39  ;;  %v2384_v17 = vld [vmem:[#allocation3 + $0xbe0] sm:$0xff]  ;;  %v2390_v39 = vld [vmem:[#allocation3 + $0xc10] sm:$0xff] }
 0x62a   :  { %2593 = vmatprep.subr.bf16.mxu1 %v2306_v3  ;;  %2757 = vmatprep.subr.bf16.mxu0 %v2308_v22  ;;  %v2392_v3 = vld [vmem:[#allocation3 + $0xc20] sm:$0xff]  ;;  %v2389_v22 = vld [vmem:[#allocation3 + $0xc08] sm:$0xff] }
 0x62d   :  { %2594 = vmatpush1.bf16.msra.mxu1 %v2305_v41  ;;  %2758 = vmatpush1.bf16.msra.mxu0 %v2307_v42  ;;  %v2391_v41 = vld [vmem:[#allocation3 + $0xc18] sm:$0xff]  ;;  %v2397_v42 = vld [vmem:[#allocation3 + $0xc48] sm:$0xff] }
 0x62e   :  { %2595 = vmatprep.subr.bf16.mxu1 %v2313_v43  ;;  %2759 = vmatprep.subr.bf16.mxu0 %v2315_v44  ;;  %v2399_v43 = vld [vmem:[#allocation3 + $0xc58] sm:$0xff]  ;;  %v2396_v44 = vld [vmem:[#allocation3 + $0xc40] sm:$0xff] }
 0x631   :  { %2596 = vmatpush1.bf16.msra.mxu1 %v2312_v47  ;;  %2760 = vmatpush1.bf16.msra.mxu0 %v2314_v21  ;;  %v2398_v47 = vld [vmem:[#allocation3 + $0xc50] sm:$0xff]  ;;  %v2404_v21 = vld [vmem:[#allocation3 + $0xc80] sm:$0xff] }
 0x632   :  { %2597 = vmatprep.subr.bf16.mxu1 %v2320_v53  ;;  %2761 = vmatprep.subr.bf16.mxu0 %v2322_v50  ;;  %v2406_v53 = vld [vmem:[#allocation3 + $0xc90] sm:$0xff]  ;;  %v2403_v50 = vld [vmem:[#allocation3 + $0xc78] sm:$0xff] }
 0x635   :  { %2598 = vmatpush1.bf16.msra.mxu1 %v2319_v57  ;;  %2762 = vmatpush1.bf16.msra.mxu0 %v2321_v56  ;;  %v2405_v57 = vld [vmem:[#allocation3 + $0xc88] sm:$0xff]  ;;  %v2411_v56 = vld [vmem:[#allocation3 + $0xcb8] sm:$0xff] }
 0x636   :  { %2599 = vmatprep.subr.bf16.mxu1 %v2327_v61  ;;  %2763 = vmatprep.subr.bf16.mxu0 %v2329_v37  ;;  %v2413_v61 = vld [vmem:[#allocation3 + $0xcc8] sm:$0xff]  ;;  %v2410_v37 = vld [vmem:[#allocation3 + $0xcb0] sm:$0xff] }
 0x639   :  { %2600 = vmatpush1.bf16.msra.mxu1 %v2326_v1  ;;  %2764 = vmatpush1.bf16.msra.mxu0 %v2328_v11  ;;  %v2412_v1 = vld [vmem:[#allocation3 + $0xcc0] sm:$0xff]  ;;  %v2418_v11 = vld [vmem:[#allocation3 + $0xcf0] sm:$0xff] }
 0x63a   :  { %2601 = vmatprep.subr.bf16.mxu1 %v2334_v2  ;;  %2765 = vmatprep.subr.bf16.mxu0 %v2336_v5  ;;  %v2420_v2 = vld [vmem:[#allocation3 + $0xd00] sm:$0xff]  ;;  %v2417_v5 = vld [vmem:[#allocation3 + $0xce8] sm:$0xff] }
 0x63d   :  { %2602 = vmatpush1.bf16.msra.mxu1 %v2333_v62  ;;  %2766 = vmatpush1.bf16.msra.mxu0 %v2335_v45  ;;  %v2419_v62 = vld [vmem:[#allocation3 + $0xcf8] sm:$0xff]  ;;  %v2425_v45 = vld [vmem:[#allocation3 + $0xd28] sm:$0xff] }
 0x63e   :  { %2612 = vmatprep.subr.bf16.mxu1 %v2341_v6  ;;  %2776 = vmatprep.subr.bf16.mxu0 %v2343_v7  ;;  %v2427_v6 = vld [vmem:[#allocation3 + $0xd38] sm:$0xff]  ;;  %v2424_v7 = vld [vmem:[#allocation3 + $0xd20] sm:$0xff] }
 0x640   :  { %2604 = vmatmul.mubr.bf16.vlgmr.msra.gmra.mrb[8].mxu1 %v4422_v40  ;;  %2768 = vmatmul.mubr.bf16.vlgmr.msra.gmra.mrb[20].mxu0 %v4422_v40 }
 0x641   :  { %2613 = vmatpush1.bf16.msra.mxu1 %v2340_v10  ;;  %2777 = vmatpush1.bf16.msra.mxu0 %v2342_v30  ;;  %v2426_v10 = vld [vmem:[#allocation3 + $0xd30] sm:$0xff]  ;;  %v2432_v30 = vld [vmem:[#allocation3 + $0xd60] sm:$0xff] }
 0x642   :  { %2614 = vmatprep.subr.bf16.mxu1 %v2348_v60  ;;  %2778 = vmatprep.subr.bf16.mxu0 %v2350_v0  ;;  %v2434_v60 = vld [vmem:[#allocation3 + $0xd70] sm:$0xff]  ;;  %v2431_v0 = vld [vmem:[#allocation3 + $0xd58] sm:$0xff] }
 0x643   :  { %2644 = vmatprep.mubr.bf16.mxu1 %v4426_v12  ;;  %2808 = vmatprep.mubr.bf16.mxu0 %v4426_v12 }
 0x645   :  { %2615 = vmatpush1.bf16.msra.mxu1 %v2347_v8  ;;  %2779 = vmatpush1.bf16.msra.mxu0 %v2349_v14  ;;  %v2433_v8 = vld [vmem:[#allocation3 + $0xd68] sm:$0xff]  ;;  %v2439_v14 = vld [vmem:[#allocation3 + $0xd98] sm:$0xff] }
 0x646   :  { %2616 = vmatprep.subr.bf16.mxu1 %v2355_v20  ;;  %2780 = vmatprep.subr.bf16.mxu0 %v2357_v23  ;;  %v2441_v20 = vld [vmem:[#allocation3 + $0xda8] sm:$0xff]  ;;  %v2438_v23 = vld [vmem:[#allocation3 + $0xd90] sm:$0xff] }
 0x649   :  { %2617 = vmatpush1.bf16.msra.mxu1 %v2354_v16  ;;  %2781 = vmatpush1.bf16.msra.mxu0 %v2356_v24  ;;  %v2440_v16 = vld [vmem:[#allocation3 + $0xda0] sm:$0xff]  ;;  %v2446_v24 = vld [vmem:[#allocation3 + $0xdd0] sm:$0xff] }
 0x64a   :  { %2618 = vmatprep.subr.bf16.mxu1 %v2362_v58  ;;  %2782 = vmatprep.subr.bf16.mxu0 %v2364_v13  ;;  %v2448_v58 = vld [vmem:[#allocation3 + $0xde0] sm:$0xff]  ;;  %v2445_v13 = vld [vmem:[#allocation3 + $0xdc8] sm:$0xff] }
 0x64d   :  { %2619 = vmatpush1.bf16.msra.mxu1 %v2361_v55  ;;  %2783 = vmatpush1.bf16.msra.mxu0 %v2363_v25  ;;  %v2447_v55 = vld [vmem:[#allocation3 + $0xdd8] sm:$0xff]  ;;  %v2009_v25 = vld [vmem:[#allocation3 + $0x28] sm:$0xff] }
 0x64e   :  { %2620 = vmatprep.subr.bf16.mxu1 %v2369_v4  ;;  %2784 = vmatprep.subr.bf16.mxu0 %v2371_v26  ;;  %v2066_v4 = vld [vmem:[#allocation3 + $0x1f0] sm:$0xff]  ;;  %v4434_v26 = vpack.c.bf16 %v4384_v9, %v4384_v9  ;;  %v2023_v9 = vld [vmem:[#allocation3 + $0x98] sm:$0xff] }
 0x651   :  { %2621 = vmatpush1.bf16.msra.mxu1 %v2368_v27  ;;  %2785 = vmatpush1.bf16.msra.mxu0 %v2370_v28  ;;  %v2008_v27 = vld [vmem:[#allocation3 + $0x20] sm:$0xff]  ;;  %v2010_v28 = vld [vmem:[#allocation3 + $0x30] sm:$0xff] }
 0x652   :  { %2622 = vmatprep.subr.bf16.mxu1 %v2376_v29  ;;  %2786 = vmatprep.subr.bf16.mxu0 %v2378_v33  ;;  %v2016_v29 = vld [vmem:[#allocation3 + $0x60] sm:$0xff]  ;;  %v2073_v33 = vld [vmem:[#allocation3 + $0x228] sm:$0xff] }
 0x655   :  { %2623 = vmatpush1.bf16.msra.mxu1 %v2375_v34  ;;  %2787 = vmatpush1.bf16.msra.mxu0 %v2377_v35  ;;  %v2015_v34 = vld [vmem:[#allocation3 + $0x58] sm:$0xff]  ;;  %v2017_v35 = vld [vmem:[#allocation3 + $0x68] sm:$0xff] }
 0x656   :  { %2624 = vmatprep.subr.bf16.mxu1 %v2383_v36  ;;  %2788 = vmatprep.subr.bf16.mxu0 %v2385_v54  ;;  %v2080_v36 = vld [vmem:[#allocation3 + $0x260] sm:$0xff]  ;;  %v2022_v54 = vld [vmem:[#allocation3 + $0x90] sm:$0xff] }
 0x659   :  { %2625 = vmatpush1.bf16.msra.mxu1 %v2382_v38  ;;  %2789 = vmatpush1.bf16.msra.mxu0 %v2384_v17  ;;  %v2024_v38 = vld [vmem:[#allocation3 + $0xa0] sm:$0xff]  ;;  %v2030_v17 = vld [vmem:[#allocation3 + $0xd0] sm:$0xff] }
 0x65a   :  { %2626 = vmatprep.subr.bf16.mxu1 %v2390_v39  ;;  %2790 = vmatprep.subr.bf16.mxu0 %v2392_v3  ;;  %v2087_v39 = vld [vmem:[#allocation3 + $0x298] sm:$0xff]  ;;  %v2029_v3 = vld [vmem:[#allocation3 + $0xc8] sm:$0xff] }
 0x65d   :  { %2627 = vmatpush1.bf16.msra.mxu1 %v2389_v22  ;;  %2791 = vmatpush1.bf16.msra.mxu0 %v2391_v41  ;;  %v2031_v22 = vld [vmem:[#allocation3 + $0xd8] sm:$0xff]  ;;  %v2037_v41 = vld [vmem:[#allocation3 + $0x108] sm:$0xff] }
 0x65e   :  { %2628 = vmatprep.subr.bf16.mxu1 %v2397_v42  ;;  %2792 = vmatprep.subr.bf16.mxu0 %v2399_v43  ;;  %v2094_v42 = vld [vmem:[#allocation3 + $0x2d0] sm:$0xff] }
 0x65f   :  { %v2038_v43 = vld [vmem:[#allocation3 + $0x110] sm:$0xff] }
 0x661   :  { %2629 = vmatpush1.bf16.msra.mxu1 %v2396_v44  ;;  %2793 = vmatpush1.bf16.msra.mxu0 %v2398_v47  ;;  %v2044_v44 = vld [vmem:[#allocation3 + $0x140] sm:$0xff]  ;;  %v2101_v47 = vld [vmem:[#allocation3 + $0x308] sm:$0xff] }
 0x662   :  { %2630 = vmatprep.subr.bf16.mxu1 %v2404_v21  ;;  %2794 = vmatprep.subr.bf16.mxu0 %v2406_v53  ;;  %v2043_v21 = vld [vmem:[#allocation3 + $0x138] sm:$0xff]  ;;  %v2045_v53 = vld [vmem:[#allocation3 + $0x148] sm:$0xff] }
 0x665   :  { %2631 = vmatpush1.bf16.msra.mxu1 %v2403_v50  ;;  %2795 = vmatpush1.bf16.msra.mxu0 %v2405_v57  ;;  %v2051_v50 = vld [vmem:[#allocation3 + $0x178] sm:$0xff]  ;;  %v2108_v57 = vld [vmem:[#allocation3 + $0x340] sm:$0xff] }
 0x666   :  { %2632 = vmatprep.subr.bf16.mxu1 %v2411_v56  ;;  %2796 = vmatprep.subr.bf16.mxu0 %v2413_v61  ;;  %v2050_v56 = vld [vmem:[#allocation3 + $0x170] sm:$0xff]  ;;  %v2052_v61 = vld [vmem:[#allocation3 + $0x180] sm:$0xff] }
 0x669   :  { %2633 = vmatpush1.bf16.msra.mxu1 %v2410_v37  ;;  %2797 = vmatpush1.bf16.msra.mxu0 %v2412_v1  ;;  %v2058_v37 = vld [vmem:[#allocation3 + $0x1b0] sm:$0xff]  ;;  %v2115_v1 = vld [vmem:[#allocation3 + $0x378] sm:$0xff] }
 0x66a   :  { %2634 = vmatprep.subr.bf16.mxu1 %v2418_v11  ;;  %2798 = vmatprep.subr.bf16.mxu0 %v2420_v2  ;;  %v2057_v11 = vld [vmem:[#allocation3 + $0x1a8] sm:$0xff]  ;;  %v2059_v2 = vld [vmem:[#allocation3 + $0x1b8] sm:$0xff] }
 0x66d   :  { %2635 = vmatpush1.bf16.msra.mxu1 %v2417_v5  ;;  %2799 = vmatpush1.bf16.msra.mxu0 %v2419_v62  ;;  %v2065_v5 = vld [vmem:[#allocation3 + $0x1e8] sm:$0xff]  ;;  %v2178_v62 = vld [vmem:[#allocation3 + $0x570] sm:$0xff] }
 0x66e   :  { %2636 = vmatprep.subr.bf16.mxu1 %v2425_v45  ;;  %2800 = vmatprep.subr.bf16.mxu0 %v2427_v6  ;;  %v2064_v45 = vld [vmem:[#allocation3 + $0x1e0] sm:$0xff]  ;;  %v2122_v6 = vld [vmem:[#allocation3 + $0x3b0] sm:$0xff] }
 0x671   :  { %2637 = vmatpush1.bf16.msra.mxu1 %v2424_v7  ;;  %2801 = vmatpush1.bf16.msra.mxu0 %v2426_v10  ;;  %v2072_v7 = vld [vmem:[#allocation3 + $0x220] sm:$0xff]  ;;  %v2185_v10 = vld [vmem:[#allocation3 + $0x5a8] sm:$0xff] }
 0x672   :  { %2638 = vmatprep.subr.bf16.mxu1 %v2432_v30  ;;  %2802 = vmatprep.subr.bf16.mxu0 %v2434_v60  ;;  %v2071_v30 = vld [vmem:[#allocation3 + $0x218] sm:$0xff]  ;;  %v2129_v60 = vld [vmem:[#allocation3 + $0x3e8] sm:$0xff] }
 0x675   :  { %2639 = vmatpush1.bf16.msra.mxu1 %v2431_v0  ;;  %2803 = vmatpush1.bf16.msra.mxu0 %v2433_v8  ;;  %v2079_v0 = vld [vmem:[#allocation3 + $0x258] sm:$0xff]  ;;  %v2192_v8 = vld [vmem:[#allocation3 + $0x5e0] sm:$0xff] }
 0x676   :  { %2640 = vmatprep.subr.bf16.mxu1 %v2439_v14  ;;  %2804 = vmatprep.subr.bf16.mxu0 %v2441_v20  ;;  %v2078_v14 = vld [vmem:[#allocation3 + $0x250] sm:$0xff]  ;;  %v2136_v20 = vld [vmem:[#allocation3 + $0x420] sm:$0xff] }
 0x679   :  { %2641 = vmatpush1.bf16.msra.mxu1 %v2438_v23  ;;  %2805 = vmatpush1.bf16.msra.mxu0 %v2440_v16  ;;  %v2086_v23 = vld [vmem:[#allocation3 + $0x290] sm:$0xff]  ;;  %v2199_v16 = vld [vmem:[#allocation3 + $0x618] sm:$0xff] }
 0x67a   :  { %2642 = vmatprep.subr.bf16.mxu1 %v2446_v24  ;;  %2806 = vmatprep.subr.bf16.mxu0 %v2448_v58  ;;  %v2085_v24 = vld [vmem:[#allocation3 + $0x288] sm:$0xff]  ;;  %v2143_v58 = vld [vmem:[#allocation3 + $0x458] sm:$0xff] }
 0x67d   :  { %2643 = vmatpush1.bf16.msra.mxu1 %v2445_v13  ;;  %2807 = vmatpush1.bf16.msra.mxu0 %v2447_v55  ;;  %v2093_v13 = vld [vmem:[#allocation3 + $0x2c8] sm:$0xff]  ;;  %v2206_v55 = vld [vmem:[#allocation3 + $0x650] sm:$0xff] }
 0x67e   :  { %2817 = vmatprep.subr.bf16.mxu1 %v2009_v25  ;;  %3268 = vmatprep.subr.bf16.mxu0 %v2066_v4  ;;  %v2092_v25 = vld [vmem:[#allocation3 + $0x2c0] sm:$0xff]  ;;  %v2150_v4 = vld [vmem:[#allocation3 + $0x490] sm:$0xff] }
 0x680   :  { %2645 = vmatmul.mubr.bf16.vlgmr.msra.gmra.mrb[8].mxu1 %v4434_v26  ;;  %2809 = vmatmul.mubr.bf16.vlgmr.msra.gmra.mrb[20].mxu0 %v4434_v26 }
 0x681   :  { %2818 = vmatpush1.bf16.msra.mxu1 %v2008_v27  ;;  %3269 = vmatpush3.bf16.msra.mxu0 %v2010_v28  ;;  %v2100_v27 = vld [vmem:[#allocation3 + $0x300] sm:$0xff]  ;;  %v2213_v28 = vld [vmem:[#allocation3 + $0x688] sm:$0xff] }
 0x682   :  { %2819 = vmatprep.subr.bf16.mxu1 %v2016_v29  ;;  %3270 = vmatprep.subr.bf16.mxu0 %v2073_v33  ;;  %v2099_v29 = vld [vmem:[#allocation3 + $0x2f8] sm:$0xff]  ;;  %v2157_v33 = vld [vmem:[#allocation3 + $0x4c8] sm:$0xff] }
 0x683   :  { %2849 = vmatprep.mubr.bf16.mxu1 %v4392_v63  ;;  %3013 = vmatprep.mubr.bf16.mxu0 %v4392_v63  ;;  %v2036_v63 = vld [vmem:[#allocation3 + $0x100] sm:$0xff] }
 0x685   :  { %2820 = vmatpush1.bf16.msra.mxu1 %v2015_v34  ;;  %3271 = vmatpush3.bf16.msra.mxu0 %v2017_v35  ;;  %v2107_v34 = vld [vmem:[#allocation3 + $0x338] sm:$0xff]  ;;  %v2220_v35 = vld [vmem:[#allocation3 + $0x6c0] sm:$0xff] }
 0x686   :  { %2821 = vmatprep.subr.bf16.mxu1 %v2023_v9  ;;  %3272 = vmatprep.subr.bf16.mxu0 %v2080_v36  ;;  %v2106_v9 = vld [vmem:[#allocation3 + $0x330] sm:$0xff]  ;;  %v2164_v36 = vld [vmem:[#allocation3 + $0x500] sm:$0xff] }
 0x689   :  { %2822 = vmatpush1.bf16.msra.mxu1 %v2022_v54  ;;  %3273 = vmatpush3.bf16.msra.mxu0 %v2024_v38  ;;  %v2114_v54 = vld [vmem:[#allocation3 + $0x370] sm:$0xff]  ;;  %v2227_v38 = vld [vmem:[#allocation3 + $0x6f8] sm:$0xff] }
 0x68a   :  { %2823 = vmatprep.subr.bf16.mxu1 %v2030_v17  ;;  %3274 = vmatprep.subr.bf16.mxu0 %v2087_v39  ;;  %v2113_v17 = vld [vmem:[#allocation3 + $0x368] sm:$0xff]  ;;  %v2171_v39 = vld [vmem:[#allocation3 + $0x538] sm:$0xff] }
 0x68d   :  { %2824 = vmatpush1.bf16.msra.mxu1 %v2029_v3  ;;  %3275 = vmatpush3.bf16.msra.mxu0 %v2031_v22  ;;  %v2121_v3 = vld [vmem:[#allocation3 + $0x3a8] sm:$0xff]  ;;  %v2290_v22 = vld [vmem:[#allocation3 + $0x8f0] sm:$0xff] }
 0x68e   :  { %2825 = vmatprep.subr.bf16.mxu1 %v2037_v41  ;;  %3276 = vmatprep.subr.bf16.mxu0 %v2094_v42  ;;  %v2120_v41 = vld [vmem:[#allocation3 + $0x3a0] sm:$0xff]  ;;  %v2234_v42 = vld [vmem:[#allocation3 + $0x730] sm:$0xff] }
 0x691   :  { %2826 = vmatpush1.bf16.msra.mxu1 %v2036_v63  ;;  %3277 = vmatpush3.bf16.msra.mxu0 %v2038_v43  ;;  %v2128_v63 = vld [vmem:[#allocation3 + $0x3e0] sm:$0xff]  ;;  %v2297_v43 = vld [vmem:[#allocation3 + $0x928] sm:$0xff] }
 0x692   :  { %2827 = vmatprep.subr.bf16.mxu1 %v2044_v44  ;;  %3278 = vmatprep.subr.bf16.mxu0 %v2101_v47  ;;  %v2127_v44 = vld [vmem:[#allocation3 + $0x3d8] sm:$0xff]  ;;  %v2241_v47 = vld [vmem:[#allocation3 + $0x768] sm:$0xff] }
 0x695   :  { %2828 = vmatpush1.bf16.msra.mxu1 %v2043_v21  ;;  %3279 = vmatpush3.bf16.msra.mxu0 %v2045_v53  ;;  %v2135_v21 = vld [vmem:[#allocation3 + $0x418] sm:$0xff]  ;;  %v2304_v53 = vld [vmem:[#allocation3 + $0x960] sm:$0xff] }
 0x696   :  { %2829 = vmatprep.subr.bf16.mxu1 %v2051_v50  ;;  %3280 = vmatprep.subr.bf16.mxu0 %v2108_v57  ;;  %v2134_v50 = vld [vmem:[#allocation3 + $0x410] sm:$0xff] }
 0x697   :  { %v2142_v57 = vld [vmem:[#allocation3 + $0x450] sm:$0xff] }
 0x699   :  { %2830 = vmatpush1.bf16.msra.mxu1 %v2050_v56  ;;  %3281 = vmatpush3.bf16.msra.mxu0 %v2052_v61  ;;  %v2311_v56 = vld [vmem:[#allocation3 + $0x998] sm:$0xff]  ;;  %v2141_v61 = vld [vmem:[#allocation3 + $0x448] sm:$0xff] }
 0x69a   :  { %2831 = vmatprep.subr.bf16.mxu1 %v2058_v37  ;;  %3282 = vmatprep.subr.bf16.mxu0 %v2115_v1  ;;  %v2255_v37 = vld [vmem:[#allocation3 + $0x7d8] sm:$0xff]  ;;  %v2149_v1 = vld [vmem:[#allocation3 + $0x488] sm:$0xff] }
 0x69d   :  { %2832 = vmatpush1.bf16.msra.mxu1 %v2057_v11  ;;  %3283 = vmatpush3.bf16.msra.mxu0 %v2059_v2  ;;  %v2318_v11 = vld [vmem:[#allocation3 + $0x9d0] sm:$0xff] }
 0x69e   :  { %2833 = vmatprep.subr.bf16.mxu1 %v2065_v5  ;;  %3290 = vmatprep.subr.bf16.mxu0 %v2178_v62  ;;  %v2262_v2 = vld [vmem:[#allocation3 + $0x810] sm:$0xff]  ;;  %v2156_v5 = vld [vmem:[#allocation3 + $0x4c0] sm:$0xff]  ;;  %v2325_v62 = vld [vmem:[#allocation3 + $0xa08] sm:$0xff] }
 0x6a0   :  { %3014 = vmatmul.mubr.bf16.vlgmr.msra.gmra.mrb[24].mxu0 %v4398_v31 }
 0x6a1   :  { %2834 = vmatpush1.bf16.msra.mxu1 %v2064_v45  ;;  %3291 = vmatpush3.bf16.msra.mxu0 %v2122_v6  ;;  %v2155_v45 = vld [vmem:[#allocation3 + $0x4b8] sm:$0xff]  ;;  %v2269_v6 = vld [vmem:[#allocation3 + $0x848] sm:$0xff] }
 0x6a2   :  { %2835 = vmatprep.subr.bf16.mxu1 %v2072_v7  ;;  %3292 = vmatprep.subr.bf16.mxu0 %v2185_v10  ;;  %v2163_v7 = vld [vmem:[#allocation3 + $0x4f8] sm:$0xff]  ;;  %v2332_v10 = vld [vmem:[#allocation3 + $0xa40] sm:$0xff] }
 0x6a3   :  { %3053 = vmatprep.mubr.bf16.mxu0 %v4402_v15 }
 0x6a5   :  { %2836 = vmatpush1.bf16.msra.mxu1 %v2071_v30  ;;  %3293 = vmatpush3.bf16.msra.mxu0 %v2129_v60  ;;  %v2162_v30 = vld [vmem:[#allocation3 + $0x4f0] sm:$0xff]  ;;  %v2276_v60 = vld [vmem:[#allocation3 + $0x880] sm:$0xff] }
 0x6a6   :  { %2837 = vmatprep.subr.bf16.mxu1 %v2079_v0  ;;  %3294 = vmatprep.subr.bf16.mxu0 %v2192_v8  ;;  %v2170_v0 = vld [vmem:[#allocation3 + $0x530] sm:$0xff]  ;;  %v2339_v8 = vld [vmem:[#allocation3 + $0xa78] sm:$0xff] }
 0x6a9   :  { %2838 = vmatpush1.bf16.msra.mxu1 %v2078_v14  ;;  %3295 = vmatpush3.bf16.msra.mxu0 %v2136_v20  ;;  %v2169_v14 = vld [vmem:[#allocation3 + $0x528] sm:$0xff]  ;;  %v2283_v20 = vld [vmem:[#allocation3 + $0x8b8] sm:$0xff] }
 0x6aa   :  { %2839 = vmatprep.subr.bf16.mxu1 %v2086_v23  ;;  %3296 = vmatprep.subr.bf16.mxu0 %v2199_v16  ;;  %v2177_v23 = vld [vmem:[#allocation3 + $0x568] sm:$0xff]  ;;  %v2402_v16 = vld [vmem:[#allocation3 + $0xc70] sm:$0xff] }
 0x6ad   :  { %2840 = vmatpush1.bf16.msra.mxu1 %v2085_v24  ;;  %3297 = vmatpush3.bf16.msra.mxu0 %v2143_v58  ;;  %v2176_v24 = vld [vmem:[#allocation3 + $0x560] sm:$0xff]  ;;  %v2346_v58 = vld [vmem:[#allocation3 + $0xab0] sm:$0xff] }
 0x6ae   :  { %2841 = vmatprep.subr.bf16.mxu1 %v2093_v13  ;;  %3298 = vmatprep.subr.bf16.mxu0 %v2206_v55  ;;  %v2184_v13 = vld [vmem:[#allocation3 + $0x5a0] sm:$0xff]  ;;  %v2409_v55 = vld [vmem:[#allocation3 + $0xca8] sm:$0xff] }
 0x6b1   :  { %2842 = vmatpush1.bf16.msra.mxu1 %v2092_v25  ;;  %3299 = vmatpush3.bf16.msra.mxu0 %v2150_v4  ;;  %v2183_v25 = vld [vmem:[#allocation3 + $0x598] sm:$0xff]  ;;  %v2353_v4 = vld [vmem:[#allocation3 + $0xae8] sm:$0xff] }
 0x6b2   :  { %2843 = vmatprep.subr.bf16.mxu1 %v2100_v27  ;;  %3300 = vmatprep.subr.bf16.mxu0 %v2213_v28  ;;  %v2191_v27 = vld [vmem:[#allocation3 + $0x5d8] sm:$0xff]  ;;  %v2416_v28 = vld [vmem:[#allocation3 + $0xce0] sm:$0xff] }
 0x6b5   :  { %2844 = vmatpush1.bf16.msra.mxu1 %v2099_v29  ;;  %3301 = vmatpush3.bf16.msra.mxu0 %v2157_v33  ;;  %v2190_v29 = vld [vmem:[#allocation3 + $0x5d0] sm:$0xff]  ;;  %v2360_v33 = vld [vmem:[#allocation3 + $0xb20] sm:$0xff] }
 0x6b6   :  { %2845 = vmatprep.subr.bf16.mxu1 %v2107_v34  ;;  %3302 = vmatprep.subr.bf16.mxu0 %v2220_v35  ;;  %v2198_v34 = vld [vmem:[#allocation3 + $0x610] sm:$0xff]  ;;  %v2423_v35 = vld [vmem:[#allocation3 + $0xd18] sm:$0xff] }
 0x6b9   :  { %2846 = vmatpush1.bf16.msra.mxu1 %v2106_v9  ;;  %3303 = vmatpush3.bf16.msra.mxu0 %v2164_v36  ;;  %v2197_v9 = vld [vmem:[#allocation3 + $0x608] sm:$0xff]  ;;  %v2367_v36 = vld [vmem:[#allocation3 + $0xb58] sm:$0xff] }
 0x6ba   :  { %2847 = vmatprep.subr.bf16.mxu1 %v2114_v54  ;;  %3304 = vmatprep.subr.bf16.mxu0 %v2227_v38  ;;  %v2205_v54 = vld [vmem:[#allocation3 + $0x648] sm:$0xff]  ;;  %v2430_v38 = vld [vmem:[#allocation3 + $0xd50] sm:$0xff] }
 0x6bd   :  { %2848 = vmatpush1.bf16.msra.mxu1 %v2113_v17  ;;  %3305 = vmatpush3.bf16.msra.mxu0 %v2171_v39  ;;  %v2204_v17 = vld [vmem:[#allocation3 + $0x640] sm:$0xff]  ;;  %v2374_v39 = vld [vmem:[#allocation3 + $0xb90] sm:$0xff] }
 0x6be   :  { %2858 = vmatprep.subr.bf16.mxu1 %v2121_v3  ;;  %3312 = vmatprep.subr.bf16.mxu0 %v2290_v22  ;;  %v2212_v3 = vld [vmem:[#allocation3 + $0x680] sm:$0xff]  ;;  %v2437_v22 = vld [vmem:[#allocation3 + $0xd88] sm:$0xff] }
 0x6c0   :  { %2850 = vmatmul.mubr.bf16.vlgmr.msra.gmra.mrb[12].mxu1 %v4398_v31  ;;  %3054 = vmatmul.mubr.bf16.vlgmr.msra.gmra.mrb[28].mxu0 %v4410_v49  ;;  %v2248_v31 = vld [vmem:[#allocation3 + $0x7a0] sm:$0xff] }
 0x6c1   :  { %2859 = vmatpush1.bf16.msra.mxu1 %v2120_v41  ;;  %3313 = vmatpush3.bf16.msra.mxu0 %v2234_v42  ;;  %v2211_v41 = vld [vmem:[#allocation3 + $0x678] sm:$0xff]  ;;  %v2381_v42 = vld [vmem:[#allocation3 + $0xbc8] sm:$0xff] }
 0x6c2   :  { %2860 = vmatprep.subr.bf16.mxu1 %v2128_v63  ;;  %3314 = vmatprep.subr.bf16.mxu0 %v2297_v43  ;;  %v2219_v63 = vld [vmem:[#allocation3 + $0x6b8] sm:$0xff]  ;;  %v2444_v43 = vld [vmem:[#allocation3 + $0xdc0] sm:$0xff] }
 0x6c3   :  { %2890 = vmatprep.mubr.bf16.mxu1 %v4402_v15  ;;  %3093 = vmatprep.mubr.bf16.mxu0 %v4414_v32  ;;  %v2148_v15 = vld [vmem:[#allocation3 + $0x480] sm:$0xff] }
 0x6c5   :  { %2861 = vmatpush1.bf16.msra.mxu1 %v2127_v44  ;;  %3315 = vmatpush3.bf16.msra.mxu0 %v2241_v47  ;;  %v2218_v44 = vld [vmem:[#allocation3 + $0x6b0] sm:$0xff]  ;;  %v2388_v47 = vld [vmem:[#allocation3 + $0xc00] sm:$0xff] }
 0x6c6   :  { %2862 = vmatprep.subr.bf16.mxu1 %v2135_v21  ;;  %3316 = vmatprep.subr.bf16.mxu0 %v2304_v53  ;;  %v2226_v21 = vld [vmem:[#allocation3 + $0x6f0] sm:$0xff]  ;;  %v2451_v53 = vld [vmem:[#allocation3 + $0xdf8] sm:$0xff] }
 0x6c9   :  { %2863 = vmatpush1.bf16.msra.mxu1 %v2134_v50  ;;  %3317 = vmatpush3.bf16.msra.mxu0 %v2248_v31  ;;  %v2225_v50 = vld [vmem:[#allocation3 + $0x6e8] sm:$0xff]  ;;  %v2395_v31 = vld [vmem:[#allocation3 + $0xc38] sm:$0xff] }
 0x6ca   :  { %2864 = vmatprep.subr.bf16.mxu1 %v2142_v57  ;;  %3318 = vmatprep.subr.bf16.mxu0 %v2311_v56  ;;  %v2233_v57 = vld [vmem:[#allocation3 + $0x728] sm:$0xff]  ;;  %v2232_v56 = vld [vmem:[#allocation3 + $0x720] sm:$0xff] }
 0x6cd   :  { %2865 = vmatpush1.bf16.msra.mxu1 %v2141_v61  ;;  %3319 = vmatpush3.bf16.msra.mxu0 %v2255_v37  ;;  %v2240_v61 = vld [vmem:[#allocation3 + $0x760] sm:$0xff]  ;;  %v2239_v37 = vld [vmem:[#allocation3 + $0x758] sm:$0xff] }
 0x6ce   :  { %2866 = vmatprep.subr.bf16.mxu1 %v2149_v1  ;;  %3320 = vmatprep.subr.bf16.mxu0 %v2318_v11  ;;  %v2247_v1 = vld [vmem:[#allocation3 + $0x798] sm:$0xff]  ;;  %v2246_v11 = vld [vmem:[#allocation3 + $0x790] sm:$0xff] }
 0x6d1   :  { %2867 = vmatpush1.bf16.msra.mxu1 %v2148_v15  ;;  %3321 = vmatpush3.bf16.msra.mxu0 %v2262_v2  ;;  %v2254_v15 = vld [vmem:[#allocation3 + $0x7d0] sm:$0xff]  ;;  %v2253_v2 = vld [vmem:[#allocation3 + $0x7c8] sm:$0xff] }
 0x6d2   :  { %2868 = vmatprep.subr.bf16.mxu1 %v2156_v5  ;;  %3322 = vmatprep.subr.bf16.mxu0 %v2325_v62  ;;  %v2261_v5 = vld [vmem:[#allocation3 + $0x808] sm:$0xff]  ;;  %v2260_v62 = vld [vmem:[#allocation3 + $0x800] sm:$0xff] }
 0x6d5   :  { %2869 = vmatpush1.bf16.msra.mxu1 %v2155_v45  ;;  %3323 = vmatpush3.bf16.msra.mxu0 %v2269_v6  ;;  %v2267_v45 = vld [vmem:[#allocation3 + $0x838] sm:$0xff] }
 0x6d6   :  { %2870 = vmatprep.subr.bf16.mxu1 %v2163_v7  ;;  %3324 = vmatprep.subr.bf16.mxu0 %v2332_v10  ;;  %v2275_v6 = vld [vmem:[#allocation3 + $0x878] sm:$0xff]  ;;  %v2282_v7 = vld [vmem:[#allocation3 + $0x8b0] sm:$0xff]  ;;  %v2281_v10 = vld [vmem:[#allocation3 + $0x8a8] sm:$0xff] }
 0x6d9   :  { %2871 = vmatpush1.bf16.msra.mxu1 %v2162_v30  ;;  %3325 = vmatpush3.bf16.msra.mxu0 %v2276_v60  ;;  %v2289_v30 = vld [vmem:[#allocation3 + $0x8e8] sm:$0xff]  ;;  %v2288_v60 = vld [vmem:[#allocation3 + $0x8e0] sm:$0xff] }
 0x6da   :  { %2872 = vmatprep.subr.bf16.mxu1 %v2170_v0  ;;  %3326 = vmatprep.subr.bf16.mxu0 %v2339_v8  ;;  %v2296_v0 = vld [vmem:[#allocation3 + $0x920] sm:$0xff]  ;;  %v2295_v8 = vld [vmem:[#allocation3 + $0x918] sm:$0xff] }
 0x6dd   :  { %2873 = vmatpush1.bf16.msra.mxu1 %v2169_v14  ;;  %3327 = vmatpush3.bf16.msra.mxu0 %v2283_v20  ;;  %v2303_v14 = vld [vmem:[#allocation3 + $0x958] sm:$0xff]  ;;  %v2302_v20 = vld [vmem:[#allocation3 + $0x950] sm:$0xff] }
 0x6de   :  { %2874 = vmatprep.subr.bf16.mxu1 %v2177_v23  ;;  %3334 = vmatprep.subr.bf16.mxu0 %v2402_v16  ;;  %v2310_v23 = vld [vmem:[#allocation3 + $0x990] sm:$0xff]  ;;  %v2309_v16 = vld [vmem:[#allocation3 + $0x988] sm:$0xff] }
 0x6e0   :  { %3094 = vmatmul.mubr.bf16.vlgmr.msra.gmra.mrb[32].mxu0 %v4422_v40 }
 0x6e1   :  { %2875 = vmatpush1.bf16.msra.mxu1 %v2176_v24  ;;  %3335 = vmatpush3.bf16.msra.mxu0 %v2346_v58  ;;  %v2317_v24 = vld [vmem:[#allocation3 + $0x9c8] sm:$0xff]  ;;  %v2316_v58 = vld [vmem:[#allocation3 + $0x9c0] sm:$0xff] }
 0x6e2   :  { %2876 = vmatprep.subr.bf16.mxu1 %v2184_v13  ;;  %3336 = vmatprep.subr.bf16.mxu0 %v2409_v55  ;;  %v2324_v13 = vld [vmem:[#allocation3 + $0xa00] sm:$0xff]  ;;  %v2323_v55 = vld [vmem:[#allocation3 + $0x9f8] sm:$0xff] }
 0x6e3   :  { %3133 = vmatprep.mubr.bf16.mxu0 %v4426_v12 }
 0x6e5   :  { %2877 = vmatpush1.bf16.msra.mxu1 %v2183_v25  ;;  %3337 = vmatpush3.bf16.msra.mxu0 %v2353_v4  ;;  %v2331_v25 = vld [vmem:[#allocation3 + $0xa38] sm:$0xff]  ;;  %v2330_v4 = vld [vmem:[#allocation3 + $0xa30] sm:$0xff] }
 0x6e6   :  { %2878 = vmatprep.subr.bf16.mxu1 %v2191_v27  ;;  %3338 = vmatprep.subr.bf16.mxu0 %v2416_v28  ;;  %v2338_v27 = vld [vmem:[#allocation3 + $0xa70] sm:$0xff]  ;;  %v2337_v28 = vld [vmem:[#allocation3 + $0xa68] sm:$0xff] }
 0x6e9   :  { %2879 = vmatpush1.bf16.msra.mxu1 %v2190_v29  ;;  %3339 = vmatpush3.bf16.msra.mxu0 %v2360_v33  ;;  %v2345_v29 = vld [vmem:[#allocation3 + $0xaa8] sm:$0xff]  ;;  %v2344_v33 = vld [vmem:[#allocation3 + $0xaa0] sm:$0xff] }
 0x6ea   :  { %2880 = vmatprep.subr.bf16.mxu1 %v2198_v34  ;;  %3340 = vmatprep.subr.bf16.mxu0 %v2423_v35  ;;  %v2352_v34 = vld [vmem:[#allocation3 + $0xae0] sm:$0xff]  ;;  %v2351_v35 = vld [vmem:[#allocation3 + $0xad8] sm:$0xff] }
 0x6ed   :  { %2881 = vmatpush1.bf16.msra.mxu1 %v2197_v9  ;;  %3341 = vmatpush3.bf16.msra.mxu0 %v2367_v36  ;;  %v2359_v9 = vld [vmem:[#allocation3 + $0xb18] sm:$0xff]  ;;  %v2358_v36 = vld [vmem:[#allocation3 + $0xb10] sm:$0xff] }
 0x6ee   :  { %2882 = vmatprep.subr.bf16.mxu1 %v2205_v54  ;;  %3342 = vmatprep.subr.bf16.mxu0 %v2430_v38  ;;  %v2366_v54 = vld [vmem:[#allocation3 + $0xb50] sm:$0xff]  ;;  %v2365_v38 = vld [vmem:[#allocation3 + $0xb48] sm:$0xff] }
 0x6f1   :  { %2883 = vmatpush1.bf16.msra.mxu1 %v2204_v17  ;;  %3343 = vmatpush3.bf16.msra.mxu0 %v2374_v39  ;;  %v2373_v17 = vld [vmem:[#allocation3 + $0xb88] sm:$0xff]  ;;  %v4453_v39 = vld [vmem:[#allocation25] sm:$0xff] }
 0x6f2   :  { %2884 = vmatprep.subr.bf16.mxu1 %v2212_v3  ;;  %3344 = vmatprep.subr.bf16.mxu0 %v2437_v22  ;;  %v2372_v3 = vld [vmem:[#allocation3 + $0xb80] sm:$0xff]  ;;  %v2465_v22 = vrot.slane %v4453_v39, %v4255_v18 }
 0x6f5   :  { %2885 = vmatpush1.bf16.msra.mxu1 %v2211_v41  ;;  %3345 = vmatpush3.bf16.msra.mxu0 %v2381_v42  ;;  %v2461_v41 = vrot.slane %v4453_v39, %v4220_v48  ;;  %v2469_v42 = vrot.slane %v4453_v39, %v4258_v19  ;;  %v2394_v19 = vld [vmem:[#allocation3 + $0xc30] sm:$0xff] }
 0x6f6   :  { %2886 = vmatprep.subr.bf16.mxu1 %v2219_v63  ;;  %3346 = vmatprep.subr.bf16.mxu0 %v2444_v43  ;;  %v2379_v63 = vld [vmem:[#allocation3 + $0xbb8] sm:$0xff] }
 0x6f9   :  { %2887 = vmatpush1.bf16.msra.mxu1 %v2218_v44  ;;  %3347 = vmatpush3.bf16.msra.mxu0 %v2388_v47  ;;  %v2387_v47 = vld [vmem:[#allocation3 + $0xbf8] sm:$0xff] }
 0x6fa   :  { %2888 = vmatprep.subr.bf16.mxu1 %v2226_v21  ;;  %3348 = vmatprep.subr.bf16.mxu0 %v2451_v53 }
 0x6fd   :  { %2889 = vmatpush1.bf16.msra.mxu1 %v2225_v50  ;;  %3349 = vmatpush3.bf16.msra.mxu0 %v2395_v31 }
 0x6fe   :  { %2899 = vmatprep.subr.bf16.mxu1 %v2233_v57 }
 0x700   :  { %2891 = vmatmul.mubr.bf16.vlgmr.msra.gmra.mrb[12].mxu1 %v4410_v49  ;;  %3134 = vmatmul.mubr.bf16.vlgmr.msra.gmra.mrb[36].mxu0 %v4434_v26  ;;  %v2268_v49 = vld [vmem:[#allocation3 + $0x840] sm:$0xff] }
 0x701   :  { %2900 = vmatpush1.bf16.msra.mxu1 %v2232_v56  ;;  %2931 = vmatprep.mubr.bf16.mxu1 %v4414_v32  ;;  %v2274_v32 = vld [vmem:[#allocation3 + $0x870] sm:$0xff] }
 0x702   :  { %2901 = vmatprep.subr.bf16.mxu1 %v2240_v61 }
 0x705   :  { %2902 = vmatpush1.bf16.msra.mxu1 %v2239_v37  ;;  %v2386_v37 = vld [vmem:[#allocation3 + $0xbf0] sm:$0xff] }
 0x706   :  { %2903 = vmatprep.subr.bf16.mxu1 %v2247_v1  ;;  %v2393_v1 = vld [vmem:[#allocation3 + $0xc28] sm:$0xff] }
 0x709   :  { %2904 = vmatpush1.bf16.msra.mxu1 %v2246_v11  ;;  %v2401_v11 = vld [vmem:[#allocation3 + $0xc68] sm:$0xff] }
 0x70a   :  { %2905 = vmatprep.subr.bf16.mxu1 %v2254_v15  ;;  %v2400_v15 = vld [vmem:[#allocation3 + $0xc60] sm:$0xff] }
 0x70d   :  { %2906 = vmatpush1.bf16.msra.mxu1 %v2253_v2  ;;  %v2408_v2 = vld [vmem:[#allocation3 + $0xca0] sm:$0xff] }
 0x70e   :  { %2907 = vmatprep.subr.bf16.mxu1 %v2261_v5 }
 0x711   :  { %2908 = vmatpush1.bf16.msra.mxu1 %v2260_v62 }
 0x712   :  { %2909 = vmatprep.subr.bf16.mxu1 %v2268_v49 }
 0x715   :  { %2910 = vmatpush1.bf16.msra.mxu1 %v2267_v45  ;;  %v2407_v45 = vld [vmem:[#allocation3 + $0xc98] sm:$0xff] }
 0x716   :  { %2911 = vmatprep.subr.bf16.mxu1 %v2275_v6 }
 0x719   :  { %2912 = vmatpush1.bf16.msra.mxu1 %v2274_v32  ;;  %v2415_v32 = vld [vmem:[#allocation3 + $0xcd8] sm:$0xff] }
 0x71a   :  { %2913 = vmatprep.subr.bf16.mxu1 %v2282_v7  ;;  %v2414_v7 = vld [vmem:[#allocation3 + $0xcd0] sm:$0xff] }
 0x71d   :  { %2914 = vmatpush1.bf16.msra.mxu1 %v2281_v10  ;;  %v2422_v10 = vld [vmem:[#allocation3 + $0xd10] sm:$0xff] }
 0x71e   :  { %2915 = vmatprep.subr.bf16.mxu1 %v2289_v30  ;;  %v2421_v30 = vld [vmem:[#allocation3 + $0xd08] sm:$0xff] }
 0x721   :  { %2916 = vmatpush1.bf16.msra.mxu1 %v2288_v60  ;;  %v2429_v60 = vld [vmem:[#allocation3 + $0xd48] sm:$0xff] }
 0x722   :  { %2917 = vmatprep.subr.bf16.mxu1 %v2296_v0  ;;  %v2428_v0 = vld [vmem:[#allocation3 + $0xd40] sm:$0xff] }
 0x725   :  { %2918 = vmatpush1.bf16.msra.mxu1 %v2295_v8  ;;  %v2436_v8 = vld [vmem:[#allocation3 + $0xd80] sm:$0xff] }
 0x726   :  { %2919 = vmatprep.subr.bf16.mxu1 %v2303_v14  ;;  %v2435_v14 = vld [vmem:[#allocation3 + $0xd78] sm:$0xff] }
 0x729   :  { %2920 = vmatpush1.bf16.msra.mxu1 %v2302_v20  ;;  %v2443_v20 = vld [vmem:[#allocation3 + $0xdb8] sm:$0xff] }
 0x72a   :  { %2921 = vmatprep.subr.bf16.mxu1 %v2310_v23 }
 0x72d   :  { %2922 = vmatpush1.bf16.msra.mxu1 %v2309_v16 }
 0x72e   :  { %2923 = vmatprep.subr.bf16.mxu1 %v2317_v24 }
 0x731   :  { %2924 = vmatpush1.bf16.msra.mxu1 %v2316_v58 }
 0x732   :  { %2925 = vmatprep.subr.bf16.mxu1 %v2324_v13  ;;  %v2442_v13 = vld [vmem:[#allocation3 + $0xdb0] sm:$0xff] }
 0x735   :  { %2926 = vmatpush1.bf16.msra.mxu1 %v2323_v55 }
 0x736   :  { %2927 = vmatprep.subr.bf16.mxu1 %v2331_v25  ;;  %v2450_v25 = vld [vmem:[#allocation3 + $0xdf0] sm:$0xff] }
 0x739   :  { %2928 = vmatpush1.bf16.msra.mxu1 %v2330_v4  ;;  %v2449_v4 = vld [vmem:[#allocation3 + $0xde8] sm:$0xff] }
 0x73a   :  { %2929 = vmatprep.subr.bf16.mxu1 %v2338_v27  ;;  %v2481_v27 = vrot.slane %v4453_v39, %v4350_v59 }
 0x73d   :  { %2930 = vmatpush1.bf16.msra.mxu1 %v2337_v28 }
 0x73e   :  { %2940 = vmatprep.subr.bf16.mxu1 %v2345_v29 }
 0x740   :  { %2932 = vmatmul.mubr.bf16.vlgmr.msra.gmra.mrb[12].mxu1 %v4422_v40  ;;  %v2380_v40 = vld [vmem:[#allocation3 + $0xbc0] sm:$0xff] }
 0x741   :  { %2941 = vmatpush1.bf16.msra.mxu1 %v2344_v33  ;;  %2972 = vmatprep.mubr.bf16.mxu1 %v4426_v12  ;;  %v2457_v12 = vrot.slane %v4453_v39, %v4217_v46 }
 0x742   :  { %2942 = vmatprep.subr.bf16.mxu1 %v2352_v34 }
 0x745   :  { %2943 = vmatpush1.bf16.msra.mxu1 %v2351_v35 }
 0x746   :  { %2944 = vmatprep.subr.bf16.mxu1 %v2359_v9 }
 0x749   :  { %2945 = vmatpush1.bf16.msra.mxu1 %v2358_v36 }
 0x74a   :  { %2946 = vmatprep.subr.bf16.mxu1 %v2366_v54 }
 0x74d   :  { %2947 = vmatpush1.bf16.msra.mxu1 %v2365_v38 }
 0x74e   :  { %2948 = vmatprep.subr.bf16.mxu1 %v2373_v17 }
 0x751   :  { %2949 = vmatpush1.bf16.msra.mxu1 %v2372_v3 }
 0x752   :  { %2950 = vmatprep.subr.bf16.mxu1 %v2380_v40 }
 0x753   :  { %v2646_v43 = vpop.f32.mrb[8].mxu1  ;;  %v2810_v44 = vpop.f32.mrb[20].mxu0 }
 0x754   :  { %v3364_v21 = vadd.f32 %v2646_v43, %v2457_v12  ;;  %v3366_v53 = vadd.f32 %v2810_v44, %v2465_v22  ;;  %v2648_v50 = vpop.f32.mrb[9].mxu1  ;;  %v2812_v31 = vpop.f32.mrb[21].mxu0  ;;  %v2473_v44 = vrot.slane %v4453_v39, %v4347_v51 }
 0x755   :  { %v3365_v46 = vadd.f32 %v2648_v50, %v2461_v41  ;;  %v3367_v57 = vadd.f32 %v2812_v31, %v2469_v42  ;;  %v2650_v56 = vpop.f32.mrb[10].mxu1  ;;  %v2814_v18 = vpop.f32.mrb[22].mxu0  ;;  %2951 = vmatpush1.bf16.msra.mxu1 %v2379_v63 }
 0x756   :  { %3591 = vtanh.f32 %v3364_v21  ;;  %v2651_v61 = vpop.f32.mrb[11].mxu1  ;;  %v2815_v48 = vpop.f32.mrb[23].mxu0  ;;  %2952 = vmatprep.subr.bf16.mxu1 %v2387_v47  ;;  %v2477_v47 = vrot.slane %v4453_v39, %v4353_v52 }
 0x757   :  { %3593 = vtanh.f32 %v3366_v53 }
 0x758   :  { %3595 = vtanh.f32 %v3365_v46 }
 0x759   :  { %3597 = vtanh.f32 %v3367_v57  ;;  %2953 = vmatpush1.bf16.msra.mxu1 %v2386_v37 }
 0x75a   :  { %2954 = vmatprep.subr.bf16.mxu1 %v2394_v19 }
 0x75d   :  { %2955 = vmatpush1.bf16.msra.mxu1 %v2393_v1 }
 0x75e   :  { %2956 = vmatprep.subr.bf16.mxu1 %v2401_v11 }
 0x760   :  { %v3592_v5 = vpop.eup %3591 }
 0x761   :  { %v3594_v62 = vpop.eup %3593  ;;  %3148 = vst [vmem:[#allocation26] sm:$0xff] %v3592_v5  ;;  %2957 = vmatpush1.bf16.msra.mxu1 %v2400_v15 }
 0x762   :  { %v3596_v49 = vpop.eup %3595  ;;  %3150 = vst [vmem:[#allocation26 + $0x10] sm:$0xff] %v3594_v62  ;;  %2958 = vmatprep.subr.bf16.mxu1 %v2408_v2 }
 0x763   :  { %v3598_v6 = vpop.eup %3597  ;;  %3149 = vst [vmem:[#allocation26 + $0x8] sm:$0xff] %v3596_v49 }
 0x764   :  { %3151 = vst [vmem:[#allocation26 + $0x18] sm:$0xff] %v3598_v6 }
 0x765   :  { %2959 = vmatpush1.bf16.msra.mxu1 %v2407_v45 }
 0x766   :  { %2960 = vmatprep.subr.bf16.mxu1 %v2415_v32 }
 0x769   :  { %2961 = vmatpush1.bf16.msra.mxu1 %v2414_v7 }
 0x76a   :  { %2962 = vmatprep.subr.bf16.mxu1 %v2422_v10 }
 0x76d   :  { %2963 = vmatpush1.bf16.msra.mxu1 %v2421_v30 }
 0x76e   :  { %2964 = vmatprep.subr.bf16.mxu1 %v2429_v60 }
 0x771   :  { %2965 = vmatpush1.bf16.msra.mxu1 %v2428_v0 }
 0x772   :  { %2966 = vmatprep.subr.bf16.mxu1 %v2436_v8 }
 0x773   :  { %v3284_v23 = vpop.f32.mrb[24].mxu0 }
 0x774   :  { %v3285_v16 = vpop.f32.mrb[25].mxu0 }
 0x775   :  { %2967 = vmatpush1.bf16.msra.mxu1 %v2435_v14  ;;  %v3286_v24 = vadd.f32 %v3285_v16, %v3284_v23  ;;  %v3287_v58 = vpop.f32.mrb[26].mxu0 }
 0x776   :  { %2968 = vmatprep.subr.bf16.mxu1 %v2443_v20  ;;  %v3288_v55 = vpop.f32.mrb[27].mxu0 }
 0x777   :  { %v3016_v28 = vadd.f32 %v3286_v24, %v2481_v27 }
 0x779   :  { %2969 = vmatpush1.bf16.msra.mxu1 %v2442_v13 }
 0x77a   :  { %2970 = vmatprep.subr.bf16.mxu1 %v2450_v25 }
 0x77d   :  { %2971 = vmatpush1.bf16.msra.mxu1 %v2449_v4 }
 0x780   :  { %2973 = vmatmul.mubr.bf16.vlgmr.msra.gmra.mrb[12].mxu1 %v4434_v26 }
 0x793   :  { %v3306_v29 = vpop.f32.mrb[28].mxu0 }
 0x794   :  { %v3307_v33 = vpop.f32.mrb[29].mxu0 }
 0x795   :  { %v3308_v34 = vadd.f32 %v3307_v33, %v3306_v29  ;;  %v3309_v35 = vpop.f32.mrb[30].mxu0 }
 0x796   :  { %v3310_v9 = vpop.f32.mrb[31].mxu0 }
 0x797   :  { %v3056_v36 = vadd.f32 %v3308_v34, %v3016_v28 }
 0x7b3   :  { %v3328_v54 = vpop.f32.mrb[32].mxu0 }
 0x7b4   :  { %v3329_v38 = vpop.f32.mrb[33].mxu0 }
 0x7b5   :  { %v3330_v17 = vadd.f32 %v3329_v38, %v3328_v54  ;;  %v3331_v3 = vpop.f32.mrb[34].mxu0 }
 0x7b6   :  { %v3332_v40 = vpop.f32.mrb[35].mxu0 }
 0x7b7   :  { %v3096_v12 = vadd.f32 %v3330_v17, %v3056_v36 }
 0x7d3   :  { %v3350_v22 = vpop.f32.mrb[36].mxu0 }
 0x7d4   :  { %v3351_v41 = vpop.f32.mrb[37].mxu0 }
 0x7d5   :  { %v3352_v42 = vadd.f32 %v3351_v41, %v3350_v22  ;;  %v3353_v26 = vpop.f32.mrb[38].mxu0 }
 0x7d6   :  { %v3354_v63 = vpop.f32.mrb[39].mxu0 }
 0x7d7   :  { %v3136_v43 = vadd.f32 %v3352_v42, %v3096_v12 }
 0x7d9   :  { %3599 = vtanh.f32 %v3136_v43 }
 0x7e3   :  { %v3600_v59 = vpop.eup %3599 }
 0x7e4   :  { %3154 = vst [vmem:[#allocation26 + $0x30] sm:$0xff] %v3600_v59 }
 0x853   :  { %v2974_v21 = vpop.f32.mrb[12].mxu1 }
 0x854   :  { %v3368_v53 = vadd.f32 %v2974_v21, %v2473_v44  ;;  %v2976_v50 = vpop.f32.mrb[13].mxu1 }
 0x855   :  { %v3369_v31 = vadd.f32 %v2976_v50, %v2477_v47  ;;  %v2978_v46 = vpop.f32.mrb[14].mxu1 }
 0x856   :  { %3601 = vtanh.f32 %v3368_v53  ;;  %v2979_v57 = vpop.f32.mrb[15].mxu1 }
 0x857   :  { %3603 = vtanh.f32 %v3369_v31 }
 0x860   :  { %v3602_v56 = vpop.eup %3601 }
 0x861   :  { %v3604_v18 = vpop.eup %3603  ;;  %3152 = vst [vmem:[#allocation26 + $0x20] sm:$0xff] %v3602_v56 }
 0x862   :  { %3153 = vst [vmem:[#allocation26 + $0x28] sm:$0xff] %v3604_v18 }
 0x863   :  { %3902 = shalt.err (!%p3899_p10)
}
 0x864   :  { %s4500_s2 = sld [smem:[#allocation41_spill]] }
 0x86a   :  { %s3903_s11 = scalar_lea.hbm %s4500_s2, 896 }
 0x86b   :  { %p3904_p11 = scmp.ne.s32.totalorder %s4500_s2, %s3903_s11  ;;  %p3907_p12 = scmp.lt.u32.totalorder %s3903_s11, %s4500_s2 }
 0x86d   :  { %p3909_p13 = pnand %p3907_p12, %p3904_p11 }
 0x86f   :  { %3912 = shalt.err (!%p3909_p13)
}
 0x870   :  { %3164 = dma.vmem_to_hbm [thread:$0]  %s3162_s28, 896, %s4500_s2, [#allocation7]  }
 0x871   :  { %3931 = dma.done.wait [#allocation7], 896  }
 0x872   :  { %3932 = vsyncadd [#allocation7], 4294966400 }
 0x873   :  { %3168 = vsyncpa [#allocation6], 1 }
 0x874   :  { %3169 = vsyncpa [#allocation9], 1 }
 0x875   :  { %3170 = vsyncpa [#allocation12], 1 }
 0x876   :  { %3171 = vsyncpa [#allocation15], 1 }
 0x877   :  { %3172 = vsyncpa [#allocation18], 1 }
 0x878   :  { %3173 = vsyncpa [#allocation21], 1 }
 0x879   :  { %3174 = vsyncpa [#allocation24], 1 }
 0x87a   :  { %3175 = vsyncpa [#allocation7], 1 }
 0x87b   :  { %3176 = vsyncmov [#allocation4] }
 0x87e   :  { %s3177_s16 = vpop.sfrf %3176 }
 0x87f   :  { %p3266_p0 = scmp.ne.s32.totalorder %s3177_s16, 0 }
 0x881   :  { %3181 = shalt.err (%p3266_p0)  }
 0x882   :  { %3183 = vsyncmov [#allocation4 + $0x1] }
 0x885   :  { %s3184_s30 = vpop.sfrf %3183 }
 0x886   :  { %p3267_p1 = scmp.ne.s32.totalorder %s3184_s30, 0 }
 0x888   :  { %3188 = shalt.err (%p3267_p1)  }

</bundles_post_ra>
